<compile_context>
chip_gen: v7x
topology: tpu7x:2x2x1
jax: 0.10.0
libtpu: 0.0.40
codegen_flags: <defaults>
</compile_context>

<pallas_src>
import functools

import jax
import jax.numpy as jnp
from jax import lax
from jax.experimental import pallas as pl
from jax.experimental.pallas import tpu as pltpu

NEG_SLOPE = 0.2
EPS = 1e-5


def downconv_kernel(x_ref, sel_ref, dw_ref, pm_ref, pwa_ref, o_ref, *, C, Ho, Wo, Nb):
    f32 = jnp.float32
    CHo = C * Ho          # rows per image in the working (rows, Wo) layout
    R = Nb * CHo          # rows per grid step (Nb images stacked along sublanes)

    # ---------------- hoisted constant loads ----------------
    se = sel_ref[0]                     # (W, Wo)  0/1 selector: even columns
    so = sel_ref[1]                     # (W, Wo)  0/1 selector: odd columns
    w1 = dw_ref[0]                      # (9, R, 1) depthwise taps, branch 1 (tap = ky*3+kx)
    w2 = dw_ref[1]                      # (9, R, 1) depthwise taps, branch 2
    pm = pm_ref[...]                    # (CHo, CHo) per-channel mean projector (block diag)
    a1 = [pwa_ref[0, dc] for dc in range(C)]   # pointwise per-row coeffs, branch 1, (CHo, 1)
    a2 = [pwa_ref[1, dc] for dc in range(C)]   # pointwise per-row coeffs, branch 2

    # ------- even / odd image rows for the whole stacked block: sublane stride-2 views -------
    # x_ref row j = n*(C*H) + c*H + h; j even <=> h even, and j//2 = n*CHo + c*Ho + h//2.
    xe = x_ref[pl.ds(0, R, stride=2), :]        # (R, W): x[n, c, 2p, :]
    xo = x_ref[pl.ds(1, R, stride=2), :]        # (R, W): x[n, c, 2p+1, :]

    # ------- 2x2 phase decomposition: stride-2 column gather as exact 0/1 MXU matmuls -------
    ee = jnp.dot(xe, se, preferred_element_type=f32)    # x[n, c, 2p,   2q]
    eo = jnp.dot(xe, so, preferred_element_type=f32)    # x[n, c, 2p,   2q+1]
    oe = jnp.dot(xo, se, preferred_element_type=f32)    # x[n, c, 2p+1, 2q]
    oo = jnp.dot(xo, so, preferred_element_type=f32)    # x[n, c, 2p+1, 2q+1]

    # ------- zero-padded halo helpers: XLU rolls + boundary masks (no matmuls) -------
    col = lax.broadcasted_iota(jnp.int32, (R, Wo), 1)
    row = lax.broadcasted_iota(jnp.int32, (R, Wo), 0)
    p_idx = row % Ho                                    # spatial row within its channel/image
    not_lft = col != 0
    not_rgt = col != Wo - 1
    not_top = p_idx != 0
    not_bot = p_idx != Ho - 1

    def from_left(a):    # a[p, q-1], zero at q == 0
        return jnp.where(not_lft, pltpu.roll(a, 1, 1), 0.0)

    def from_right(a):   # a[p, q+1], zero at q == Wo-1
        return jnp.where(not_rgt, pltpu.roll(a, Wo - 1, 1), 0.0)

    def from_above(a):   # a[p-1, q], zero at top row of each channel (sublane roll + mask)
        return jnp.where(not_top, pltpu.roll(a, 1, 0), 0.0)

    def from_below(a):   # a[p+1, q], zero at bottom row of each channel
        return jnp.where(not_bot, pltpu.roll(a, R - 1, 0), 0.0)

    # ---------------- branch 1: depthwise 3x3, stride 2, pad 1 (stacked over Nb) ----------------
    oo_l = from_left(oo)
    acc1 = (w1[0] * from_above(oo_l) + w1[1] * from_above(oe) + w1[2] * from_above(oo)
            + w1[3] * from_left(eo) + w1[4] * ee + w1[5] * eo
            + w1[6] * oo_l + w1[7] * oe + w1[8] * oo)

    # ------ branch 2: bilinear 0.5x (2x2 mean) + depthwise 3x3, stride 1, pad 1 ------
    d = 0.25 * (ee + eo + oe + oo)                      # (R, Wo) downsampled image
    d_a, d_b = from_above(d), from_below(d)
    acc2 = (w2[0] * from_left(d_a) + w2[1] * d_a + w2[2] * from_right(d_a)
            + w2[3] * from_left(d) + w2[4] * d + w2[5] * from_right(d)
            + w2[6] * from_left(d_b) + w2[7] * d_b + w2[8] * from_right(d_b))

    # ---------------- per-image InstanceNorm + LeakyReLU + pointwise ----------------
    li2 = lax.broadcasted_iota(jnp.int32, (CHo, 2), 1)

    def inorm_lrelu(v):
        # one-pass InstanceNorm (biased var, eps=1e-5) + LeakyReLU(0.2).
        # rs/rss are packed into one (CHo, 2) operand -> a single block-diag matmul per call.
        rs = jnp.sum(v, axis=1, keepdims=True)                       # (CHo, 1)
        rss = jnp.sum(v * v, axis=1, keepdims=True)                  # (CHo, 1)
        st = jnp.dot(pm, jnp.where(li2 == 0, rs, rss),
                     preferred_element_type=f32)                     # (CHo, 2) = [mean, E[x^2]]
        mean = st[:, 0:1]
        var = jnp.maximum(st[:, 1:2] - mean * mean, 0.0)
        y = (v - mean) * lax.rsqrt(var + EPS)
        return jnp.where(y >= 0, y, NEG_SLOPE * y)

    def pointwise(y, coeffs):
        # z[c*Ho+p] = sum_ci pw[c, ci] * y[ci*Ho+p]; expressed as C channel-cyclic sublane
        # rolls with per-row coefficients (exact f32, no kron(pw, I_Ho) matmul).
        z = coeffs[0] * y
        for dc in range(1, C):
            z = z + coeffs[dc] * pltpu.roll(y, dc * Ho, 0)
        return z

    for n in range(Nb):
        lo = n * CHo
        hi = lo + CHo
        out1 = inorm_lrelu(pointwise(inorm_lrelu(acc1[lo:hi, :]), a1))
        out2 = inorm_lrelu(pointwise(inorm_lrelu(acc2[lo:hi, :]), a2))
        o_ref[pl.ds(lo, CHo), :] = (out1 + out2).astype(o_ref.dtype)


@jax.jit
def downconv(x, dw1, pw1, dw2, pw2):
    """x: (N, C, H, W) f32 NCHW.  dw*: (C,3,3) depthwise weights, pw*: (Cout, Cin) pointwise."""
    N, C, H, W = x.shape
    assert H % 2 == 0 and W % 2 == 0
    Ho, Wo = H // 2, W // 2
    CHo = C * Ho
    f32 = jnp.float32

    # ---- per-step batching: amortize the ~0.35us per-grid-step overhead by stacking Nb
    # images along the sublane/row axis, keeping >= 2 grid steps when possible (megacore).
    per_img_bytes = C * H * W * 4
    Nb = 1
    for nb in range(1, N + 1):
        if N % nb == 0 and nb * per_img_bytes <= (1 << 20) and (N // nb) >= min(N, 2):
            Nb = nb
    R = Nb * CHo
    G = N // Nb

    # Free (contiguous) reshape: per grid step, rows = (n_in_block, c, h).
    x_r = x.astype(f32).reshape(G, Nb * C * H, W)

    # 0/1 column-phase selectors (exact in f32 -> gather is bit-exact).
    cols = jnp.arange(W)[:, None]
    outc = jnp.arange(Wo)[None, :]
    sel = jnp.stack([(cols == 2 * outc).astype(f32),
                     (cols == 2 * outc + 1).astype(f32)], axis=0)        # (2, W, Wo)

    # Depthwise taps -> per-row coefficient vectors on the stacked (R, Wo) layout.
    def prep_dw(w):
        t = jnp.transpose(w, (1, 2, 0)).reshape(9, C)                    # tap t = ky*3 + kx
        t = jnp.repeat(t, Ho, axis=1)                                    # (9, CHo)
        return jnp.tile(t, (1, Nb))[:, :, None].astype(f32)              # (9, R, 1)
    dwp = jnp.stack([prep_dw(dw1), prep_dw(dw2)], axis=0)                # (2, 9, R, 1)

    # Per-channel mean projector (block diagonal, per image): mean over (Ho, Wo).
    pm = jnp.kron(jnp.eye(C, dtype=f32),
                  jnp.full((Ho, Ho), 1.0 / (Ho * Wo), f32))              # (CHo, CHo)

    # Pointwise coefficients for the channel-roll formulation:
    #   A[b, dc, c*Ho + p] = pw_b[c, (c - dc) % C]
    cidx = jnp.arange(C)
    def prep_pw(pw):
        gath = pw.astype(f32)[cidx[None, :], (cidx[None, :] - cidx[:, None]) % C]  # (dc, c)
        return jnp.repeat(gath, Ho, axis=1)[:, :, None]                            # (C, CHo, 1)
    pwa = jnp.stack([prep_pw(pw1), prep_pw(pw2)], axis=0)                # (2, C, CHo, 1)

    # VMEM budget from the actual footprint (double-buffered I/O + constants + live f32
    # intermediates), clamped below v7x's 64 MiB physical VMEM.
    in_bytes = Nb * C * H * W * 4
    out_bytes = R * Wo * 4
    const_bytes = (sel.size + dwp.size + pm.size + pwa.size) * 4
    scratch_guess = 24 * R * Wo * 4 + 4 * R * W * 4
    vmem_limit = int(min(56 * 2**20,
                         max(16 * 2**20,
                             2 * (in_bytes + out_bytes + const_bytes) + scratch_guess)))

    kernel = functools.partial(downconv_kernel, C=C, Ho=Ho, Wo=Wo, Nb=Nb)
    out = pl.pallas_call(
        kernel,
        out_shape=jax.ShapeDtypeStruct((G, R, Wo), f32),
        grid_spec=pltpu.PrefetchScalarGridSpec(
            num_scalar_prefetch=0,
            grid=(G,),
            in_specs=[
                pl.BlockSpec((None, Nb * C * H, W), lambda b: (b, 0, 0)),
                pl.BlockSpec((2, W, Wo), lambda b: (0, 0, 0)),
                pl.BlockSpec((2, 9, R, 1), lambda b: (0, 0, 0, 0)),
                pl.BlockSpec((CHo, CHo), lambda b: (0, 0)),
                pl.BlockSpec((2, C, CHo, 1), lambda b: (0, 0, 0, 0)),
            ],
            out_specs=pl.BlockSpec((None, R, Wo), lambda b: (b, 0, 0)),
        ),
        compiler_params=pltpu.CompilerParams(
            dimension_semantics=("parallel",),     # batch axis; uses both TCs on v7x
            vmem_limit_bytes=vmem_limit,
        ),
    )(x_r, sel, dwp, pm, pwa)

    # Free reshape back to NCHW: (G, Nb*C*Ho, Wo) row-major == (N, C, Ho, Wo) row-major.
    return out.reshape(N, C, Ho, Wo)


# ---------------- pure-JAX reference (mirrors PyTorch semantics) ----------------
def downconv_ref(x, dw1, pw1, dw2, pw2):
    C = x.shape[1]

    def depthwise(xx, w, stride):
        return lax.conv_general_dilated(
            xx, w[:, None, :, :], (stride, stride), ((1, 1), (1, 1)),
            dimension_numbers=("NCHW", "OIHW", "NCHW"),
            feature_group_count=C, precision=lax.Precision.HIGHEST)

    def pointwise(xx, w):
        return lax.conv_general_dilated(
            xx, w[:, :, None, None], (1, 1), "VALID",
            dimension_numbers=("NCHW", "OIHW", "NCHW"),
            precision=lax.Precision.HIGHEST)

    def inorm(xx):
        m = xx.mean(axis=(2, 3), keepdims=True)
        v = ((xx - m) ** 2).mean(axis=(2, 3), keepdims=True)
        return (xx - m) / jnp.sqrt(v + EPS)

    def lrelu(xx):
        return jnp.where(xx >= 0, xx, NEG_SLOPE * xx)

    def sep(xx, dw, pw, stride):
        y = lrelu(inorm(depthwise(xx, dw, stride)))
        return lrelu(inorm(pointwise(y, pw)))

    o1 = sep(x, dw1, pw1, 2)
    x2 = 0.25 * (x[:, :, 0::2, 0::2] + x[:, :, 0::2, 1::2]
                 + x[:, :, 1::2, 0::2] + x[:, :, 1::2, 1::2])  # bilinear 0.5x == 2x2 mean
    o2 = sep(x2, dw2, pw2, 1)
    return o1 + o2


if __name__ == "__main__":
    key = jax.random.PRNGKey(0)
    k1, k2, k3, k4, k5 = jax.random.split(key, 5)
    N, C, H, W = 2, 4, 16, 16

    x = jax.random.normal(k1, (N, C, H, W), jnp.float32)
    # deterministic synthetic parameters (bias=False everywhere in the module)
    dw1 = jax.random.normal(k2, (C, 3, 3), jnp.float32) * 0.2   # depthwise weight of conv1
    pw1 = jax.random.normal(k3, (C, C), jnp.float32) * 0.2      # pointwise weight (Cout, Cin)
    dw2 = jax.random.normal(k4, (C, 3, 3), jnp.float32) * 0.2
    pw2 = jax.random.normal(k5, (C, C), jnp.float32) * 0.2

    out = jax.block_until_ready(downconv(x, dw1, pw1, dw2, pw2))
    assert out.shape == (N, C, H // 2, W // 2), out.shape

    ref = jax.block_until_ready(downconv_ref(x, dw1, pw1, dw2, pw2))
    max_err = float(jnp.max(jnp.abs(out - ref)))
    assert max_err < 5e-2, f"mismatch vs reference: max_err={max_err}"

    print("KERNEL_OK")
</pallas_src>

<mosaic_0001>
module attributes {stable_mosaic.version = 11 : i64} {
  func.func @downconv_kernel(%arg0: i32, %arg1: memref<1x64x16xf32, #tpu.memory_space<vmem>>, %arg2: memref<2x16x8xf32, #tpu.memory_space<vmem>>, %arg3: memref<2x9x32x1xf32, #tpu.memory_space<vmem>>, %arg4: memref<32x32xf32, #tpu.memory_space<vmem>>, %arg5: memref<2x4x32x1xf32, #tpu.memory_space<vmem>>, %arg6: memref<1x32x8xf32, #tpu.memory_space<vmem>>) attributes {dimension_semantics = [#tpu.dimension_semantics<parallel>], iteration_bounds = array<i64: 2>, scalar_prefetch = 0 : i64, scratch_operands = 0 : i64, tpu.core_type = #tpu.core_type<tc>, window_params = [{transform_indices = @transform_0, window_bounds = array<i64: 1, 64, 16>}, {pipeline_mode = #tpu.pipeline_mode<synchronous>, transform_indices = @transform_1, window_bounds = array<i64: 2, 16, 8>}, {pipeline_mode = #tpu.pipeline_mode<synchronous>, transform_indices = @transform_2, window_bounds = array<i64: 2, 9, 32, 1>}, {pipeline_mode = #tpu.pipeline_mode<synchronous>, transform_indices = @transform_3, window_bounds = array<i64: 32, 32>}, {pipeline_mode = #tpu.pipeline_mode<synchronous>, transform_indices = @transform_4, window_bounds = array<i64: 2, 4, 32, 1>}, {transform_indices = @transform_5, window_bounds = array<i64: 1, 32, 8>}]} {
    %c0 = arith.constant 0 : index
    %c0_0 = arith.constant 0 : index
    %c0_1 = arith.constant 0 : index
    %0 = vector.load %arg2[%c0, %c0_0, %c0_1] : memref<2x16x8xf32, #tpu.memory_space<vmem>>, vector<1x16x8xf32>
    %1 = vector.shape_cast %0 : vector<1x16x8xf32> to vector<16x8xf32>
    %c1 = arith.constant 1 : index
    %c0_2 = arith.constant 0 : index
    %c0_3 = arith.constant 0 : index
    %2 = vector.load %arg2[%c1, %c0_2, %c0_3] : memref<2x16x8xf32, #tpu.memory_space<vmem>>, vector<1x16x8xf32>
    %3 = vector.shape_cast %2 : vector<1x16x8xf32> to vector<16x8xf32>
    %c0_4 = arith.constant 0 : index
    %c0_5 = arith.constant 0 : index
    %c0_6 = arith.constant 0 : index
    %c0_7 = arith.constant 0 : index
    %4 = vector.load %arg3[%c0_4, %c0_5, %c0_6, %c0_7] : memref<2x9x32x1xf32, #tpu.memory_space<vmem>>, vector<1x9x32x1xf32>
    %5 = vector.shape_cast %4 : vector<1x9x32x1xf32> to vector<9x32x1xf32>
    %c1_8 = arith.constant 1 : index
    %c0_9 = arith.constant 0 : index
    %c0_10 = arith.constant 0 : index
    %c0_11 = arith.constant 0 : index
    %6 = vector.load %arg3[%c1_8, %c0_9, %c0_10, %c0_11] : memref<2x9x32x1xf32, #tpu.memory_space<vmem>>, vector<1x9x32x1xf32>
    %7 = vector.shape_cast %6 : vector<1x9x32x1xf32> to vector<9x32x1xf32>
    %c0_12 = arith.constant 0 : index
    %c0_13 = arith.constant 0 : index
    %8 = vector.load %arg4[%c0_12, %c0_13] : memref<32x32xf32, #tpu.memory_space<vmem>>, vector<32x32xf32>
    %c0_14 = arith.constant 0 : index
    %c0_15 = arith.constant 0 : index
    %c0_16 = arith.constant 0 : index
    %c0_17 = arith.constant 0 : index
    %9 = vector.load %arg5[%c0_14, %c0_15, %c0_16, %c0_17] : memref<2x4x32x1xf32, #tpu.memory_space<vmem>>, vector<1x1x32x1xf32>
    %10 = vector.shape_cast %9 : vector<1x1x32x1xf32> to vector<32x1xf32>
    %c0_18 = arith.constant 0 : index
    %c1_19 = arith.constant 1 : index
    %c0_20 = arith.constant 0 : index
    %c0_21 = arith.constant 0 : index
    %11 = vector.load %arg5[%c0_18, %c1_19, %c0_20, %c0_21] : memref<2x4x32x1xf32, #tpu.memory_space<vmem>>, vector<1x1x32x1xf32>
    %12 = vector.shape_cast %11 : vector<1x1x32x1xf32> to vector<32x1xf32>
    %c0_22 = arith.constant 0 : index
    %c2 = arith.constant 2 : index
    %c0_23 = arith.constant 0 : index
    %c0_24 = arith.constant 0 : index
    %13 = vector.load %arg5[%c0_22, %c2, %c0_23, %c0_24] : memref<2x4x32x1xf32, #tpu.memory_space<vmem>>, vector<1x1x32x1xf32>
    %14 = vector.shape_cast %13 : vector<1x1x32x1xf32> to vector<32x1xf32>
    %c0_25 = arith.constant 0 : index
    %c3 = arith.constant 3 : index
    %c0_26 = arith.constant 0 : index
    %c0_27 = arith.constant 0 : index
    %15 = vector.load %arg5[%c0_25, %c3, %c0_26, %c0_27] : memref<2x4x32x1xf32, #tpu.memory_space<vmem>>, vector<1x1x32x1xf32>
    %16 = vector.shape_cast %15 : vector<1x1x32x1xf32> to vector<32x1xf32>
    %c1_28 = arith.constant 1 : index
    %c0_29 = arith.constant 0 : index
    %c0_30 = arith.constant 0 : index
    %c0_31 = arith.constant 0 : index
    %17 = vector.load %arg5[%c1_28, %c0_29, %c0_30, %c0_31] : memref<2x4x32x1xf32, #tpu.memory_space<vmem>>, vector<1x1x32x1xf32>
    %18 = vector.shape_cast %17 : vector<1x1x32x1xf32> to vector<32x1xf32>
    %c1_32 = arith.constant 1 : index
    %c1_33 = arith.constant 1 : index
    %c0_34 = arith.constant 0 : index
    %c0_35 = arith.constant 0 : index
    %19 = vector.load %arg5[%c1_32, %c1_33, %c0_34, %c0_35] : memref<2x4x32x1xf32, #tpu.memory_space<vmem>>, vector<1x1x32x1xf32>
    %20 = vector.shape_cast %19 : vector<1x1x32x1xf32> to vector<32x1xf32>
    %c1_36 = arith.constant 1 : index
    %c2_37 = arith.constant 2 : index
    %c0_38 = arith.constant 0 : index
    %c0_39 = arith.constant 0 : index
    %21 = vector.load %arg5[%c1_36, %c2_37, %c0_38, %c0_39] : memref<2x4x32x1xf32, #tpu.memory_space<vmem>>, vector<1x1x32x1xf32>
    %22 = vector.shape_cast %21 : vector<1x1x32x1xf32> to vector<32x1xf32>
    %c1_40 = arith.constant 1 : index
    %c3_41 = arith.constant 3 : index
    %c0_42 = arith.constant 0 : index
    %c0_43 = arith.constant 0 : index
    %23 = vector.load %arg5[%c1_40, %c3_41, %c0_42, %c0_43] : memref<2x4x32x1xf32, #tpu.memory_space<vmem>>, vector<1x1x32x1xf32>
    %24 = vector.shape_cast %23 : vector<1x1x32x1xf32> to vector<32x1xf32>
    %c0_44 = arith.constant 0 : index
    %c0_45 = arith.constant 0 : index
    %c0_46 = arith.constant 0 : index
    %25 = tpu.strided_load %arg1[%c0_44, %c0_45, %c0_46] {strides = array<i32: 1, 2, 1>} : memref<1x64x16xf32, #tpu.memory_space<vmem>>, vector<1x32x16xf32>
    %26 = vector.shape_cast %25 : vector<1x32x16xf32> to vector<32x16xf32>
    %c0_47 = arith.constant 0 : index
    %c1_48 = arith.constant 1 : index
    %c0_49 = arith.constant 0 : index
    %27 = tpu.strided_load %arg1[%c0_47, %c1_48, %c0_49] {strides = array<i32: 1, 2, 1>} : memref<1x64x16xf32, #tpu.memory_space<vmem>>, vector<1x32x16xf32>
    %28 = vector.shape_cast %27 : vector<1x32x16xf32> to vector<32x16xf32>
    %cst = arith.constant dense<0.000000e+00> : vector<32x8xf32>
    %29 = tpu.matmul %26, %1, %cst {dimension_numbers = #tpu.dot_dimension_numbers<[1], [0], [0], [1], [0, 0, 1, 1], [], []>} : vector<32x16xf32>, vector<16x8xf32>, vector<32x8xf32> -> vector<32x8xf32>
    %cst_50 = arith.constant dense<0.000000e+00> : vector<32x8xf32>
    %30 = tpu.matmul %26, %3, %cst_50 {dimension_numbers = #tpu.dot_dimension_numbers<[1], [0], [0], [1], [0, 0, 1, 1], [], []>} : vector<32x16xf32>, vector<16x8xf32>, vector<32x8xf32> -> vector<32x8xf32>
    %cst_51 = arith.constant dense<0.000000e+00> : vector<32x8xf32>
    %31 = tpu.matmul %28, %1, %cst_51 {dimension_numbers = #tpu.dot_dimension_numbers<[1], [0], [0], [1], [0, 0, 1, 1], [], []>} : vector<32x16xf32>, vector<16x8xf32>, vector<32x8xf32> -> vector<32x8xf32>
    %cst_52 = arith.constant dense<0.000000e+00> : vector<32x8xf32>
    %32 = tpu.matmul %28, %3, %cst_52 {dimension_numbers = #tpu.dot_dimension_numbers<[1], [0], [0], [1], [0, 0, 1, 1], [], []>} : vector<32x16xf32>, vector<16x8xf32>, vector<32x8xf32> -> vector<32x8xf32>
    %33 = tpu.iota {dimensions = array<i32: 1>} : vector<32x8xi32>
    %34 = tpu.iota {dimensions = array<i32: 0>} : vector<32x8xi32>
    %c8_i32 = arith.constant 8 : i32
    %c0_i32 = arith.constant 0 : i32
    %35 = arith.cmpi eq, %c8_i32, %c0_i32 : i32
    %c1_i32 = arith.constant 1 : i32
    %36 = arith.select %35, %c1_i32, %c8_i32 : i32
    %37 = vector.broadcast %36 : i32 to vector<32x8xi32>
    %38 = arith.remsi %34, %37 : vector<32x8xi32>
    %c0_i32_53 = arith.constant 0 : i32
    %39 = vector.broadcast %c0_i32_53 : i32 to vector<32x8xi32>
    %40 = arith.cmpi ne, %38, %39 : vector<32x8xi32>
    %c0_i32_54 = arith.constant 0 : i32
    %41 = vector.broadcast %c0_i32_54 : i32 to vector<32x8xi32>
    %42 = arith.cmpi slt, %38, %41 : vector<32x8xi32>
    %c0_i32_55 = arith.constant 0 : i32
    %43 = arith.cmpi slt, %36, %c0_i32_55 : i32
    %44 = vector.broadcast %43 : i1 to vector<32x8xi1>
    %45 = vector.broadcast %44 : vector<32x8xi1> to vector<32x8xi1>
    %46 = arith.xori %42, %45 : vector<32x8xi1>
    %47 = arith.andi %46, %40 : vector<32x8xi1>
    %48 = vector.broadcast %36 : i32 to vector<32x8xi32>
    %49 = arith.addi %38, %48 : vector<32x8xi32>
    %50 = arith.select %47, %49, %38 : vector<32x8xi1>, vector<32x8xi32>
    %c0_i32_56 = arith.constant 0 : i32
    %51 = vector.broadcast %c0_i32_56 : i32 to vector<32x8xi32>
    %52 = arith.cmpi ne, %33, %51 : vector<32x8xi32>
    %c7_i32 = arith.constant 7 : i32
    %53 = vector.broadcast %c7_i32 : i32 to vector<32x8xi32>
    %54 = arith.cmpi ne, %33, %53 : vector<32x8xi32>
    %c0_i32_57 = arith.constant 0 : i32
    %55 = vector.broadcast %c0_i32_57 : i32 to vector<32x8xi32>
    %56 = arith.cmpi ne, %50, %55 : vector<32x8xi32>
    %c7_i32_58 = arith.constant 7 : i32
    %57 = vector.broadcast %c7_i32_58 : i32 to vector<32x8xi32>
    %58 = arith.cmpi ne, %50, %57 : vector<32x8xi32>
    %c1_i32_59 = arith.constant 1 : i32
    %59 = tpu.dynamic_rotate %32 by %c1_i32_59 dim 1 : vector<32x8xf32>, i32 -> vector<32x8xf32>
    %cst_60 = arith.constant 0.000000e+00 : f32
    %60 = vector.broadcast %cst_60 : f32 to vector<32x8xf32>
    %61 = arith.select %52, %59, %60 : vector<32x8xi1>, vector<32x8xf32>
    %62 = vector.extract_strided_slice %5 {offsets = [0, 0, 0], sizes = [1, 32, 1], strides = [1, 1, 1]} : vector<9x32x1xf32> to vector<1x32x1xf32>
    %63 = vector.shape_cast %62 : vector<1x32x1xf32> to vector<32x1xf32>
    %c1_i32_61 = arith.constant 1 : i32
    %64 = tpu.dynamic_rotate %61 by %c1_i32_61 dim 0 : vector<32x8xf32>, i32 -> vector<32x8xf32>
    %cst_62 = arith.constant 0.000000e+00 : f32
    %65 = vector.broadcast %cst_62 : f32 to vector<32x8xf32>
    %66 = arith.select %56, %64, %65 : vector<32x8xi1>, vector<32x8xf32>
    %67 = vector.broadcast %63 : vector<32x1xf32> to vector<32x8xf32>
    %68 = arith.mulf %67, %66 : vector<32x8xf32>
    %69 = vector.extract_strided_slice %5 {offsets = [1, 0, 0], sizes = [1, 32, 1], strides = [1, 1, 1]} : vector<9x32x1xf32> to vector<1x32x1xf32>
    %70 = vector.shape_cast %69 : vector<1x32x1xf32> to vector<32x1xf32>
    %c1_i32_63 = arith.constant 1 : i32
    %71 = tpu.dynamic_rotate %31 by %c1_i32_63 dim 0 : vector<32x8xf32>, i32 -> vector<32x8xf32>
    %cst_64 = arith.constant 0.000000e+00 : f32
    %72 = vector.broadcast %cst_64 : f32 to vector<32x8xf32>
    %73 = arith.select %56, %71, %72 : vector<32x8xi1>, vector<32x8xf32>
    %74 = vector.broadcast %70 : vector<32x1xf32> to vector<32x8xf32>
    %75 = arith.mulf %74, %73 : vector<32x8xf32>
    %76 = arith.addf %68, %75 : vector<32x8xf32>
    %77 = vector.extract_strided_slice %5 {offsets = [2, 0, 0], sizes = [1, 32, 1], strides = [1, 1, 1]} : vector<9x32x1xf32> to vector<1x32x1xf32>
    %78 = vector.shape_cast %77 : vector<1x32x1xf32> to vector<32x1xf32>
    %c1_i32_65 = arith.constant 1 : i32
    %79 = tpu.dynamic_rotate %32 by %c1_i32_65 dim 0 : vector<32x8xf32>, i32 -> vector<32x8xf32>
    %cst_66 = arith.constant 0.000000e+00 : f32
    %80 = vector.broadcast %cst_66 : f32 to vector<32x8xf32>
    %81 = arith.select %56, %79, %80 : vector<32x8xi1>, vector<32x8xf32>
    %82 = vector.broadcast %78 : vector<32x1xf32> to vector<32x8xf32>
    %83 = arith.mulf %82, %81 : vector<32x8xf32>
    %84 = arith.addf %76, %83 : vector<32x8xf32>
    %85 = vector.extract_strided_slice %5 {offsets = [3, 0, 0], sizes = [1, 32, 1], strides = [1, 1, 1]} : vector<9x32x1xf32> to vector<1x32x1xf32>
    %86 = vector.shape_cast %85 : vector<1x32x1xf32> to vector<32x1xf32>
    %c1_i32_67 = arith.constant 1 : i32
    %87 = tpu.dynamic_rotate %30 by %c1_i32_67 dim 1 : vector<32x8xf32>, i32 -> vector<32x8xf32>
    %cst_68 = arith.constant 0.000000e+00 : f32
    %88 = vector.broadcast %cst_68 : f32 to vector<32x8xf32>
    %89 = arith.select %52, %87, %88 : vector<32x8xi1>, vector<32x8xf32>
    %90 = vector.broadcast %86 : vector<32x1xf32> to vector<32x8xf32>
    %91 = arith.mulf %90, %89 : vector<32x8xf32>
    %92 = arith.addf %84, %91 : vector<32x8xf32>
    %93 = vector.extract_strided_slice %5 {offsets = [4, 0, 0], sizes = [1, 32, 1], strides = [1, 1, 1]} : vector<9x32x1xf32> to vector<1x32x1xf32>
    %94 = vector.shape_cast %93 : vector<1x32x1xf32> to vector<32x1xf32>
    %95 = vector.broadcast %94 : vector<32x1xf32> to vector<32x8xf32>
    %96 = arith.mulf %95, %29 : vector<32x8xf32>
    %97 = arith.addf %92, %96 : vector<32x8xf32>
    %98 = vector.extract_strided_slice %5 {offsets = [5, 0, 0], sizes = [1, 32, 1], strides = [1, 1, 1]} : vector<9x32x1xf32> to vector<1x32x1xf32>
    %99 = vector.shape_cast %98 : vector<1x32x1xf32> to vector<32x1xf32>
    %100 = vector.broadcast %99 : vector<32x1xf32> to vector<32x8xf32>
    %101 = arith.mulf %100, %30 : vector<32x8xf32>
    %102 = arith.addf %97, %101 : vector<32x8xf32>
    %103 = vector.extract_strided_slice %5 {offsets = [6, 0, 0], sizes = [1, 32, 1], strides = [1, 1, 1]} : vector<9x32x1xf32> to vector<1x32x1xf32>
    %104 = vector.shape_cast %103 : vector<1x32x1xf32> to vector<32x1xf32>
    %105 = vector.broadcast %104 : vector<32x1xf32> to vector<32x8xf32>
    %106 = arith.mulf %105, %61 : vector<32x8xf32>
    %107 = arith.addf %102, %106 : vector<32x8xf32>
    %108 = vector.extract_strided_slice %5 {offsets = [7, 0, 0], sizes = [1, 32, 1], strides = [1, 1, 1]} : vector<9x32x1xf32> to vector<1x32x1xf32>
    %109 = vector.shape_cast %108 : vector<1x32x1xf32> to vector<32x1xf32>
    %110 = vector.broadcast %109 : vector<32x1xf32> to vector<32x8xf32>
    %111 = arith.mulf %110, %31 : vector<32x8xf32>
    %112 = arith.addf %107, %111 : vector<32x8xf32>
    %113 = vector.extract_strided_slice %5 {offsets = [8, 0, 0], sizes = [1, 32, 1], strides = [1, 1, 1]} : vector<9x32x1xf32> to vector<1x32x1xf32>
    %114 = vector.shape_cast %113 : vector<1x32x1xf32> to vector<32x1xf32>
    %115 = vector.broadcast %114 : vector<32x1xf32> to vector<32x8xf32>
    %116 = arith.mulf %115, %32 : vector<32x8xf32>
    %117 = arith.addf %112, %116 : vector<32x8xf32>
    %118 = arith.addf %29, %30 : vector<32x8xf32>
    %119 = arith.addf %118, %31 : vector<32x8xf32>
    %120 = arith.addf %119, %32 : vector<32x8xf32>
    %cst_69 = arith.constant 2.500000e-01 : f32
    %121 = vector.broadcast %cst_69 : f32 to vector<32x8xf32>
    %122 = arith.mulf %121, %120 : vector<32x8xf32>
    %c1_i32_70 = arith.constant 1 : i32
    %123 = tpu.dynamic_rotate %122 by %c1_i32_70 dim 0 : vector<32x8xf32>, i32 -> vector<32x8xf32>
    %cst_71 = arith.constant 0.000000e+00 : f32
    %124 = vector.broadcast %cst_71 : f32 to vector<32x8xf32>
    %125 = arith.select %56, %123, %124 : vector<32x8xi1>, vector<32x8xf32>
    %c31_i32 = arith.constant 31 : i32
    %126 = tpu.dynamic_rotate %122 by %c31_i32 dim 0 : vector<32x8xf32>, i32 -> vector<32x8xf32>
    %cst_72 = arith.constant 0.000000e+00 : f32
    %127 = vector.broadcast %cst_72 : f32 to vector<32x8xf32>
    %128 = arith.select %58, %126, %127 : vector<32x8xi1>, vector<32x8xf32>
    %129 = vector.extract_strided_slice %7 {offsets = [0, 0, 0], sizes = [1, 32, 1], strides = [1, 1, 1]} : vector<9x32x1xf32> to vector<1x32x1xf32>
    %130 = vector.shape_cast %129 : vector<1x32x1xf32> to vector<32x1xf32>
    %c1_i32_73 = arith.constant 1 : i32
    %131 = tpu.dynamic_rotate %125 by %c1_i32_73 dim 1 : vector<32x8xf32>, i32 -> vector<32x8xf32>
    %cst_74 = arith.constant 0.000000e+00 : f32
    %132 = vector.broadcast %cst_74 : f32 to vector<32x8xf32>
    %133 = arith.select %52, %131, %132 : vector<32x8xi1>, vector<32x8xf32>
    %134 = vector.broadcast %130 : vector<32x1xf32> to vector<32x8xf32>
    %135 = arith.mulf %134, %133 : vector<32x8xf32>
    %136 = vector.extract_strided_slice %7 {offsets = [1, 0, 0], sizes = [1, 32, 1], strides = [1, 1, 1]} : vector<9x32x1xf32> to vector<1x32x1xf32>
    %137 = vector.shape_cast %136 : vector<1x32x1xf32> to vector<32x1xf32>
    %138 = vector.broadcast %137 : vector<32x1xf32> to vector<32x8xf32>
    %139 = arith.mulf %138, %125 : vector<32x8xf32>
    %140 = arith.addf %135, %139 : vector<32x8xf32>
    %141 = vector.extract_strided_slice %7 {offsets = [2, 0, 0], sizes = [1, 32, 1], strides = [1, 1, 1]} : vector<9x32x1xf32> to vector<1x32x1xf32>
    %142 = vector.shape_cast %141 : vector<1x32x1xf32> to vector<32x1xf32>
    %c7_i32_75 = arith.constant 7 : i32
    %143 = tpu.dynamic_rotate %125 by %c7_i32_75 dim 1 : vector<32x8xf32>, i32 -> vector<32x8xf32>
    %cst_76 = arith.constant 0.000000e+00 : f32
    %144 = vector.broadcast %cst_76 : f32 to vector<32x8xf32>
    %145 = arith.select %54, %143, %144 : vector<32x8xi1>, vector<32x8xf32>
    %146 = vector.broadcast %142 : vector<32x1xf32> to vector<32x8xf32>
    %147 = arith.mulf %146, %145 : vector<32x8xf32>
    %148 = arith.addf %140, %147 : vector<32x8xf32>
    %149 = vector.extract_strided_slice %7 {offsets = [3, 0, 0], sizes = [1, 32, 1], strides = [1, 1, 1]} : vector<9x32x1xf32> to vector<1x32x1xf32>
    %150 = vector.shape_cast %149 : vector<1x32x1xf32> to vector<32x1xf32>
    %c1_i32_77 = arith.constant 1 : i32
    %151 = tpu.dynamic_rotate %122 by %c1_i32_77 dim 1 : vector<32x8xf32>, i32 -> vector<32x8xf32>
    %cst_78 = arith.constant 0.000000e+00 : f32
    %152 = vector.broadcast %cst_78 : f32 to vector<32x8xf32>
    %153 = arith.select %52, %151, %152 : vector<32x8xi1>, vector<32x8xf32>
    %154 = vector.broadcast %150 : vector<32x1xf32> to vector<32x8xf32>
    %155 = arith.mulf %154, %153 : vector<32x8xf32>
    %156 = arith.addf %148, %155 : vector<32x8xf32>
    %157 = vector.extract_strided_slice %7 {offsets = [4, 0, 0], sizes = [1, 32, 1], strides = [1, 1, 1]} : vector<9x32x1xf32> to vector<1x32x1xf32>
    %158 = vector.shape_cast %157 : vector<1x32x1xf32> to vector<32x1xf32>
    %159 = vector.broadcast %158 : vector<32x1xf32> to vector<32x8xf32>
    %160 = arith.mulf %159, %122 : vector<32x8xf32>
    %161 = arith.addf %156, %160 : vector<32x8xf32>
    %162 = vector.extract_strided_slice %7 {offsets = [5, 0, 0], sizes = [1, 32, 1], strides = [1, 1, 1]} : vector<9x32x1xf32> to vector<1x32x1xf32>
    %163 = vector.shape_cast %162 : vector<1x32x1xf32> to vector<32x1xf32>
    %c7_i32_79 = arith.constant 7 : i32
    %164 = tpu.dynamic_rotate %122 by %c7_i32_79 dim 1 : vector<32x8xf32>, i32 -> vector<32x8xf32>
    %cst_80 = arith.constant 0.000000e+00 : f32
    %165 = vector.broadcast %cst_80 : f32 to vector<32x8xf32>
    %166 = arith.select %54, %164, %165 : vector<32x8xi1>, vector<32x8xf32>
    %167 = vector.broadcast %163 : vector<32x1xf32> to vector<32x8xf32>
    %168 = arith.mulf %167, %166 : vector<32x8xf32>
    %169 = arith.addf %161, %168 : vector<32x8xf32>
    %170 = vector.extract_strided_slice %7 {offsets = [6, 0, 0], sizes = [1, 32, 1], strides = [1, 1, 1]} : vector<9x32x1xf32> to vector<1x32x1xf32>
    %171 = vector.shape_cast %170 : vector<1x32x1xf32> to vector<32x1xf32>
    %c1_i32_81 = arith.constant 1 : i32
    %172 = tpu.dynamic_rotate %128 by %c1_i32_81 dim 1 : vector<32x8xf32>, i32 -> vector<32x8xf32>
    %cst_82 = arith.constant 0.000000e+00 : f32
    %173 = vector.broadcast %cst_82 : f32 to vector<32x8xf32>
    %174 = arith.select %52, %172, %173 : vector<32x8xi1>, vector<32x8xf32>
    %175 = vector.broadcast %171 : vector<32x1xf32> to vector<32x8xf32>
    %176 = arith.mulf %175, %174 : vector<32x8xf32>
    %177 = arith.addf %169, %176 : vector<32x8xf32>
    %178 = vector.extract_strided_slice %7 {offsets = [7, 0, 0], sizes = [1, 32, 1], strides = [1, 1, 1]} : vector<9x32x1xf32> to vector<1x32x1xf32>
    %179 = vector.shape_cast %178 : vector<1x32x1xf32> to vector<32x1xf32>
    %180 = vector.broadcast %179 : vector<32x1xf32> to vector<32x8xf32>
    %181 = arith.mulf %180, %128 : vector<32x8xf32>
    %182 = arith.addf %177, %181 : vector<32x8xf32>
    %183 = vector.extract_strided_slice %7 {offsets = [8, 0, 0], sizes = [1, 32, 1], strides = [1, 1, 1]} : vector<9x32x1xf32> to vector<1x32x1xf32>
    %184 = vector.shape_cast %183 : vector<1x32x1xf32> to vector<32x1xf32>
    %c7_i32_83 = arith.constant 7 : i32
    %185 = tpu.dynamic_rotate %128 by %c7_i32_83 dim 1 : vector<32x8xf32>, i32 -> vector<32x8xf32>
    %cst_84 = arith.constant 0.000000e+00 : f32
    %186 = vector.broadcast %cst_84 : f32 to vector<32x8xf32>
    %187 = arith.select %54, %185, %186 : vector<32x8xi1>, vector<32x8xf32>
    %188 = vector.broadcast %184 : vector<32x1xf32> to vector<32x8xf32>
    %189 = arith.mulf %188, %187 : vector<32x8xf32>
    %190 = arith.addf %182, %189 : vector<32x8xf32>
    %191 = tpu.iota {dimensions = array<i32: 1>} : vector<32x2xi32>
    %cst_85 = arith.constant dense<0.000000e+00> : vector<32xf32>
    %192 = vector.multi_reduction <add>, %117, %cst_85 [1] : vector<32x8xf32> to vector<32xf32>
    %193 = vector.shape_cast %192 : vector<32xf32> to vector<32x1xf32>
    %194 = arith.mulf %117, %117 : vector<32x8xf32>
    %cst_86 = arith.constant dense<0.000000e+00> : vector<32xf32>
    %195 = vector.multi_reduction <add>, %194, %cst_86 [1] : vector<32x8xf32> to vector<32xf32>
    %196 = vector.shape_cast %195 : vector<32xf32> to vector<32x1xf32>
    %c0_i32_87 = arith.constant 0 : i32
    %197 = vector.broadcast %c0_i32_87 : i32 to vector<32x2xi32>
    %198 = arith.cmpi eq, %191, %197 : vector<32x2xi32>
    %199 = vector.shape_cast %193 : vector<32x1xf32> to vector<32x1xf32>
    %200 = vector.broadcast %199 : vector<32x1xf32> to vector<32x2xf32>
    %201 = vector.shape_cast %196 : vector<32x1xf32> to vector<32x1xf32>
    %202 = vector.broadcast %201 : vector<32x1xf32> to vector<32x2xf32>
    %203 = arith.select %198, %200, %202 : vector<32x2xi1>, vector<32x2xf32>
    %cst_88 = arith.constant dense<0.000000e+00> : vector<32x2xf32>
    %204 = tpu.matmul %8, %203, %cst_88 {dimension_numbers = #tpu.dot_dimension_numbers<[1], [0], [0], [1], [0, 0, 1, 1], [], []>} : vector<32x32xf32>, vector<32x2xf32>, vector<32x2xf32> -> vector<32x2xf32>
    %205 = vector.extract_strided_slice %204 {offsets = [0, 0], sizes = [32, 1], strides = [1, 1]} : vector<32x2xf32> to vector<32x1xf32>
    %206 = vector.extract_strided_slice %204 {offsets = [0, 1], sizes = [32, 1], strides = [1, 1]} : vector<32x2xf32> to vector<32x1xf32>
    %207 = arith.mulf %205, %205 : vector<32x1xf32>
    %208 = arith.subf %206, %207 : vector<32x1xf32>
    %cst_89 = arith.constant 0.000000e+00 : f32
    %209 = vector.broadcast %cst_89 : f32 to vector<32x1xf32>
    %210 = arith.maximumf %208, %209 : vector<32x1xf32>
    %211 = vector.broadcast %205 : vector<32x1xf32> to vector<32x8xf32>
    %212 = arith.subf %117, %211 : vector<32x8xf32>
    %cst_90 = arith.constant 9.99999974E-6 : f32
    %213 = vector.broadcast %cst_90 : f32 to vector<32x1xf32>
    %214 = arith.addf %210, %213 : vector<32x1xf32>
    %215 = math.rsqrt %214 : vector<32x1xf32>
    %216 = vector.broadcast %215 : vector<32x1xf32> to vector<32x8xf32>
    %217 = arith.mulf %212, %216 : vector<32x8xf32>
    %cst_91 = arith.constant 0.000000e+00 : f32
    %218 = vector.broadcast %cst_91 : f32 to vector<32x8xf32>
    %219 = arith.cmpf oge, %217, %218 : vector<32x8xf32>
    %cst_92 = arith.constant 2.000000e-01 : f32
    %220 = vector.broadcast %cst_92 : f32 to vector<32x8xf32>
    %221 = arith.mulf %220, %217 : vector<32x8xf32>
    %222 = arith.select %219, %217, %221 : vector<32x8xi1>, vector<32x8xf32>
    %223 = vector.broadcast %10 : vector<32x1xf32> to vector<32x8xf32>
    %224 = arith.mulf %223, %222 : vector<32x8xf32>
    %c8_i32_93 = arith.constant 8 : i32
    %225 = tpu.dynamic_rotate %222 by %c8_i32_93 dim 0 : vector<32x8xf32>, i32 -> vector<32x8xf32>
    %226 = vector.broadcast %12 : vector<32x1xf32> to vector<32x8xf32>
    %227 = arith.mulf %226, %225 : vector<32x8xf32>
    %228 = arith.addf %224, %227 : vector<32x8xf32>
    %c16_i32 = arith.constant 16 : i32
    %229 = tpu.dynamic_rotate %222 by %c16_i32 dim 0 : vector<32x8xf32>, i32 -> vector<32x8xf32>
    %230 = vector.broadcast %14 : vector<32x1xf32> to vector<32x8xf32>
    %231 = arith.mulf %230, %229 : vector<32x8xf32>
    %232 = arith.addf %228, %231 : vector<32x8xf32>
    %c24_i32 = arith.constant 24 : i32
    %233 = tpu.dynamic_rotate %222 by %c24_i32 dim 0 : vector<32x8xf32>, i32 -> vector<32x8xf32>
    %234 = vector.broadcast %16 : vector<32x1xf32> to vector<32x8xf32>
    %235 = arith.mulf %234, %233 : vector<32x8xf32>
    %236 = arith.addf %232, %235 : vector<32x8xf32>
    %cst_94 = arith.constant dense<0.000000e+00> : vector<32xf32>
    %237 = vector.multi_reduction <add>, %236, %cst_94 [1] : vector<32x8xf32> to vector<32xf32>
    %238 = vector.shape_cast %237 : vector<32xf32> to vector<32x1xf32>
    %239 = arith.mulf %236, %236 : vector<32x8xf32>
    %cst_95 = arith.constant dense<0.000000e+00> : vector<32xf32>
    %240 = vector.multi_reduction <add>, %239, %cst_95 [1] : vector<32x8xf32> to vector<32xf32>
    %241 = vector.shape_cast %240 : vector<32xf32> to vector<32x1xf32>
    %c0_i32_96 = arith.constant 0 : i32
    %242 = vector.broadcast %c0_i32_96 : i32 to vector<32x2xi32>
    %243 = arith.cmpi eq, %191, %242 : vector<32x2xi32>
    %244 = vector.shape_cast %238 : vector<32x1xf32> to vector<32x1xf32>
    %245 = vector.broadcast %244 : vector<32x1xf32> to vector<32x2xf32>
    %246 = vector.shape_cast %241 : vector<32x1xf32> to vector<32x1xf32>
    %247 = vector.broadcast %246 : vector<32x1xf32> to vector<32x2xf32>
    %248 = arith.select %243, %245, %247 : vector<32x2xi1>, vector<32x2xf32>
    %cst_97 = arith.constant dense<0.000000e+00> : vector<32x2xf32>
    %249 = tpu.matmul %8, %248, %cst_97 {dimension_numbers = #tpu.dot_dimension_numbers<[1], [0], [0], [1], [0, 0, 1, 1], [], []>} : vector<32x32xf32>, vector<32x2xf32>, vector<32x2xf32> -> vector<32x2xf32>
    %250 = vector.extract_strided_slice %249 {offsets = [0, 0], sizes = [32, 1], strides = [1, 1]} : vector<32x2xf32> to vector<32x1xf32>
    %251 = vector.extract_strided_slice %249 {offsets = [0, 1], sizes = [32, 1], strides = [1, 1]} : vector<32x2xf32> to vector<32x1xf32>
    %252 = arith.mulf %250, %250 : vector<32x1xf32>
    %253 = arith.subf %251, %252 : vector<32x1xf32>
    %cst_98 = arith.constant 0.000000e+00 : f32
    %254 = vector.broadcast %cst_98 : f32 to vector<32x1xf32>
    %255 = arith.maximumf %253, %254 : vector<32x1xf32>
    %256 = vector.broadcast %250 : vector<32x1xf32> to vector<32x8xf32>
    %257 = arith.subf %236, %256 : vector<32x8xf32>
    %cst_99 = arith.constant 9.99999974E-6 : f32
    %258 = vector.broadcast %cst_99 : f32 to vector<32x1xf32>
    %259 = arith.addf %255, %258 : vector<32x1xf32>
    %260 = math.rsqrt %259 : vector<32x1xf32>
    %261 = vector.broadcast %260 : vector<32x1xf32> to vector<32x8xf32>
    %262 = arith.mulf %257, %261 : vector<32x8xf32>
    %cst_100 = arith.constant 0.000000e+00 : f32
    %263 = vector.broadcast %cst_100 : f32 to vector<32x8xf32>
    %264 = arith.cmpf oge, %262, %263 : vector<32x8xf32>
    %cst_101 = arith.constant 2.000000e-01 : f32
    %265 = vector.broadcast %cst_101 : f32 to vector<32x8xf32>
    %266 = arith.mulf %265, %262 : vector<32x8xf32>
    %267 = arith.select %264, %262, %266 : vector<32x8xi1>, vector<32x8xf32>
    %cst_102 = arith.constant dense<0.000000e+00> : vector<32xf32>
    %268 = vector.multi_reduction <add>, %190, %cst_102 [1] : vector<32x8xf32> to vector<32xf32>
    %269 = vector.shape_cast %268 : vector<32xf32> to vector<32x1xf32>
    %270 = arith.mulf %190, %190 : vector<32x8xf32>
    %cst_103 = arith.constant dense<0.000000e+00> : vector<32xf32>
    %271 = vector.multi_reduction <add>, %270, %cst_103 [1] : vector<32x8xf32> to vector<32xf32>
    %272 = vector.shape_cast %271 : vector<32xf32> to vector<32x1xf32>
    %c0_i32_104 = arith.constant 0 : i32
    %273 = vector.broadcast %c0_i32_104 : i32 to vector<32x2xi32>
    %274 = arith.cmpi eq, %191, %273 : vector<32x2xi32>
    %275 = vector.shape_cast %269 : vector<32x1xf32> to vector<32x1xf32>
    %276 = vector.broadcast %275 : vector<32x1xf32> to vector<32x2xf32>
    %277 = vector.shape_cast %272 : vector<32x1xf32> to vector<32x1xf32>
    %278 = vector.broadcast %277 : vector<32x1xf32> to vector<32x2xf32>
    %279 = arith.select %274, %276, %278 : vector<32x2xi1>, vector<32x2xf32>
    %cst_105 = arith.constant dense<0.000000e+00> : vector<32x2xf32>
    %280 = tpu.matmul %8, %279, %cst_105 {dimension_numbers = #tpu.dot_dimension_numbers<[1], [0], [0], [1], [0, 0, 1, 1], [], []>} : vector<32x32xf32>, vector<32x2xf32>, vector<32x2xf32> -> vector<32x2xf32>
    %281 = vector.extract_strided_slice %280 {offsets = [0, 0], sizes = [32, 1], strides = [1, 1]} : vector<32x2xf32> to vector<32x1xf32>
    %282 = vector.extract_strided_slice %280 {offsets = [0, 1], sizes = [32, 1], strides = [1, 1]} : vector<32x2xf32> to vector<32x1xf32>
    %283 = arith.mulf %281, %281 : vector<32x1xf32>
    %284 = arith.subf %282, %283 : vector<32x1xf32>
    %cst_106 = arith.constant 0.000000e+00 : f32
    %285 = vector.broadcast %cst_106 : f32 to vector<32x1xf32>
    %286 = arith.maximumf %284, %285 : vector<32x1xf32>
    %287 = vector.broadcast %281 : vector<32x1xf32> to vector<32x8xf32>
    %288 = arith.subf %190, %287 : vector<32x8xf32>
    %cst_107 = arith.constant 9.99999974E-6 : f32
    %289 = vector.broadcast %cst_107 : f32 to vector<32x1xf32>
    %290 = arith.addf %286, %289 : vector<32x1xf32>
    %291 = math.rsqrt %290 : vector<32x1xf32>
    %292 = vector.broadcast %291 : vector<32x1xf32> to vector<32x8xf32>
    %293 = arith.mulf %288, %292 : vector<32x8xf32>
    %cst_108 = arith.constant 0.000000e+00 : f32
    %294 = vector.broadcast %cst_108 : f32 to vector<32x8xf32>
    %295 = arith.cmpf oge, %293, %294 : vector<32x8xf32>
    %cst_109 = arith.constant 2.000000e-01 : f32
    %296 = vector.broadcast %cst_109 : f32 to vector<32x8xf32>
    %297 = arith.mulf %296, %293 : vector<32x8xf32>
    %298 = arith.select %295, %293, %297 : vector<32x8xi1>, vector<32x8xf32>
    %299 = vector.broadcast %18 : vector<32x1xf32> to vector<32x8xf32>
    %300 = arith.mulf %299, %298 : vector<32x8xf32>
    %c8_i32_110 = arith.constant 8 : i32
    %301 = tpu.dynamic_rotate %298 by %c8_i32_110 dim 0 : vector<32x8xf32>, i32 -> vector<32x8xf32>
    %302 = vector.broadcast %20 : vector<32x1xf32> to vector<32x8xf32>
    %303 = arith.mulf %302, %301 : vector<32x8xf32>
    %304 = arith.addf %300, %303 : vector<32x8xf32>
    %c16_i32_111 = arith.constant 16 : i32
    %305 = tpu.dynamic_rotate %298 by %c16_i32_111 dim 0 : vector<32x8xf32>, i32 -> vector<32x8xf32>
    %306 = vector.broadcast %22 : vector<32x1xf32> to vector<32x8xf32>
    %307 = arith.mulf %306, %305 : vector<32x8xf32>
    %308 = arith.addf %304, %307 : vector<32x8xf32>
    %c24_i32_112 = arith.constant 24 : i32
    %309 = tpu.dynamic_rotate %298 by %c24_i32_112 dim 0 : vector<32x8xf32>, i32 -> vector<32x8xf32>
    %310 = vector.broadcast %24 : vector<32x1xf32> to vector<32x8xf32>
    %311 = arith.mulf %310, %309 : vector<32x8xf32>
    %312 = arith.addf %308, %311 : vector<32x8xf32>
    %cst_113 = arith.constant dense<0.000000e+00> : vector<32xf32>
    %313 = vector.multi_reduction <add>, %312, %cst_113 [1] : vector<32x8xf32> to vector<32xf32>
    %314 = vector.shape_cast %313 : vector<32xf32> to vector<32x1xf32>
    %315 = arith.mulf %312, %312 : vector<32x8xf32>
    %cst_114 = arith.constant dense<0.000000e+00> : vector<32xf32>
    %316 = vector.multi_reduction <add>, %315, %cst_114 [1] : vector<32x8xf32> to vector<32xf32>
    %317 = vector.shape_cast %316 : vector<32xf32> to vector<32x1xf32>
    %c0_i32_115 = arith.constant 0 : i32
    %318 = vector.broadcast %c0_i32_115 : i32 to vector<32x2xi32>
    %319 = arith.cmpi eq, %191, %318 : vector<32x2xi32>
    %320 = vector.shape_cast %314 : vector<32x1xf32> to vector<32x1xf32>
    %321 = vector.broadcast %320 : vector<32x1xf32> to vector<32x2xf32>
    %322 = vector.shape_cast %317 : vector<32x1xf32> to vector<32x1xf32>
    %323 = vector.broadcast %322 : vector<32x1xf32> to vector<32x2xf32>
    %324 = arith.select %319, %321, %323 : vector<32x2xi1>, vector<32x2xf32>
    %cst_116 = arith.constant dense<0.000000e+00> : vector<32x2xf32>
    %325 = tpu.matmul %8, %324, %cst_116 {dimension_numbers = #tpu.dot_dimension_numbers<[1], [0], [0], [1], [0, 0, 1, 1], [], []>} : vector<32x32xf32>, vector<32x2xf32>, vector<32x2xf32> -> vector<32x2xf32>
    %326 = vector.extract_strided_slice %325 {offsets = [0, 0], sizes = [32, 1], strides = [1, 1]} : vector<32x2xf32> to vector<32x1xf32>
    %327 = vector.extract_strided_slice %325 {offsets = [0, 1], sizes = [32, 1], strides = [1, 1]} : vector<32x2xf32> to vector<32x1xf32>
    %328 = arith.mulf %326, %326 : vector<32x1xf32>
    %329 = arith.subf %327, %328 : vector<32x1xf32>
    %cst_117 = arith.constant 0.000000e+00 : f32
    %330 = vector.broadcast %cst_117 : f32 to vector<32x1xf32>
    %331 = arith.maximumf %329, %330 : vector<32x1xf32>
    %332 = vector.broadcast %326 : vector<32x1xf32> to vector<32x8xf32>
    %333 = arith.subf %312, %332 : vector<32x8xf32>
    %cst_118 = arith.constant 9.99999974E-6 : f32
    %334 = vector.broadcast %cst_118 : f32 to vector<32x1xf32>
    %335 = arith.addf %331, %334 : vector<32x1xf32>
    %336 = math.rsqrt %335 : vector<32x1xf32>
    %337 = vector.broadcast %336 : vector<32x1xf32> to vector<32x8xf32>
    %338 = arith.mulf %333, %337 : vector<32x8xf32>
    %cst_119 = arith.constant 0.000000e+00 : f32
    %339 = vector.broadcast %cst_119 : f32 to vector<32x8xf32>
    %340 = arith.cmpf oge, %338, %339 : vector<32x8xf32>
    %cst_120 = arith.constant 2.000000e-01 : f32
    %341 = vector.broadcast %cst_120 : f32 to vector<32x8xf32>
    %342 = arith.mulf %341, %338 : vector<32x8xf32>
    %343 = arith.select %340, %338, %342 : vector<32x8xi1>, vector<32x8xf32>
    %344 = arith.addf %267, %343 : vector<32x8xf32>
    %c0_121 = arith.constant 0 : index
    %c0_122 = arith.constant 0 : index
    %c0_123 = arith.constant 0 : index
    %345 = vector.load %arg6[%c0_121, %c0_122, %c0_123] : memref<1x32x8xf32, #tpu.memory_space<vmem>>, vector<1x32x8xf32>
    %346 = vector.shape_cast %345 : vector<1x32x8xf32> to vector<32x8xf32>
    %347 = vector.shape_cast %344 : vector<32x8xf32> to vector<1x32x8xf32>
    tpu.vector_store %arg6[%c0_121, %c0_122, %c0_123], %347 {strides = array<i32>} : memref<1x32x8xf32, #tpu.memory_space<vmem>>, vector<1x32x8xf32>,
    return
  }
  func.func @transform_0(%arg0: i32) -> (i32, i32, i32) {
    %c0_i32 = arith.constant 0 : i32
    %c0_i32_0 = arith.constant 0 : i32
    %c0_i32_1 = arith.constant 0 : i32
    return %arg0, %c0_i32, %c0_i32_0 : i32, i32, i32
  }
  func.func @transform_1(%arg0: i32) -> (i32, i32, i32) {
    %c0_i32 = arith.constant 0 : i32
    %c0_i32_0 = arith.constant 0 : i32
    %c0_i32_1 = arith.constant 0 : i32
    %c0_i32_2 = arith.constant 0 : i32
    return %c0_i32, %c0_i32_0, %c0_i32_1 : i32, i32, i32
  }
  func.func @transform_2(%arg0: i32) -> (i32, i32, i32, i32) {
    %c0_i32 = arith.constant 0 : i32
    %c0_i32_0 = arith.constant 0 : i32
    %c0_i32_1 = arith.constant 0 : i32
    %c0_i32_2 = arith.constant 0 : i32
    %c0_i32_3 = arith.constant 0 : i32
    return %c0_i32, %c0_i32_0, %c0_i32_1, %c0_i32_2 : i32, i32, i32, i32
  }
  func.func @transform_3(%arg0: i32) -> (i32, i32) {
    %c0_i32 = arith.constant 0 : i32
    %c0_i32_0 = arith.constant 0 : i32
    %c0_i32_1 = arith.constant 0 : i32
    return %c0_i32, %c0_i32_0 : i32, i32
  }
  func.func @transform_4(%arg0: i32) -> (i32, i32, i32, i32) {
    %c0_i32 = arith.constant 0 : i32
    %c0_i32_0 = arith.constant 0 : i32
    %c0_i32_1 = arith.constant 0 : i32
    %c0_i32_2 = arith.constant 0 : i32
    %c0_i32_3 = arith.constant 0 : i32
    return %c0_i32, %c0_i32_0, %c0_i32_1, %c0_i32_2 : i32, i32, i32, i32
  }
  func.func @transform_5(%arg0: i32) -> (i32, i32, i32) {
    %c0_i32 = arith.constant 0 : i32
    %c0_i32_0 = arith.constant 0 : i32
    %c0_i32_1 = arith.constant 0 : i32
    return %arg0, %c0_i32, %c0_i32_0 : i32, i32, i32
  }
}

</mosaic_0001>

<bundles_post_ra>
// kernel: downconv.1
= control target key start
LH: loop header
LB: loop body
LE: loop exit
PB: predicated region body
PF: predicated region fallthrough
CT: control target
= control target key end

     0   :  { %10 = vsyncpa [#allocation3], 0  ;;  %s4893_s0 = inlined_call_operand.vmem [shape: f32[2,64,16], index: 0, kind: input, shape index: {}]   ;;  %s4894_s1 = inlined_call_operand.vmem [shape: f32[2,16,8], index: 1, kind: input, shape index: {}]   ;;  %s4895_s2 = inlined_call_operand.vmem [shape: f32[2,9,32,1], index: 2, kind: input, shape index: {}]   ;;  %s4896_s3 = inlined_call_operand.vmem [shape: f32[32,32], index: 3, kind: input, shape index: {}]   ;;  %s4897_s4 = inlined_call_operand.vmem [shape: f32[2,4,32,1], index: 4, kind: input, shape index: {}]   ;;  %s4898_s5 = inlined_call_operand.hbm [shape: f32[2,32,8], index: 5, kind: output, shape index: {}]  }
   0x1   :  { %12 = vsyncpa [#allocation3 + $0x1], 0  ;;  %s3308_s18 = smov 0   ;;  %s3310_s19 = smov 0  }
   0x2   :  { %s3312_s20 = smov 0   ;;  %s3314_s21 = smov 0  }
   0x3 LB: > { %s3329_s22 = sadd.s32 4294967295, %s3268_s21   ;;  %s2799_s23 = sadd.s32 4294967294, %s3268_s21   ;;  %s3268_s21 = sphi %s3314_s21, %s5061_s21   ;;  %s3264_s20 = sphi %s3312_s20, %s5060_s20   ;;  %s3260_s19 = sphi %s3310_s19, %s5059_s19   ;;  %s3256_s18 = sphi %s3308_s18, %s5058_s18  }
   0x4   : > { %s3333_s24 = sadd.s32 1, %s3268_s21   ;;  %s135_s25 = sadd.s32 1, %s3264_s20 }
   0x5   : > { %s132_s26 = ssub.s32 %s3268_s21, %s3333_s24  ;;  %p145_p0 = scmp.ne.s32.totalorder %s3264_s20, %s3260_s19 }
   0x6   : > { %p133_p1 = scmp.eq.s32.totalorder %s132_s26, 0  ;;  %p146_p2 = scmp.eq.s32.totalorder %s3329_s22, 1 }
   0x7   : > { %p151_p3 = scmp.ne.s32.totalorder %s3260_s19, %s3256_s18  ;;  %p152_p4 = scmp.eq.s32.totalorder %s2799_s23, 1 }
   0x8   : > { %s3344_s27 = scalar_select %p133_p1, %s3264_s20, %s135_s25  }
   0x9   : > { %p3346_p5 = por %p146_p2, %p145_p0  ;;  %p3350_p6 = por %p152_p4, %p151_p3 }
   0xa   : > { %p2802_p7 = scmp.ge.s32.totalorder %s3268_s21, 1  ;;  %p190_p8 = scmp.lt.s32.totalorder %s3268_s21, 3 }
   0xc   : > { %p191_p9 = pnand %p2802_p7, %p190_p8 }
   0xe   : > { %194 = sbr.rel (%p191_p9) target bundleno = 1985 (0x7c1), region = 40 }
  0x15   : > { %v229_v0 = vld [vmem:[%s4895_s2 + $0x8] sm:$0xff]  ;;  %v228_v1 = vld [vmem:[%s4895_s2] sm:$0xff]  ;;  %p218_p10 = scmp.lt.s32.totalorder %s3329_s22, 1  ;;  %v4899_v3 = vmov 0   ;;  %v2806_v5 = vld [vmem:[%s4894_s1 + $0x10] sm:$0xff]  ;;  %vm359_vm0 = vcmask 130048  }
  0x16   : > { %v223_v2 = vld [vmem:[%s4894_s1] sm:$0xff]  ;;  %3165 = vset.pattern.permute.xlu1 %v4899_v3  ;;  %3164 = vset.pattern.permute.xlu0 %v4899_v3  ;;  %v224_v4 = vld [vmem:[%s4894_s1 + $0x8] sm:$0xff]  ;;  %v2807_v6 = vld [vmem:[%s4894_s1 + $0x18] sm:$0xff]  ;;  %s3271_s11 = smov 8   ;;  %vm789_vm11 = vcmask 1047616   ;;  %s3272_s26 = smov 121  }
  0x17   : > { %854 = vperm.xlu1 %3165, %v229_v0   ;;  %849 = vperm.xlu0 %3164, %v228_v1   ;;  %v3070_v7 = vpack.c.bf16 %v224_v4, %v223_v2  ;;  %v3074_v8 = vpack.c.bf16 %v2807_v6, %v2806_v5  ;;  %s219_s17 = scalar_select %p218_p10, %s3329_s22, 1  ;;  %v232_v9 = vld [vmem:[%s4895_s2 + $0x20] sm:$0xff]  ;;  %v233_v10 = vld [vmem:[%s4895_s2 + $0x28] sm:$0xff]  ;;  %v231_v18 = vld [vmem:[%s4895_s2 + $0x18] sm:$0xff]  ;;  %vm1632_vm13 = vcmask 64512   ;;  %vm1666_vm15 = vcmask 261120  }
  0x18   : > { %v237_v14 = vld [vmem:[%s4895_s2 + $0x48] sm:$0xff]  ;;  %v236_v15 = vld [vmem:[%s4895_s2 + $0x40] sm:$0xff]  ;;  %v230_v19 = vld [vmem:[%s4895_s2 + $0x10] sm:$0xff]  ;;  %s3273_s30 = smov 127  }
  0x19   : > { %3071 = vmatprep.subr.bf16.mxu0 %v3070_v7  ;;  %3075 = vmatprep.subr.bf16.mxu1 %v3074_v8  ;;  %s2916_s6 = sshll.u32 %s219_s17, 6  ;;  %v235_v22 = vld [vmem:[%s4895_s2 + $0x38] sm:$0xff]  ;;  %v234_v23 = vld [vmem:[%s4895_s2 + $0x30] sm:$0xff]  ;;  %v241_v25 = vld [vmem:[%s4895_s2 + $0x68] sm:$0xff]  ;;  %s3276_s17 = smov [#allocation2]  }
  0x1a   : > { %3073 = vmatpush3.bf16.msra.mxu0 %v3070_v7  ;;  %3077 = vmatpush3.bf16.msra.mxu1 %v3074_v8  ;;  %s3387_s9 = scalar_lea.vmem %s4893_s0, %s2916_s6  ;;  %v240_v26 = vld [vmem:[%s4895_s2 + $0x60] sm:$0xff]  ;;  %v238_v27 = vld [vmem:[%s4895_s2 + $0x50] sm:$0xff]  ;;  %v239_v28 = vld [vmem:[%s4895_s2 + $0x58] sm:$0xff]  ;;  %s3210_s23 = sshll.u32 %s3276_s17, 4  ;;  %s3211_s23 = int_to_ptr.vmem [resolvable:$false] %s3210_s23 }
  0x1b   : > { %885 = vperm.xlu1 %3165, %v232_v9   ;;  %890 = vperm.xlu0 %3164, %v233_v10   ;;  %v344_v11 = vld [vmem:[%s3387_s9] ss:$2 sm:$0xff]  ;;  %v2872_v12 = vld [vmem:[%s3387_s9 + $0x10] ss:$2 sm:$0xff]  ;;  %v2875_v17 = vld [vmem:[%s3387_s9 + $0x1] ss:$2 sm:$0xff] }
  0x1c   : > { %v2873_v13 = vld [vmem:[%s3387_s9 + $0x20] ss:$2 sm:$0xff]  ;;  %2978 = vmatprep.mubr.msk.f32.mxu0 %vm359_vm0, %v344_v11  ;;  %2988 = vmatprep.mubr.msk.f32.mxu1 %vm359_vm0, %v344_v11  ;;  %v2874_v16 = vld [vmem:[%s3387_s9 + $0x30] ss:$2 sm:$0xff]  ;;  %v2876_v20 = vld [vmem:[%s3387_s9 + $0x11] ss:$2 sm:$0xff] }
  0x1d   : > { %2979 = vmatmul.mubr.msk.f32.vlgmr.msra.gmra.mrb[0].mxu0 %vm359_vm0, %v2872_v12  ;;  %2989 = vmatmul.mubr.msk.f32.vlgmr.msra.gmra.mrb[0].mxu1 %vm359_vm0, %v2872_v12  ;;  %v2877_v21 = vld [vmem:[%s3387_s9 + $0x21] ss:$2 sm:$0xff]  ;;  %v2878_v24 = vld [vmem:[%s3387_s9 + $0x31] ss:$2 sm:$0xff]  ;;  %s2917_s9 = sshll.u32 %s3329_s22, 9  ;;  %s3212_s25 = scalar_lea.vmem %s3211_s23, 1024 }
  0x1e   : > { %3083 = vmatprep.subr.bf16.mxu1 %v3074_v8  ;;  %2981 = vmatprep.mubr.msk.f32.mxu0 %vm359_vm0, %v2873_v13  ;;  %v244_v29 = vld [vmem:[%s4895_s2 + $0x80] sm:$0xff]  ;;  %v245_v30 = vld [vmem:[%s4895_s2 + $0x88] sm:$0xff]  ;;  %v242_v31 = vld [vmem:[%s4895_s2 + $0x70] sm:$0xff]  ;;  %s4844_s15 = scalar_lea.hbm %s4898_s5, %s2917_s9 }
  0x1f   : > { %930 = vperm.xlu1 %3165, %v237_v14   ;;  %925 = vperm.xlu0 %3164, %v236_v15   ;;  %v243_v32 = vld [vmem:[%s4895_s2 + $0x78] sm:$0xff]  ;;  %v248_v33 = vld [vmem:[%s4895_s2 + $0xa0] sm:$0xff]  ;;  %v249_v34 = vld [vmem:[%s4895_s2 + $0xa8] sm:$0xff] }
  0x20   : > { %3085 = vmatpush3.bf16.msra.mxu1 %v3074_v8  ;;  %2991 = vmatprep.mubr.msk.f32.mxu1 %vm359_vm0, %v2873_v13  ;;  %v2808_v35 = vld [vmem:[%s4895_s2 + $0x120] sm:$0xff]  ;;  %v2809_v36 = vld [vmem:[%s4895_s2 + $0x128] sm:$0xff]  ;;  %v246_v39 = vld [vmem:[%s4895_s2 + $0x90] sm:$0xff] }
  0x21   : > { %2982 = vmatmul.mubr.msk.f32.gmra.mrb[2].mxu0 %vm359_vm0, %v2874_v16  ;;  %2992 = vmatmul.mubr.msk.f32.gmra.mrb[2].mxu1 %vm359_vm0, %v2874_v16  ;;  %v2812_v37 = vld [vmem:[%s4895_s2 + $0x140] sm:$0xff]  ;;  %v2813_v38 = vld [vmem:[%s4895_s2 + $0x148] sm:$0xff]  ;;  %v247_v40 = vld [vmem:[%s4895_s2 + $0x98] sm:$0xff] }
  0x22   : > { %3079 = vmatprep.subr.bf16.mxu0 %v3070_v7  ;;  %2998 = vmatprep.mubr.msk.f32.mxu0 %vm359_vm0, %v2875_v17  ;;  %v252_v41 = vld [vmem:[%s4895_s2 + $0xc0] sm:$0xff]  ;;  %v253_v42 = vld [vmem:[%s4895_s2 + $0xc8] sm:$0xff]  ;;  %v250_v45 = vld [vmem:[%s4895_s2 + $0xb0] sm:$0xff] }
  0x23   : > { %3081 = vmatpush3.bf16.msra.mxu0 %v3070_v7  ;;  %864 = vperm.xlu1 %3165, %v231_v18   ;;  %v2816_v43 = vld [vmem:[%s4895_s2 + $0x160] sm:$0xff]  ;;  %v2817_v44 = vld [vmem:[%s4895_s2 + $0x168] sm:$0xff]  ;;  %v251_v46 = vld [vmem:[%s4895_s2 + $0xb8] sm:$0xff] }
  0x24   : > { %859 = vperm.xlu0 %3164, %v230_v19   ;;  %3008 = vmatprep.mubr.msk.f32.mxu1 %vm359_vm0, %v2875_v17  ;;  %v256_v47 = vld [vmem:[%s4895_s2 + $0xe0] sm:$0xff]  ;;  %v257_v48 = vld [vmem:[%s4895_s2 + $0xe8] sm:$0xff]  ;;  %v2810_v49 = vld [vmem:[%s4895_s2 + $0x130] sm:$0xff] }
  0x25   : > { %3009 = vmatmul.mubr.msk.f32.vlgmr.msra.gmra.mrb[4].mxu1 %vm359_vm0, %v2876_v20  ;;  %v2811_v50 = vld [vmem:[%s4895_s2 + $0x138] sm:$0xff]  ;;  %v2814_v51 = vld [vmem:[%s4895_s2 + $0x150] sm:$0xff]  ;;  %v2820_v53 = vld [vmem:[%s4895_s2 + $0x180] sm:$0xff] }
  0x26   : > { %2999 = vmatmul.mubr.msk.f32.vlgmr.msra.gmra.mrb[4].mxu0 %vm359_vm0, %v2876_v20  ;;  %3011 = vmatprep.mubr.msk.f32.mxu1 %vm359_vm0, %v2877_v21  ;;  %v2815_v52 = vld [vmem:[%s4895_s2 + $0x158] sm:$0xff]  ;;  %v2821_v54 = vld [vmem:[%s4895_s2 + $0x188] sm:$0xff]  ;;  %v254_v55 = vld [vmem:[%s4895_s2 + $0xd0] sm:$0xff] }
  0x27   : > { %900 = vperm.xlu1 %3165, %v235_v22   ;;  %3001 = vmatprep.mubr.msk.f32.mxu0 %vm359_vm0, %v2877_v21  ;;  %v255_v56 = vld [vmem:[%s4895_s2 + $0xd8] sm:$0xff]  ;;  %v260_v57 = vld [vmem:[%s4895_s2 + $0x100] sm:$0xff]  ;;  %v261_v58 = vld [vmem:[%s4895_s2 + $0x108] sm:$0xff] }
  0x28   : > { %895 = vperm.xlu0 %3164, %v234_v23   ;;  %v2818_v59 = vld [vmem:[%s4895_s2 + $0x170] sm:$0xff]  ;;  %v2819_v60 = vld [vmem:[%s4895_s2 + $0x178] sm:$0xff]  ;;  %v2824_v61 = vld [vmem:[%s4895_s2 + $0x1a0] sm:$0xff] }
  0x29   : > { %3012 = vmatmul.mubr.msk.f32.gmra.mrb[6].mxu1 %vm359_vm0, %v2878_v24  ;;  %v2825_v62 = vld [vmem:[%s4895_s2 + $0x1a8] sm:$0xff]  ;;  %v258_v63 = vld [vmem:[%s4895_s2 + $0xf0] sm:$0xff]  ;;  %v259_v0 = vld [vmem:[%s4895_s2 + $0xf8] sm:$0xff] }
  0x2a   : > { %3002 = vmatmul.mubr.msk.f32.gmra.mrb[6].mxu0 %vm359_vm0, %v2878_v24  ;;  %v2822_v1 = vld [vmem:[%s4895_s2 + $0x190] sm:$0xff]  ;;  %v2823_v2 = vld [vmem:[%s4895_s2 + $0x198] sm:$0xff]  ;;  %v2828_v4 = vld [vmem:[%s4895_s2 + $0x1c0] sm:$0xff] }
  0x2b   : > { %1002 = vperm.xlu1 %3165, %v241_v25   ;;  %v2829_v5 = vld [vmem:[%s4895_s2 + $0x1c8] sm:$0xff]  ;;  %v262_v6 = vld [vmem:[%s4895_s2 + $0x110] sm:$0xff]  ;;  %v263_v7 = vld [vmem:[%s4895_s2 + $0x118] sm:$0xff] }
  0x2c   : > { %997 = vperm.xlu0 %3164, %v240_v26   ;;  %v2826_v8 = vld [vmem:[%s4895_s2 + $0x1b0] sm:$0xff]  ;;  %v2827_v9 = vld [vmem:[%s4895_s2 + $0x1b8] sm:$0xff]  ;;  %v2832_v10 = vld [vmem:[%s4895_s2 + $0x1e0] sm:$0xff] }
  0x2d   : > { %v2833_v11 = vld [vmem:[%s4895_s2 + $0x1e8] sm:$0xff] }
  0x2f   : > { %935 = vperm.xlu1 %3165, %v238_v27  }
  0x30   : > { %940 = vperm.xlu0 %3164, %v239_v28  }
  0x33   : > { %1025 = vperm.xlu1 %3165, %v244_v29  }
  0x34   : > { %1030 = vperm.xlu0 %3164, %v245_v30  }
  0x37   : > { %1007 = vperm.xlu1 %3165, %v242_v31  }
  0x38   : > { %1012 = vperm.xlu0 %3164, %v243_v32  }
  0x3b   : > { %1053 = vperm.xlu1 %3165, %v248_v33  }
  0x3c   : > { %1058 = vperm.xlu0 %3164, %v249_v34  }
  0x3f   : > { %1250 = vperm.xlu1 %3165, %v2808_v35  }
  0x40   : > { %1255 = vperm.xlu0 %3164, %v2809_v36  }
  0x43   : > { %1274 = vperm.xlu1 %3165, %v2812_v37  }
  0x44   : > { %1279 = vperm.xlu0 %3164, %v2813_v38  }
  0x47   : > { %1035 = vperm.xlu1 %3165, %v246_v39  }
  0x48   : > { %1040 = vperm.xlu0 %3164, %v247_v40  }
  0x4b   : > { %1081 = vperm.xlu1 %3165, %v252_v41  }
  0x4c   : > { %1086 = vperm.xlu0 %3164, %v253_v42   ;;  %v4901_v42 = vlaneseq }
  0x4f   : > { %1318 = vperm.xlu1 %3165, %v2816_v43  }
  0x50   : > { %1323 = vperm.xlu0 %3164, %v2817_v44  }
  0x53   : > { %1063 = vperm.xlu1 %3165, %v250_v45  }
  0x54   : > { %1068 = vperm.xlu0 %3164, %v251_v46  }
  0x57   : > { %1109 = vperm.xlu1 %3165, %v256_v47  }
  0x58   : > { %1114 = vperm.xlu0 %3164, %v257_v48  }
  0x5b   : > { %1260 = vperm.xlu1 %3165, %v2810_v49   ;;  %v3662_v49 = vshrl.u32 %v4901_v42, 7 }
  0x5c   : > { %1265 = vperm.xlu0 %3164, %v2811_v50  }
  0x5d   : > { %vm838_vm1 = vcmp.lt.s32.totalorder %v3662_v49, 1  ;;  %vm1195_vm2 = vcmp.lt.s32.totalorder %v3662_v49, 7 }
  0x5f   : > { %1284 = vperm.xlu1 %3165, %v2814_v51  }
  0x60   : > { %1289 = vperm.xlu0 %3164, %v2815_v52  }
  0x63   : > { %1390 = vperm.xlu1 %3165, %v2820_v53  }
  0x64   : > { %1395 = vperm.xlu0 %3164, %v2821_v54  }
  0x67   : > { %1091 = vperm.xlu1 %3165, %v254_v55  }
  0x68   : > { %1096 = vperm.xlu0 %3164, %v255_v56  }
  0x6b   : > { %1137 = vperm.xlu1 %3165, %v260_v57  }
  0x6c   : > { %1142 = vperm.xlu0 %3164, %v261_v58  }
  0x6f   : > { %1328 = vperm.xlu1 %3165, %v2818_v59  }
  0x70   : > { %1333 = vperm.xlu0 %3164, %v2819_v60  }
  0x73   : > { %1418 = vperm.xlu1 %3165, %v2824_v61  }
  0x74   : > { %1423 = vperm.xlu0 %3164, %v2825_v62  }
  0x77   : > { %1119 = vperm.xlu1 %3165, %v258_v63  }
  0x78   : > { %1124 = vperm.xlu0 %3164, %v259_v0  }
  0x7b   : > { %1400 = vperm.xlu1 %3165, %v2822_v1  }
  0x7c   : > { %1405 = vperm.xlu0 %3164, %v2823_v2  }
  0x7f   : > { %1462 = vperm.xlu1 %3165, %v2828_v4  }
  0x80   : > { %1467 = vperm.xlu0 %3164, %v2829_v5  }
  0x83   : > { %1147 = vperm.xlu1 %3165, %v262_v6  }
  0x84   : > { %1152 = vperm.xlu0 %3164, %v263_v7  }
  0x87   : > { %1428 = vperm.xlu1 %3165, %v2826_v8  }
  0x88   : > { %1433 = vperm.xlu0 %3164, %v2827_v9  }
  0x8b   : > { %1534 = vperm.xlu1 %3165, %v2832_v10  }
  0x8c   : > { %1539 = vperm.xlu0 %3164, %v2833_v11  }
  0x96   : > { %v3581_v12 = vpop.permute.xlu1 %854  ;;  %v3583_v13 = vpop.permute.xlu0 %849 }
  0x9a   : > { %v3585_v14 = vpop.permute.xlu1 %885  ;;  %v3587_v15 = vpop.permute.xlu0 %890 }
  0x9e   : > { %v3589_v16 = vpop.permute.xlu1 %930  ;;  %v3591_v17 = vpop.permute.xlu0 %925 }
  0xa2   : > { %v3593_v18 = vpop.permute.xlu1 %864 }
  0xa3   : > { %v3595_v19 = vpop.permute.xlu0 %859 }
  0xa6   : > { %v3597_v20 = vpop.permute.xlu1 %900 }
  0xa7   : > { %v3599_v21 = vpop.permute.xlu0 %895 }
  0xaa   : > { %v3601_v22 = vpop.permute.xlu1 %1002 }
  0xab   : > { %v3603_v23 = vpop.permute.xlu0 %997 }
  0xae   : > { %v3605_v24 = vpop.permute.xlu1 %935 }
  0xaf   : > { %v3607_v25 = vpop.permute.xlu0 %940 }
  0xb2   : > { %v3609_v26 = vpop.permute.xlu1 %1025 }
  0xb3   : > { %4916 = vst [vmem:[#allocation5_spill] sm:$0xff] %v3609_v26  ;;  %v3611_v27 = vpop.permute.xlu0 %1030 }
  0xb6   : > { %v3613_v28 = vpop.permute.xlu1 %1007 }
  0xb7   : > { %v3615_v29 = vpop.permute.xlu0 %1012 }
  0xba   : > { %v3617_v30 = vpop.permute.xlu1 %1053 }
  0xbb   : > { %4917 = vst [vmem:[#allocation6_spill] sm:$0xff] %v3617_v30  ;;  %v3619_v31 = vpop.permute.xlu0 %1058 }
  0xbe   : > { %v3621_v32 = vpop.permute.xlu1 %1250 }
  0xbf   : > { %4918 = vst [vmem:[#allocation7_spill] sm:$0xff] %v3621_v32  ;;  %v3623_v33 = vpop.permute.xlu0 %1255 }
  0xc0   : > { %4919 = vst [vmem:[#allocation8_spill] sm:$0xff] %v3623_v33 }
  0xc2   : > { %v3637_v39 = vpop.permute.xlu1 %1274 }
  0xc3   : > { %4920 = vst [vmem:[#allocation9_spill] sm:$0xff] %v3637_v39  ;;  %v3643_v41 = vpop.permute.xlu0 %1279 }
  0xc4   : > { %4921 = vst [vmem:[#allocation10_spill] sm:$0xff] %v3643_v41 }
  0xc6   : > { %v3664_v50 = vpop.permute.xlu1 %1035 }
  0xc7   : > { %4924 = vst [vmem:[#allocation13_spill] sm:$0xff] %v3664_v50  ;;  %v3674_v55 = vpop.permute.xlu0 %1040 }
  0xc8   : > { %4926 = vst [vmem:[#allocation15_spill] sm:$0xff] %v3674_v55 }
  0xca   : > { %v3711_v10 = vpop.permute.xlu1 %1081 }
  0xcb   : > { %4931 = vst [vmem:[#allocation20_spill] sm:$0xff] %v3711_v10 }
  0xce   : > { %v3748_v39 = vpop.permute.xlu1 %1318 }
  0xcf   : > { %4933 = vst [vmem:[#allocation22_spill] sm:$0xff] %v3748_v39 }
  0xf0   : > { %v3625_v34 = vpop.f32.mrb[0].mxu0  ;;  %v3627_v35 = vpop.f32.mrb[0].mxu1 }
  0xf1   : > { %954 = vrot.lane.b32.xlu1 %v3627_v35, %s3271_s11  ;;  %v3631_v36 = vpop.f32.mrb[1].mxu0  ;;  %v3633_v37 = vpop.f32.mrb[1].mxu1  ;;  %v1164_v38 = vadd.f32 %v3627_v35, %v3625_v34 }
  0xf2   : > { %951 = vrot.lane.b32.xlu0 %v3633_v37, %s3271_s11  ;;  %v1163_v40 = vadd.f32 %v3633_v37, %v3631_v36 }
  0xf4   : > { %v3645_v43 = vpop.f32.mrb[2].mxu0  ;;  %v3647_v44 = vpop.f32.mrb[2].mxu1 }
  0xf5   : > { %4922 = vst [vmem:[#allocation11_spill] sm:$0xff] %v3645_v43  ;;  %960 = vrot.lane.b32.xlu1 %v3647_v44, %s3271_s11  ;;  %v3651_v45 = vpop.f32.mrb[3].mxu0  ;;  %v3653_v46 = vpop.f32.mrb[3].mxu1  ;;  %v1166_v47 = vadd.f32 %v3647_v44, %v3645_v43 }
  0xf6   : > { %4923 = vst [vmem:[#allocation12_spill] sm:$0xff] %v3651_v45  ;;  %957 = vrot.lane.b32.xlu0 %v3653_v46, %s3271_s11  ;;  %v1165_v48 = vadd.f32 %v3653_v46, %v3651_v45  ;;  %v3787_v43 = vpop.permute.xlu1 %1063 }
  0xf7   : > { %4936 = vst [vmem:[#allocation25_spill] sm:$0xff] %v3787_v43 }
  0xf8   : > { %v3666_v51 = vpop.f32.mrb[4].mxu1 }
  0xf9   : > { %v3668_v52 = vpop.f32.mrb[4].mxu0  ;;  %v912_v53 = vrot.slane %v3666_v51, 7  ;;  %v3672_v54 = vpop.f32.mrb[5].mxu1 }
  0xfa   : > { %4925 = vst [vmem:[#allocation14_spill] sm:$0xff] %v3668_v52  ;;  %v872_v56 = vrot.slane %v3668_v52, 7  ;;  %v1168_v57 = vadd.f32 %v3668_v52, %v1164_v38  ;;  %v3678_v58 = vpop.f32.mrb[5].mxu0  ;;  %v911_v59 = vrot.slane %v3672_v54, 7  ;;  %793 = vrot.lane.b32.xlu0 %v3666_v51, %s3271_s11 }
  0xfb   : > { %4927 = vst [vmem:[#allocation16_spill] sm:$0xff] %v3678_v58  ;;  %v871_v60 = vrot.slane %v3678_v58, 7  ;;  %v1167_v61 = vadd.f32 %v1163_v40, %v3678_v58  ;;  %v730_v58 = vadd.s32 24, %v3662_v49 }
  0xfc   : > { %v1172_v62 = vadd.f32 %v3666_v51, %v1168_v57  ;;  %v3686_v63 = vpop.f32.mrb[6].mxu1  ;;  %v3690_v0 = vsel %vm838_vm1, %v911_v59, %v912_v53  ;;  %v3717_v57 = vpop.permute.xlu0 %1086 }
  0xfd   : > { %v3694_v1 = vsel %vm838_vm1, %v871_v60, %v872_v56  ;;  %v1171_v2 = vadd.f32 %v1167_v61, %v3672_v54  ;;  %v3697_v4 = vpop.f32.mrb[6].mxu0  ;;  %799 = vrot.lane.b32.xlu1 %v3686_v63, %s3271_s11  ;;  %v3701_v5 = vpop.f32.mrb[7].mxu1  ;;  %4932 = vst [vmem:[#allocation21_spill] sm:$0xff] %v3717_v57  ;;  %v756_v55 = vand.u32 7, %v730_v58 }
  0xfe   : > { %4928 = vst [vmem:[#allocation17_spill] sm:$0xff] %v3697_v4  ;;  %v3703_v6 = vmul.f32 0.25, %v1172_v62  ;;  %v874_v7 = vrot.slane %v3697_v4, 7  ;;  %v1170_v8 = vadd.f32 %v3697_v4, %v1166_v47  ;;  %v3707_v9 = vpop.f32.mrb[7].mxu0  ;;  %790 = vrot.lane.b32.xlu0 %v3672_v54, %s3271_s11  ;;  %v914_v62 = vrot.slane %v3686_v63, 7 }
  0xff   : > { %4930 = vst [vmem:[#allocation19_spill] sm:$0xff] %v3707_v9  ;;  %v3713_v11 = vmul.f32 0.25, %v1171_v2  ;;  %v873_v38 = vrot.slane %v3707_v9, 7  ;;  %v1169_v40 = vadd.f32 %v1165_v48, %v3707_v9  ;;  %vm788_vm6 = vcmp.ne.s32.totalorder %v756_v55, 7 }
 0x100   : > { %4929 = vst [vmem:[#allocation18_spill] sm:$0xff] %v3703_v6  ;;  %v3721_v61 = vsel %vm838_vm1, %v874_v7, %v871_v60  ;;  %v1174_v47 = vadd.f32 %v3686_v63, %v1170_v8  ;;  %v913_v60 = vrot.slane %v3701_v5, 7  ;;  %v1180_v32 = vrot.slane %v3703_v6, 7  ;;  %v3758_v33 = vpop.permute.xlu0 %1323 }
 0x101   : > { %v3727_v3 = vsel %vm838_vm1, %v873_v38, %v874_v7  ;;  %v3731_v2 = vsel %vm838_vm1, %v872_v56, %v873_v38  ;;  %v1173_v48 = vadd.f32 %v1169_v40, %v3701_v5  ;;  %796 = vrot.lane.b32.xlu1 %v3701_v5, %s3271_s11  ;;  %v1191_v8 = vrot.slane %v3713_v11, 1  ;;  %4934 = vst [vmem:[#allocation23_spill] sm:$0xff] %v3758_v33 }
 0x102   : > { %v3736_v42 = vmul.f32 0.25, %v1174_v47  ;;  %1344 = vrot.lane.b32.xlu0 %v3713_v11, %s3271_s11  ;;  %v1192_v7 = vrot.slane %v3703_v6, 1  ;;  %v728_v56 = vadd.s32 8, %v3662_v49  ;;  %v735_v40 = vand.u32 7, %v3662_v49 }
 0x103   : > { %v3745_v38 = vmul.f32 0.25, %v1173_v48  ;;  %v1179_v47 = vrot.slane %v3713_v11, 7  ;;  %v3756_v41 = vsel %vm838_vm1, %v914_v62, %v911_v59  ;;  %v3767_v4 = vsel %vm838_vm1, %v912_v53, %v913_v60 }
 0x104   : > { %vm785_vm3 = vcmp.ne.s32.totalorder %v735_v40, 7  ;;  %v1198_v48 = vsel %vm1195_vm2, %v1191_v8, %v1192_v7  ;;  %v1182_v39 = vrot.slane %v3736_v42, 7  ;;  %v742_v9 = vand.u32 7, %v728_v56  ;;  %v3793_v30 = vpop.permute.xlu0 %1068 }
 0x105   : > { %1347 = vrot.lane.b32.xlu1 %v3703_v6, %s3271_s11  ;;  %v729_v59 = vadd.s32 16, %v3662_v49  ;;  %v3773_v33 = vsel %vm785_vm3, %v1198_v48, 0.0  ;;  %v1185_v10 = vsel %vm838_vm1, %v1179_v47, %v1180_v32  ;;  %v1194_v52 = vrot.slane %v3736_v42, 1  ;;  %4939 = vst [vmem:[#allocation26_spill] sm:$0xff] %v3793_v30 }
 0x106   : > { %1350 = vrot.lane.b32.xlu0 %v3745_v38, %s3271_s11  ;;  %4935 = vst [vmem:[#allocation24_spill] sm:$0xff] %v3773_v33  ;;  %v1186_v53 = vsel %vm838_vm1, %v1182_v39, %v1179_v47  ;;  %v1181_v56 = vrot.slane %v3745_v38, 7  ;;  %v3785_v57 = vsel %vm838_vm1, %v913_v60, %v914_v62  ;;  %vm3789_vm4 = vcmp.ne.s32.totalorder %v742_v9, 0 }
 0x107   : > { %v3797_v50 = vsel %vm3789_vm4, %v1185_v10, 0.0  ;;  %vm3799_vm5 = vcmp.ne.s32.totalorder %v735_v40, 0  ;;  %v749_v45 = vand.u32 7, %v729_v59  ;;  %v1199_v58 = vsel %vm1195_vm2, %v1194_v52, %v1191_v8  ;;  %v3821_v59 = vpop.permute.xlu1 %1109 }
 0x108   : > { %v3807_v62 = vsel %vm3799_vm5, %v1186_v53, 0.0  ;;  %v1184_v10 = vsel %vm838_vm1, %v1180_v32, %v1181_v56  ;;  %v3815_v60 = vsel %vm788_vm6, %v1199_v58, 0.0  ;;  %4945 = vst [vmem:[#allocation28_spill] sm:$0xff] %v3821_v59  ;;  %v1183_v53 = vsel %vm838_vm1, %v1181_v56, %v1182_v39  ;;  %v3832_v58 = vpop.permute.xlu0 %1114  ;;  %v2831_v59 = vld [vmem:[%s4895_s2 + $0x1d8] sm:$0xff] }
 0x109   : > { %1353 = vrot.lane.b32.xlu1 %v3736_v42, %s3271_s11  ;;  %4942 = vst [vmem:[#allocation27_spill] sm:$0xff] %v3815_v60  ;;  %vm3817_vm7 = vcmp.ne.s32.totalorder %v749_v45, 0  ;;  %v1193_v32 = vrot.slane %v3745_v38, 1  ;;  %4947 = vst [vmem:[#allocation30_spill] sm:$0xff] %v3832_v58  ;;  %vm3836_vm8 = vcmp.ne.s32.totalorder %v756_v55, 0  ;;  %vm786_vm9 = vcmp.ne.s32.totalorder %v742_v9, 7 }
 0x10a   : > { %1488 = vrot.lane.b32.xlu0 %v3773_v33, %s3271_s11  ;;  %v3827_v8 = vsel %vm3817_vm7, %v1184_v10, 0.0  ;;  %v3845_v10 = vsel %vm3836_vm8, %v1183_v53, 0.0  ;;  %vm787_vm10 = vcmp.ne.s32.totalorder %v749_v45, 7  ;;  %v2830_v45 = vld [vmem:[%s4895_s2 + $0x1d0] sm:$0xff] }
 0x10b   : > { %4946 = vst [vmem:[#allocation29_spill] sm:$0xff] %v3827_v8  ;;  %v1197_v39 = vsel %vm1195_vm2, %v1192_v7, %v1193_v32  ;;  %v1196_v55 = vsel %vm1195_vm2, %v1193_v32, %v1194_v52  ;;  %v3853_v56 = vpop.permute.xlu1 %1260  ;;  %v2837_v52 = vld [vmem:[%s4895_s2 + $0x208] sm:$0xff]  ;;  %v2835_v32 = vld [vmem:[%s4895_s2 + $0x1f8] sm:$0xff] }
 0x10c   : > { %4950 = vst [vmem:[#allocation31_spill] sm:$0xff] %v3853_v56  ;;  %v3855_v58 = vpop.permute.xlu0 %1265  ;;  %v3857_v43 = vsel %vm786_vm9, %v1197_v39, 0.0  ;;  %v3861_v53 = vsel %vm787_vm10, %v1196_v55, 0.0  ;;  %v2834_v39 = vld [vmem:[%s4895_s2 + $0x1f0] sm:$0xff]  ;;  %v2840_v56 = vld [vmem:[%s4895_s2 + $0x220] sm:$0xff] }
 0x10d   : > { %1207 = vrot.lane.b32.xlu1 %v3797_v50, %s3271_s11  ;;  %4951 = vst [vmem:[#allocation32_spill] sm:$0xff] %v3855_v58  ;;  %4952 = vst [vmem:[#allocation33_spill] sm:$0xff] %v3857_v43 }
 0x10e   : > { %1204 = vrot.lane.b32.xlu0 %v3807_v62, %s3271_s11  ;;  %4953 = vst [vmem:[#allocation34_spill] sm:$0xff] %v3861_v53 }
 0x10f   : > { %v3871_v9 = vpop.permute.xlu1 %1284 }
 0x110   : > { %4954 = vst [vmem:[#allocation35_spill] sm:$0xff] %v3871_v9  ;;  %v3873_v7 = vpop.permute.xlu0 %1289 }
 0x111   : > { %1497 = vrot.lane.b32.xlu1 %v3815_v60, %s3271_s11  ;;  %4955 = vst [vmem:[#allocation36_spill] sm:$0xff] %v3873_v7 }
 0x112   : > { %1210 = vrot.lane.b32.xlu0 %v3827_v8, %s3271_s11 }
 0x113   : > { %v3884_v55 = vpop.permute.xlu1 %1390 }
 0x114   : > { %4956 = vst [vmem:[#allocation37_spill] sm:$0xff] %v3884_v55 }
 0x115   : > { %1213 = vrot.lane.b32.xlu1 %v3845_v10, %s3271_s11 }
 0x116   : > { %1477 = vperm.xlu0 %3164, %v2831_v59   ;;  %v2836_v59 = vld [vmem:[%s4895_s2 + $0x200] sm:$0xff] }
 0x119   : > { %1491 = vrot.lane.b32.xlu1 %v3857_v43, %s3271_s11 }
 0x11a   : > { %1494 = vrot.lane.b32.xlu0 %v3861_v53, %s3271_s11 }
 0x11d   : > { %1472 = vperm.xlu1 %3165, %v2830_v45   ;;  %v2841_v45 = vld [vmem:[%s4895_s2 + $0x228] sm:$0xff] }
 0x11e   : > { %1567 = vperm.xlu0 %3164, %v2837_v52   ;;  %v3889_v52 = vpop.permute.xlu0 %1395 }
 0x11f   : > { %4957 = vst [vmem:[#allocation38_spill] sm:$0xff] %v3889_v52 }
 0x121   : > { %1562 = vperm.xlu1 %3165, %v2836_v59   ;;  %v3894_v59 = vpop.permute.xlu1 %1091 }
 0x122   : > { %1549 = vperm.xlu0 %3164, %v2835_v32   ;;  %4958 = vst [vmem:[#allocation39_spill] sm:$0xff] %v3894_v59  ;;  %v3896_v32 = vpop.permute.xlu0 %1096 }
 0x123   : > { %4959 = vst [vmem:[#allocation40_spill] sm:$0xff] %v3896_v32 }
 0x125   : > { %1544 = vperm.xlu1 %3165, %v2834_v39   ;;  %v3898_v58 = vpop.permute.xlu1 %1137 }
 0x126   : > { %1611 = vperm.xlu0 %3164, %v2841_v45   ;;  %4960 = vst [vmem:[#allocation41_spill] sm:$0xff] %v3898_v58  ;;  %v3900_v55 = vpop.permute.xlu0 %1142 }
 0x127   : > { %4961 = vst [vmem:[#allocation42_spill] sm:$0xff] %v3900_v55 }
 0x129   : > { %1606 = vperm.xlu1 %3165, %v2840_v56   ;;  %v3902_v9 = vpop.permute.xlu1 %1328 }
 0x12a   : > { %4962 = vst [vmem:[#allocation43_spill] sm:$0xff] %v3902_v9  ;;  %v3904_v7 = vpop.permute.xlu0 %1333 }
 0x12b   : > { %4963 = vst [vmem:[#allocation44_spill] sm:$0xff] %v3904_v7 }
 0x12d   : > { %v3906_v52 = vpop.permute.xlu1 %1418 }
 0x12e   : > { %4964 = vst [vmem:[#allocation45_spill] sm:$0xff] %v3906_v52  ;;  %v3908_v39 = vpop.permute.xlu0 %1423 }
 0x12f   : > { %4965 = vst [vmem:[#allocation46_spill] sm:$0xff] %v3908_v39 }
 0x131   : > { %v3910_v45 = vpop.permute.xlu1 %1119 }
 0x132   : > { %4966 = vst [vmem:[#allocation47_spill] sm:$0xff] %v3910_v45  ;;  %v3912_v26 = vpop.permute.xlu0 %1124 }
 0x133   : > { %4967 = vst [vmem:[#allocation48_spill] sm:$0xff] %v3912_v26 }
 0x135   : > { %v3914_v59 = vpop.permute.xlu1 %1400 }
 0x136   : > { %4968 = vst [vmem:[#allocation49_spill] sm:$0xff] %v3914_v59  ;;  %v3916_v56 = vpop.permute.xlu0 %1405 }
 0x137   : > { %4969 = vst [vmem:[#allocation50_spill] sm:$0xff] %v3916_v56 }
 0x139   : > { %v3918_v32 = vpop.permute.xlu1 %1462 }
 0x13a   : > { %4970 = vst [vmem:[#allocation51_spill] sm:$0xff] %v3918_v32  ;;  %v3920_v58 = vpop.permute.xlu0 %1467 }
 0x13b   : > { %4971 = vst [vmem:[#allocation52_spill] sm:$0xff] %v3920_v58 }
 0x13d   : > { %v3922_v55 = vpop.permute.xlu1 %1147 }
 0x13e   : > { %4972 = vst [vmem:[#allocation53_spill] sm:$0xff] %v3922_v55  ;;  %v3924_v9 = vpop.permute.xlu0 %1152 }
 0x13f   : > { %4973 = vst [vmem:[#allocation54_spill] sm:$0xff] %v3924_v9 }
 0x141   : > { %v3926_v7 = vpop.permute.xlu1 %1428 }
 0x142   : > { %4974 = vst [vmem:[#allocation55_spill] sm:$0xff] %v3926_v7  ;;  %v3928_v52 = vpop.permute.xlu0 %1433 }
 0x143   : > { %4975 = vst [vmem:[#allocation56_spill] sm:$0xff] %v3928_v52 }
 0x145   : > { %v3930_v39 = vpop.permute.xlu1 %1534 }
 0x146   : > { %4976 = vst [vmem:[#allocation57_spill] sm:$0xff] %v3930_v39  ;;  %v3932_v45 = vpop.permute.xlu0 %1539 }
 0x147   : > { %4977 = vst [vmem:[#allocation58_spill] sm:$0xff] %v3932_v45 }
 0x163   : > { %v955_v59 = vpop.permute.xlu1 %954 }
 0x164   : > { %v952_v26 = vpop.permute.xlu0 %951  ;;  %v956_v56 = vsel %vm789_vm11, %v955_v59, %v3627_v35 }
 0x165   : > { %965 = vrot.lane.b32.xlu1 %v956_v56, %s3271_s11  ;;  %v953_v32 = vsel %vm789_vm11, %v952_v26, %v3633_v37 }
 0x166   : > { %963 = vrot.lane.b32.xlu0 %v953_v32, %s3271_s11 }
 0x167   : > { %v961_v58 = vpop.permute.xlu1 %960 }
 0x168   : > { %v958_v7 = vpop.permute.xlu0 %957  ;;  %v962_v39 = vsel %vm789_vm11, %v961_v58, %v3647_v44 }
 0x169   : > { %969 = vrot.lane.b32.xlu1 %v962_v39, %s3271_s11  ;;  %v959_v45 = vsel %vm789_vm11, %v958_v7, %v3653_v46 }
 0x16a   : > { %967 = vrot.lane.b32.xlu0 %v959_v45, %s3271_s11 }
 0x16c   : > { %v794_v59 = vpop.permute.xlu0 %793 }
 0x16d   : > { %v795_v56 = vsel %vm789_vm11, %v794_v59, %v3666_v51 }
 0x16e   : > { %804 = vrot.lane.b32.xlu1 %v795_v56, %s3271_s11 }
 0x16f   : > { %v800_v26 = vpop.permute.xlu1 %799 }
 0x170   : > { %v791_v32 = vpop.permute.xlu0 %790  ;;  %v801_v45 = vsel %vm789_vm11, %v800_v26, %v3686_v63 }
 0x171   : > { %v792_v52 = vsel %vm789_vm11, %v791_v32, %v3672_v54 }
 0x172   : > { %802 = vrot.lane.b32.xlu0 %v792_v52, %s3271_s11 }
 0x173   : > { %v797_v58 = vpop.permute.xlu1 %796 }
 0x174   : > { %v1345_v39 = vpop.permute.xlu0 %1344  ;;  %v798_v7 = vsel %vm789_vm11, %v797_v58, %v3701_v5 }
 0x175   : > { %806 = vrot.lane.b32.xlu1 %v798_v7, %s3271_s11  ;;  %v1346_v52 = vsel %vm789_vm11, %v1345_v39, %v3713_v11 }
 0x176   : > { %808 = vrot.lane.b32.xlu0 %v801_v45, %s3271_s11 }
 0x177   : > { %v1348_v59 = vpop.permute.xlu1 %1347 }
 0x178   : > { %v1351_v56 = vpop.permute.xlu0 %1350  ;;  %v1349_v9 = vsel %vm789_vm11, %v1348_v59, %v3703_v6 }
 0x179   : > { %1358 = vrot.lane.b32.xlu1 %v1349_v9, %s3271_s11  ;;  %v1352_v26 = vsel %vm789_vm11, %v1351_v56, %v3745_v38 }
 0x17a   : > { %1356 = vrot.lane.b32.xlu0 %v1346_v52, %s3271_s11 }
 0x17b   : > { %v1354_v32 = vpop.permute.xlu1 %1353 }
 0x17c   : > { %v1355_v58 = vsel %vm789_vm11, %v1354_v32, %v3736_v42  ;;  %v1489_v7 = vpop.permute.xlu0 %1488 }
 0x17d   : > { %1362 = vrot.lane.b32.xlu1 %v1355_v58, %s3271_s11  ;;  %v1490_v39 = vsel %vm789_vm11, %v1489_v7, %v3773_v33 }
 0x17e   : > { %1360 = vrot.lane.b32.xlu0 %v1352_v26, %s3271_s11 }
 0x17f   : > { %v1208_v45 = vpop.permute.xlu1 %1207 }
 0x180   : > { %v1209_v9 = vsel %vm789_vm11, %v1208_v45, %v3797_v50  ;;  %v1205_v59 = vpop.permute.xlu0 %1204 }
 0x181   : > { %1218 = vrot.lane.b32.xlu1 %v1209_v9, %s3271_s11  ;;  %v1206_v32 = vsel %vm789_vm11, %v1205_v59, %v3807_v62  ;;  %v2838_v9 = vld [vmem:[%s4895_s2 + $0x210] sm:$0xff]  ;;  %v2839_v59 = vld [vmem:[%s4895_s2 + $0x218] sm:$0xff] }
 0x182   : > { %1500 = vrot.lane.b32.xlu0 %v1490_v39, %s3271_s11 }
 0x183   : > { %v1498_v52 = vpop.permute.xlu1 %1497 }
 0x184   : > { %v1499_v56 = vsel %vm789_vm11, %v1498_v52, %v3815_v60  ;;  %v1211_v58 = vpop.permute.xlu0 %1210  ;;  %v2843_v52 = vld [vmem:[%s4895_s2 + $0x238] sm:$0xff] }
 0x185   : > { %1506 = vrot.lane.b32.xlu1 %v1499_v56, %s3271_s11  ;;  %v1212_v45 = vsel %vm789_vm11, %v1211_v58, %v3827_v8 }
 0x186   : > { %1216 = vrot.lane.b32.xlu0 %v1206_v32, %s3271_s11  ;;  %v2842_v32 = vld [vmem:[%s4895_s2 + $0x230] sm:$0xff] }
 0x187   : > { %v1214_v26 = vpop.permute.xlu1 %1213 }
 0x188   : > { %v1215_v7 = vsel %vm789_vm11, %v1214_v26, %v3845_v10 }
 0x189   : > { %1222 = vrot.lane.b32.xlu1 %v1215_v7, %s3271_s11 }
 0x18a   : > { %1220 = vrot.lane.b32.xlu0 %v1212_v45, %s3271_s11 }
 0x18b   : > { %v1492_v39 = vpop.permute.xlu1 %1491 }
 0x18c   : > { %v1493_v56 = vsel %vm789_vm11, %v1492_v39, %v3857_v43 }
 0x18d   : > { %1572 = vperm.xlu1 %3165, %v2838_v9  }
 0x18e   : > { %1577 = vperm.xlu0 %3164, %v2839_v59  }
 0x191   : > { %1502 = vrot.lane.b32.xlu1 %v1493_v56, %s3271_s11 }
 0x192   : > { %1621 = vperm.xlu0 %3164, %v2843_v52  }
 0x195   : > { %v4003_v58 = vpop.permute.xlu0 %1477  ;;  %1616 = vperm.xlu1 %3165, %v2842_v32  }
 0x196   : > { %4978 = vst [vmem:[#allocation59_spill] sm:$0xff] %v4003_v58 }
 0x199   : > { %v1495_v26 = vpop.permute.xlu0 %1494 }
 0x19a   : > { %v1496_v7 = vsel %vm789_vm11, %v1495_v26, %v3861_v53 }
 0x19b   : > { %1504 = vrot.lane.b32.xlu0 %v1496_v7, %s3271_s11 }
 0x19c   : > { %v4008_v45 = vpop.permute.xlu1 %1472 }
 0x19d   : > { %4979 = vst [vmem:[#allocation60_spill] sm:$0xff] %v4008_v45  ;;  %v4012_v59 = vpop.permute.xlu0 %1567 }
 0x19e   : > { %4981 = vst [vmem:[#allocation62_spill] sm:$0xff] %v4012_v59 }
 0x1a0   : > { %v4010_v9 = vpop.permute.xlu1 %1562 }
 0x1a1   : > { %4980 = vst [vmem:[#allocation61_spill] sm:$0xff] %v4010_v9  ;;  %v4016_v52 = vpop.permute.xlu0 %1549 }
 0x1a2   : > { %4983 = vst [vmem:[#allocation64_spill] sm:$0xff] %v4016_v52 }
 0x1a4   : > { %v4014_v39 = vpop.permute.xlu1 %1544 }
 0x1a5   : > { %4982 = vst [vmem:[#allocation63_spill] sm:$0xff] %v4014_v39  ;;  %v4020_v58 = vpop.permute.xlu0 %1611 }
 0x1a6   : > { %4985 = vst [vmem:[#allocation66_spill] sm:$0xff] %v4020_v58 }
 0x1a8   : > { %v4018_v56 = vpop.permute.xlu1 %1606 }
 0x1a9   : > { %4984 = vst [vmem:[#allocation65_spill] sm:$0xff] %v4018_v56 }
 0x1d7   : > { %v966_v32 = vpop.permute.xlu1 %965 }
 0x1d8   : > { %v972_v26 = vsel %vm789_vm11, %v966_v32, %v3627_v35  ;;  %v964_v55 = vpop.permute.xlu0 %963 }
 0x1d9   : > { %v971_v7 = vsel %vm789_vm11, %v964_v55, %v3633_v37  ;;  %981 = vrot.lane.b32.xlu0 %v972_v26, %s3272_s26 }
 0x1da   : > { %979 = vrot.lane.b32.xlu1 %v971_v7, %s3272_s26 }
 0x1db   : > { %v970_v39 = vpop.permute.xlu1 %969 }
 0x1dc   : > { %v974_v52 = vsel %vm789_vm11, %v970_v39, %v3647_v44  ;;  %v968_v45 = vpop.permute.xlu0 %967 }
 0x1dd   : > { %v973_v58 = vsel %vm789_vm11, %v968_v45, %v3653_v46  ;;  %985 = vrot.lane.b32.xlu0 %v974_v52, %s3272_s26 }
 0x1de   : > { %983 = vrot.lane.b32.xlu1 %v973_v58, %s3272_s26 }
 0x1e0   : > { %v805_v32 = vpop.permute.xlu1 %804 }
 0x1e1   : > { %v811_v55 = vsel %vm789_vm11, %v805_v32, %v3666_v51 }
 0x1e2   : > { %820 = vrot.lane.b32.xlu0 %v811_v55, %s3272_s26 }
 0x1e4   : > { %v803_v26 = vpop.permute.xlu0 %802 }
 0x1e5   : > { %v810_v7 = vsel %vm789_vm11, %v803_v26, %v3672_v54 }
 0x1e6   : > { %818 = vrot.lane.b32.xlu1 %v810_v7, %s3272_s26 }
 0x1e7   : > { %v807_v39 = vpop.permute.xlu1 %806 }
 0x1e8   : > { %v812_v45 = vsel %vm789_vm11, %v807_v39, %v3701_v5  ;;  %v809_v59 = vpop.permute.xlu0 %808 }
 0x1e9   : > { %v813_v58 = vsel %vm789_vm11, %v809_v59, %v3686_v63  ;;  %822 = vrot.lane.b32.xlu0 %v812_v45, %s3272_s26 }
 0x1ea   : > { %824 = vrot.lane.b32.xlu1 %v813_v58, %s3272_s26 }
 0x1eb   : > { %v1359_v52 = vpop.permute.xlu1 %1358 }
 0x1ec   : > { %v1365_v32 = vsel %vm789_vm11, %v1359_v52, %v3703_v6  ;;  %v1357_v55 = vpop.permute.xlu0 %1356 }
 0x1ed   : > { %v1364_v26 = vsel %vm789_vm11, %v1357_v55, %v3713_v11  ;;  %1374 = vrot.lane.b32.xlu0 %v1365_v32, %s3272_s26 }
 0x1ee   : > { %1372 = vrot.lane.b32.xlu1 %v1364_v26, %s3272_s26 }
 0x1ef   : > { %v1363_v39 = vpop.permute.xlu1 %1362 }
 0x1f0   : > { %v1361_v7 = vpop.permute.xlu0 %1360  ;;  %v1367_v59 = vsel %vm789_vm11, %v1363_v39, %v3736_v42 }
 0x1f1   : > { %1446 = vrot.lane.b32.xlu0 %v1365_v32, %s3273_s30  ;;  %v1366_v45 = vsel %vm789_vm11, %v1361_v7, %v3745_v38 }
 0x1f2   : > { %1444 = vrot.lane.b32.xlu1 %v1364_v26, %s3273_s30 }
 0x1f3   : > { %v1219_v52 = vpop.permute.xlu1 %1218 }
 0x1f4   : > { %v1501_v58 = vpop.permute.xlu0 %1500  ;;  %v1225_v32 = vsel %vm789_vm11, %v1219_v52, %v3797_v50 }
 0x1f5   : > { %1378 = vrot.lane.b32.xlu0 %v1367_v59, %s3272_s26  ;;  %v1508_v55 = vsel %vm789_vm11, %v1501_v58, %v3773_v33  ;;  %v882_v33 = vsel %vm3836_vm8, %v3727_v3, 0.0  ;;  %v921_v3 = vsel %vm3817_vm7, %v3767_v4, 0.0 }
 0x1f6   : > { %1376 = vrot.lane.b32.xlu1 %v1366_v45, %s3272_s26 }
 0x1f7   : > { %v1507_v7 = vpop.permute.xlu1 %1506 }
 0x1f8   : > { %v1217_v26 = vpop.permute.xlu0 %1216 }
 0x1f9   : > { %1450 = vrot.lane.b32.xlu0 %v1367_v59, %s3273_s30  ;;  %v1224_v39 = vsel %vm789_vm11, %v1217_v26, %v3807_v62  ;;  %v1511_v59 = vsel %vm789_vm11, %v1507_v7, %v3815_v60 }
 0x1fa   : > { %1516 = vrot.lane.b32.xlu1 %v1508_v55, %s3272_s26 }
 0x1fb   : > { %v1223_v58 = vpop.permute.xlu1 %1222 }
 0x1fc   : > { %v1221_v52 = vpop.permute.xlu0 %1220 }
 0x1fd   : > { %1234 = vrot.lane.b32.xlu0 %v1225_v32, %s3272_s26  ;;  %v1226_v56 = vsel %vm789_vm11, %v1221_v52, %v3827_v8 }
 0x1fe   : > { %1448 = vrot.lane.b32.xlu1 %v1366_v45, %s3273_s30  ;;  %v1227_v45 = vsel %vm789_vm11, %v1223_v58, %v3845_v10 }
 0x201   : > { %1302 = vrot.lane.b32.xlu0 %v1225_v32, %s3273_s30 }
 0x202   : > { %1232 = vrot.lane.b32.xlu1 %v1224_v39, %s3272_s26 }
 0x205   : > { %1522 = vrot.lane.b32.xlu0 %v1511_v59, %s3272_s26 }
 0x206   : > { %1300 = vrot.lane.b32.xlu1 %v1224_v39, %s3273_s30 }
 0x209   : > { %1238 = vrot.lane.b32.xlu0 %v1227_v45, %s3272_s26 }
 0x20a   : > { %1236 = vrot.lane.b32.xlu1 %v1226_v56, %s3272_s26 }
 0x20c   : > { %v4082_v32 = vpop.permute.xlu1 %1572 }
 0x20d   : > { %4986 = vst [vmem:[#allocation67_spill] sm:$0xff] %v4082_v32  ;;  %v4084_v26 = vpop.permute.xlu0 %1577  ;;  %1306 = vrot.lane.b32.xlu0 %v1227_v45, %s3273_s30 }
 0x20e   : > { %4987 = vst [vmem:[#allocation68_spill] sm:$0xff] %v4084_v26  ;;  %1304 = vrot.lane.b32.xlu1 %v1226_v56, %s3273_s30 }
 0x210   : > { %v1503_v7 = vpop.permute.xlu1 %1502 }
 0x211   : > { %v1509_v39 = vsel %vm789_vm11, %v1503_v7, %v3857_v43  ;;  %v4090_v58 = vpop.permute.xlu0 %1621 }
 0x212   : > { %4988 = vst [vmem:[#allocation69_spill] sm:$0xff] %v4090_v58  ;;  %1588 = vrot.lane.b32.xlu1 %v1508_v55, %s3273_s30  ;;  %1518 = vrot.lane.b32.xlu0 %v1509_v39, %s3272_s26  ;;  %v4990_v55 = vlaneseq }
 0x214   : > { %v4100_v56 = vpop.permute.xlu1 %1616  ;;  %v4103_v26 = vand.u32 127, %v4990_v55 }
 0x215   : > { %v1505_v52 = vpop.permute.xlu0 %1504  ;;  %4989 = vst [vmem:[#allocation70_spill] sm:$0xff] %v4100_v56 }
 0x216   : > { %v1510_v32 = vsel %vm789_vm11, %v1505_v52, %v3861_v53  ;;  %1590 = vrot.lane.b32.xlu0 %v1509_v39, %s3273_s30  ;;  %vm779_vm12 = vcmp.ne.s32.totalorder %v4103_v26, 0  ;;  %v879_v52 = vsel %vm3799_vm5, %v3721_v61, 0.0  ;;  %vm780_vm14 = vcmp.ne.s32.totalorder %v4103_v26, 7 }
 0x217   : > { %1520 = vrot.lane.b32.xlu1 %v1510_v32, %s3272_s26  ;;  %v903_v9 = vmul.f32 %v3585_v14, %v879_v52  ;;  %vm1661_vm0 = vcmp.eq.s32.totalorder %v4103_v26, 0 }
 0x21a   : > { %1594 = vrot.lane.b32.xlu0 %v1511_v59, %s3273_s30  ;;  %v880_v59 = vsel %vm3789_vm4, %v3694_v1, 0.0 }
 0x21b   : > { %1592 = vrot.lane.b32.xlu1 %v1510_v32, %s3273_s30  ;;  %v920_v32 = vsel %vm3789_vm4, %v3690_v0, 0.0  ;;  %v904_v6 = vmul.f32 %v3587_v15, %v880_v59  ;;  %s3274_s30 = smov 1  }
 0x21c   : > { %v944_v0 = vmul.f32 %v3589_v16, %v920_v32 }
 0x24b   : > { %v982_v45 = vpop.permute.xlu0 %981 }
 0x24c   : > { %v980_v7 = vpop.permute.xlu1 %979  ;;  %v992_v32 = vsel %vm779_vm12, %v982_v45, 0.0 }
 0x24f   : > { %v986_v58 = vpop.permute.xlu0 %985 }
 0x250   : > { %v984_v60 = vpop.permute.xlu1 %983 }
 0x251   : > { %v993_v40 = vsel %vm779_vm12, %v984_v60, 0.0 }
 0x254   : > { %v821_v43 = vpop.permute.xlu0 %820 }
 0x255   : > { %v4108_v39 = vsel %vm779_vm12, %v821_v43, 0.0  ;;  %v919_v43 = vsel %vm3799_vm5, %v3756_v41, 0.0 }
 0x256   : > { %v835_v53 = vrot.slane %v4108_v39, 7  ;;  %v943_v16 = vmul.f32 %v3591_v17, %v919_v43  ;;  %v922_v43 = vsel %vm3836_vm8, %v3785_v57, 0.0  ;;  %v1016_v57 = vmul.f32 %v3601_v22, %v992_v32 }
 0x257   : > { %v991_v22 = vsel %vm779_vm12, %v980_v7, 0.0  ;;  %v946_v30 = vmul.f32 %v3607_v25, %v922_v43  ;;  %v4992_v43 = vld [vmem:[#allocation12_spill] sm:$0xff] }
 0x258   : > { %v819_v55 = vpop.permute.xlu1 %818 }
 0x259   : > { %v4121_v56 = vsel %vm779_vm12, %v819_v55, 0.0  ;;  %v881_v55 = vsel %vm3817_vm7, %v3731_v2, 0.0 }
 0x25a   : > { %v834_v1 = vrot.slane %v4121_v56, 7  ;;  %v905_v48 = vmul.f32 %v3599_v21, %v881_v55 }
 0x25b   : > { %v823_v61 = vpop.permute.xlu0 %822 }
 0x25c   : > { %v841_v41 = vsel %vm838_vm1, %v834_v1, %v835_v53  ;;  %v4141_v8 = vsel %vm779_vm12, %v823_v61, 0.0  ;;  %v825_v15 = vpop.permute.xlu1 %824  ;;  %v906_v61 = vmul.f32 %v3597_v20, %v882_v33 }
 0x25d   : > { %v844_v14 = vsel %vm3789_vm4, %v841_v41, 0.0  ;;  %v836_v59 = vrot.slane %v4141_v8, 7  ;;  %v4149_v2 = vsel %vm779_vm12, %v825_v15, 0.0 }
 0x25e   : > { %v868_v52 = vmul.f32 %v3581_v12, %v844_v14  ;;  %v837_v17 = vrot.slane %v4149_v2, 7 }
 0x25f   : > { %v840_v41 = vsel %vm838_vm1, %v835_v53, %v836_v59  ;;  %v4165_v15 = vpop.permute.xlu0 %1374 }
 0x260   : > { %v908_v4 = vadd.f32 %v904_v6, %v868_v52  ;;  %v845_v45 = vsel %vm3817_vm7, %v840_v41, 0.0  ;;  %v839_v12 = vsel %vm838_vm1, %v836_v59, %v837_v17  ;;  %v842_v21 = vsel %vm838_vm1, %v837_v17, %v834_v1  ;;  %v4173_v55 = vpop.permute.xlu1 %1372 }
 0x261   : > { %v869_v20 = vmul.f32 %v3595_v19, %v845_v45  ;;  %v843_v33 = vsel %vm3799_vm5, %v842_v21, 0.0  ;;  %v846_v6 = vsel %vm3836_vm8, %v839_v12, 0.0  ;;  %v945_v1 = vmul.f32 %v3605_v24, %v921_v3  ;;  %v4996_v45 = vld [vmem:[#allocation11_spill] sm:$0xff]  ;;  %v4997_v21 = vld [vmem:[#allocation25_spill] sm:$0xff] }
 0x262   : > { %v948_v53 = vadd.f32 %v944_v0, %v908_v4  ;;  %v867_v14 = vmul.f32 %v3583_v13, %v843_v33  ;;  %v870_v49 = vmul.f32 %v3593_v18, %v846_v6  ;;  %v994_v19 = vsel %vm779_vm12, %v986_v58, 0.0 }
 0x263   : > { %v909_v47 = vadd.f32 %v905_v48, %v869_v20  ;;  %v4190_v59 = vpop.permute.xlu0 %1446  ;;  %v1044_v13 = vmul.f32 %v3625_v34, %v3611_v27  ;;  %v1072_v18 = vmul.f32 %v3627_v35, %v3619_v31  ;;  %v1017_v24 = vmul.f32 %v3613_v28, %v993_v40  ;;  %v4994_v31 = vld [vmem:[#allocation6_spill] sm:$0xff]  ;;  %v4995_v35 = vld [vmem:[#allocation15_spill] sm:$0xff] }
 0x264   : > { %v1020_v32 = vadd.f32 %v1016_v57, %v948_v53  ;;  %v907_v60 = vadd.f32 %v903_v9, %v867_v14  ;;  %v910_v0 = vadd.f32 %v906_v61, %v870_v49  ;;  %v4193_v52 = vpop.permute.xlu1 %1444  ;;  %v1015_v58 = vmul.f32 %v3603_v23, %v991_v22  ;;  %v4991_v9 = vld [vmem:[#allocation5_spill] sm:$0xff]  ;;  %v4999_v40 = vld [vmem:[#allocation26_spill] sm:$0xff] }
 0x265   : > { %v949_v7 = vadd.f32 %v945_v1, %v909_v47  ;;  %v1018_v3 = vmul.f32 %v3615_v29, %v994_v19  ;;  %v1043_v48 = vmul.f32 %v4991_v9, %v3631_v36  ;;  %v4993_v61 = vld [vmem:[#allocation13_spill] sm:$0xff]  ;;  %v1071_v28 = vmul.f32 %v4994_v31, %v3633_v37  ;;  %v5000_v37 = vld [vmem:[#allocation42_spill] sm:$0xff]  ;;  %v5009_v9 = vld [vmem:[#allocation47_spill] sm:$0xff] }
 0x266   : > { %v947_v17 = vadd.f32 %v943_v16, %v907_v60  ;;  %v950_v25 = vadd.f32 %v946_v30, %v910_v0  ;;  %v1045_v41 = vmul.f32 %v4993_v61, %v4992_v43  ;;  %v1048_v34 = vadd.f32 %v1044_v13, %v1020_v32  ;;  %v4998_v57 = vld [vmem:[#allocation21_spill] sm:$0xff]  ;;  %v5001_v22 = vld [vmem:[#allocation30_spill] sm:$0xff]  ;;  %v5003_v32 = vld [vmem:[#allocation39_spill] sm:$0xff] }
 0x267   : > { %v1021_v4 = vadd.f32 %v1017_v24, %v949_v7  ;;  %v4206_v27 = vpop.permute.xlu0 %1378  ;;  %v1046_v23 = vmul.f32 %v4996_v45, %v4995_v35  ;;  %v1073_v36 = vmul.f32 %v4997_v21, %v3653_v46  ;;  %v1100_v20 = vmul.f32 %v4998_v57, %v4108_v39  ;;  %v5002_v19 = vld [vmem:[#allocation14_spill] sm:$0xff]  ;;  %v5004_v0 = vld [vmem:[#allocation20_spill] sm:$0xff]  ;;  %v5012_v31 = vld [vmem:[#allocation53_spill] sm:$0xff] }
 0x268   : > { %v1019_v12 = vadd.f32 %v1015_v58, %v947_v17  ;;  %v1022_v29 = vadd.f32 %v1018_v3, %v950_v25  ;;  %v4212_v16 = vpop.permute.xlu1 %1376  ;;  %v1076_v6 = vadd.f32 %v1072_v18, %v1048_v34  ;;  %v1074_v53 = vmul.f32 %v3647_v44, %v4999_v40  ;;  %v5005_v44 = vld [vmem:[#allocation40_spill] sm:$0xff]  ;;  %v5008_v25 = vld [vmem:[#allocation19_spill] sm:$0xff] }
 0x269   : > { %v1049_v33 = vadd.f32 %v1045_v41, %v1021_v4  ;;  %v1156_v49 = vmul.f32 %v3666_v51, %v5000_v37  ;;  %v1128_v47 = vmul.f32 %v5002_v19, %v5001_v22  ;;  %v1101_v46 = vmul.f32 %v5003_v32, %v4141_v8  ;;  %v5006_v58 = vld [vmem:[#allocation16_spill] sm:$0xff]  ;;  %v5011_v41 = vld [vmem:[#allocation17_spill] sm:$0xff]  ;;  %v5017_v32 = vld [vmem:[#allocation23_spill] sm:$0xff] }
 0x26a   : > { %v1050_v14 = vadd.f32 %v1046_v23, %v1022_v29  ;;  %v1047_v1 = vadd.f32 %v1043_v48, %v1019_v12  ;;  %v1104_v39 = vadd.f32 %v1100_v20, %v1076_v6  ;;  %v1099_v13 = vmul.f32 %v5004_v0, %v4121_v56  ;;  %v5007_v3 = vld [vmem:[#allocation28_spill] sm:$0xff]  ;;  %v5013_v23 = vld [vmem:[#allocation41_spill] sm:$0xff]  ;;  %v5014_v29 = vld [vmem:[#allocation54_spill] sm:$0xff] }
 0x26b   : > { %v1077_v30 = vadd.f32 %v1073_v36, %v1049_v33  ;;  %v4226_v60 = vpop.permute.xlu0 %1450  ;;  %v1102_v24 = vmul.f32 %v5005_v44, %v4149_v2  ;;  %v1127_v17 = vmul.f32 %v5007_v3, %v5006_v58  ;;  %v1129_v48 = vmul.f32 %v5009_v9, %v5008_v25  ;;  %v5010_v61 = vld [vmem:[#allocation48_spill] sm:$0xff]  ;;  %v5019_v44 = vld [vmem:[#allocation55_spill] sm:$0xff] }
 0x26c   : > { %v1078_v18 = vadd.f32 %v1074_v53, %v1050_v14  ;;  %v4232_v7 = vpop.permute.xlu1 %1516  ;;  %v1075_v51 = vadd.f32 %v1071_v28, %v1047_v1  ;;  %v1132_v43 = vadd.f32 %v1128_v47, %v1104_v39  ;;  %v1130_v4 = vmul.f32 %v5011_v41, %v5010_v61  ;;  %v5016_v47 = vld [vmem:[#allocation10_spill] sm:$0xff] }
 0x26d   : > { %v1105_v8 = vadd.f32 %v1101_v46, %v1077_v30  ;;  %v1157_v2 = vmul.f32 %v5012_v31, %v3701_v5  ;;  %v1155_v12 = vmul.f32 %v5013_v23, %v3672_v54  ;;  %v1158_v21 = vmul.f32 %v3686_v63, %v5014_v29  ;;  %v5015_v63 = vld [vmem:[#allocation8_spill] sm:$0xff] }
 0x26e   : > { %v1106_v34 = vadd.f32 %v1102_v24, %v1078_v18  ;;  %v1103_v56 = vadd.f32 %v1099_v13, %v1075_v51  ;;  %v4242_v28 = vadd.f32 %v1156_v49, %v1132_v43  ;;  %v1293_v30 = vmul.f32 %v5016_v47, %v3797_v50  ;;  %v5018_v13 = vld [vmem:[#allocation7_spill] sm:$0xff]  ;;  %v5020_v51 = vld [vmem:[#allocation56_spill] sm:$0xff] }
 0x26f   : > { %v1133_v35 = vadd.f32 %v1129_v48, %v1105_v8  ;;  %v1235_v45 = vpop.permute.xlu0 %1234  ;;  %v4279_v24 = vmul.f32 %v5019_v44, %v3745_v38  ;;  %v4283_v58 = vmul.f32 %v5020_v51, %v3736_v42  ;;  %v1385_v25 = vsel %vm779_vm12, %v4165_v15, 0.0  ;;  %v5021_v38 = vld [vmem:[#allocation9_spill] sm:$0xff]  ;;  %v5036_v44 = vld [vmem:[#allocation51_spill] sm:$0xff] }
 0x270   : > { %v1134_v36 = vadd.f32 %v1130_v4, %v1106_v34  ;;  %v1245_v57 = vsel %vm779_vm12, %v1235_v45, 0.0  ;;  %v4250_v20 = vpop.permute.xlu1 %1448  ;;  %v1131_v33 = vadd.f32 %v1127_v17, %v1103_v56  ;;  %v1636_v5 = vsel %vm1632_vm13, %v4242_v28, 0.0  ;;  %v5022_v42 = vld [vmem:[#allocation45_spill] sm:$0xff]  ;;  %v5023_v56 = vld [vmem:[#allocation22_spill] sm:$0xff] }
 0x271   : > { %v1646_v6 = vmul.f32 %v4242_v28, %v4242_v28  ;;  %1637 = vadd.xlane.f32.xlu0 %v1636_v5  ;;  %v4256_v40 = vadd.f32 %v1157_v2, %v1133_v35  ;;  %v1269_v14 = vmul.f32 %v5015_v63, %v1245_v57  ;;  %v1384_v9 = vsel %vm779_vm12, %v4173_v55, 0.0  ;;  %v5025_v2 = vld [vmem:[#allocation29_spill] sm:$0xff]  ;;  %v5026_v35 = vld [vmem:[#allocation35_spill] sm:$0xff]  ;;  %v5027_v45 = vld [vmem:[#allocation38_spill] sm:$0xff] }
 0x272   : > { %v4258_v54 = vadd.f32 %v1155_v12, %v1131_v33  ;;  %v4260_v53 = vadd.f32 %v1158_v21, %v1134_v36  ;;  %v1292_v48 = vmul.f32 %v5021_v38, %v3807_v62  ;;  %v1436_v8 = vmul.f32 %v5022_v42, %v3713_v11  ;;  %v5024_v62 = vld [vmem:[#allocation36_spill] sm:$0xff]  ;;  %v5028_v12 = vld [vmem:[#allocation37_spill] sm:$0xff] }
 0x273   : > { %v1303_v37 = vpop.permute.xlu0 %1302  ;;  %v1652_v49 = vsel %vm1632_vm13, %v1646_v6, 0.0  ;;  %v1639_v19 = vsel %vm1632_vm13, %v4256_v40, 0.0  ;;  %v1297_v50 = vadd.f32 %v1293_v30, %v1269_v14  ;;  %v1647_v15 = vmul.f32 %v4256_v40, %v4256_v40 }
 0x274   : > { %v1313_v1 = vsel %vm780_vm14, %v1303_v37, 0.0  ;;  %1653 = vadd.xlane.f32.xlu1 %v1652_v49  ;;  %v1233_v22 = vpop.permute.xlu1 %1232  ;;  %v1645_v0 = vmul.f32 %v4258_v54, %v4258_v54  ;;  %v1633_v17 = vsel %vm1632_vm13, %v4258_v54, 0.0  ;;  %v1295_v31 = vmul.f32 %v5024_v62, %v3845_v10  ;;  %v5029_v37 = vld [vmem:[#allocation32_spill] sm:$0xff] }
 0x275   : > { %v1337_v46 = vmul.f32 %v5017_v32, %v1313_v1  ;;  %v1244_v39 = vsel %vm779_vm12, %v1233_v22, 0.0  ;;  %1640 = vadd.xlane.f32.xlu0 %v1639_v19  ;;  %v1294_v11 = vmul.f32 %v5026_v35, %v5025_v2  ;;  %v1409_v23 = vmul.f32 %v5027_v45, %v1385_v25  ;;  %v5030_v19 = vld [vmem:[#allocation24_spill] sm:$0xff]  ;;  %v5032_v32 = vld [vmem:[#allocation31_spill] sm:$0xff]  ;;  %v5041_v35 = vld [vmem:[#allocation49_spill] sm:$0xff] }
 0x276   : > { %v1268_v18 = vmul.f32 %v5018_v13, %v1244_v39  ;;  %v1649_v4 = vsel %vm1632_vm13, %v1645_v0, 0.0  ;;  %v1408_v29 = vmul.f32 %v5028_v12, %v1384_v9  ;;  %v1642_v36 = vsel %vm1632_vm13, %v4260_v53, 0.0  ;;  %v5034_v39 = vld [vmem:[#allocation46_spill] sm:$0xff]  ;;  %v5035_v13 = vld [vmem:[#allocation52_spill] sm:$0xff] }
 0x277   : > { %v1523_v3 = vpop.permute.xlu0 %1522  ;;  %v1341_v61 = vadd.f32 %v1337_v46, %v1297_v50  ;;  %v1648_v57 = vmul.f32 %v4260_v53, %v4260_v53  ;;  %v1457_v33 = vsel %vm780_vm14, %v4190_v59, 0.0  ;;  %v1456_v10 = vsel %vm780_vm14, %v4193_v52, 0.0  ;;  %v5031_v59 = vld [vmem:[#allocation61_spill] sm:$0xff]  ;;  %v5033_v46 = vld [vmem:[#allocation18_spill] sm:$0xff] }
 0x278   : > { %1634 = vadd.xlane.f32.xlu1 %v1633_v17  ;;  %v1301_v43 = vpop.permute.xlu1 %1300  ;;  %v1296_v34 = vadd.f32 %v1292_v48, %v1268_v18  ;;  %v1655_v22 = vsel %vm1632_vm13, %v1647_v15, 0.0  ;;  %v1580_v47 = vmul.f32 %v5031_v59, %v5030_v19  ;;  %v1437_v0 = vmul.f32 %v5034_v39, %v5033_v46  ;;  %v5046_v19 = vld [vmem:[#allocation59_spill] sm:$0xff] }
 0x279   : > { %v1312_v41 = vsel %vm780_vm14, %v1301_v43, 0.0  ;;  %1650 = vadd.xlane.f32.xlu0 %v1649_v4  ;;  %v1413_v14 = vadd.f32 %v1409_v23, %v1341_v61  ;;  %v1481_v18 = vmul.f32 %v5035_v13, %v1457_v33  ;;  %v1480_v51 = vmul.f32 %v5036_v44, %v1456_v10 }
 0x27a   : > { %v1336_v55 = vmul.f32 %v5023_v56, %v1312_v41  ;;  %v1528_v50 = vsel %vm779_vm12, %v4232_v7, 0.0  ;;  %v1658_v25 = vsel %vm1632_vm13, %v1648_v57, 0.0  ;;  %v1387_v9 = vsel %vm779_vm12, %v4206_v27, 0.0  ;;  %v5037_v41 = vld [vmem:[#allocation44_spill] sm:$0xff] }
 0x27b   : > { %v1239_v21 = vpop.permute.xlu0 %1238  ;;  %v1386_v38 = vsel %vm779_vm12, %v4212_v16, 0.0  ;;  %v1441_v15 = vadd.f32 %v1437_v0, %v1413_v14  ;;  %v5040_v16 = vld [vmem:[#allocation50_spill] sm:$0xff]  ;;  %v1458_v12 = vsel %vm780_vm14, %v4250_v20, 0.0  ;;  %v5043_v20 = vld [vmem:[#allocation65_spill] sm:$0xff] }
 0x27c   : > { %v1340_v5 = vadd.f32 %v1336_v55, %v1296_v34  ;;  %v1247_v6 = vsel %vm779_vm12, %v1239_v21, 0.0  ;;  %1643 = vadd.xlane.f32.xlu1 %v1642_v36  ;;  %v1237_v63 = vpop.permute.xlu1 %1236  ;;  %v5038_v34 = vld [vmem:[#allocation57_spill] sm:$0xff]  ;;  %v5039_v55 = vld [vmem:[#allocation43_spill] sm:$0xff]  ;;  %v1410_v45 = vmul.f32 %v5041_v35, %v1386_v38 }
 0x27d   : > { %v1271_v49 = vmul.f32 %v5029_v37, %v1247_v6  ;;  %v1246_v1 = vsel %vm779_vm12, %v1237_v63, 0.0  ;;  %1656 = vadd.xlane.f32.xlu0 %v1655_v22  ;;  %v1552_v56 = vmul.f32 %v5038_v34, %v1528_v50  ;;  %v1485_v10 = vadd.f32 %v1481_v18, %v1441_v15  ;;  %v5042_v63 = vld [vmem:[#allocation58_spill] sm:$0xff]  ;;  %v5048_v18 = vld [vmem:[#allocation64_spill] sm:$0xff] }
 0x27e   : > { %v1412_v30 = vadd.f32 %v1408_v29, %v1340_v5  ;;  %v1270_v52 = vmul.f32 %v5032_v32, %v1246_v1  ;;  %v1531_v29 = vsel %vm779_vm12, %v1523_v3, 0.0  ;;  %v5044_v1 = vld [vmem:[#allocation33_spill] sm:$0xff]  ;;  %v5045_v3 = vld [vmem:[#allocation62_spill] sm:$0xff]  ;;  %v5047_v32 = vld [vmem:[#allocation60_spill] sm:$0xff] }
 0x27f   : > { %v1307_v17 = vpop.permute.xlu0 %1306  ;;  %v1299_v61 = vadd.f32 %v1295_v31, %v1271_v49  ;;  %v1459_v31 = vsel %vm780_vm14, %v4226_v60, 0.0  ;;  %v1581_v22 = vmul.f32 %v5045_v3, %v5044_v1  ;;  %v1555_v44 = vmul.f32 %v5048_v18, %v1531_v29  ;;  %v5053_v34 = vld [vmem:[#allocation34_spill] sm:$0xff]  ;;  %v2844_v1 = vld [vmem:[%s4897_s4 + $0x20] sm:$0xff] }
 0x280   : > { %v1440_v48 = vadd.f32 %v1436_v8, %v1412_v30  ;;  %v1315_v42 = vsel %vm780_vm14, %v1307_v17, 0.0  ;;  %1659 = vadd.xlane.f32.xlu1 %v1658_v25  ;;  %v1305_v43 = vpop.permute.xlu1 %1304  ;;  %v1298_v27 = vadd.f32 %v1294_v11, %v1270_v52  ;;  %v1411_v8 = vmul.f32 %v5040_v16, %v1387_v9  ;;  %v5049_v25 = vld [vmem:[#allocation66_spill] sm:$0xff]  ;;  %v305_v3 = vld [vmem:[%s4897_s4] sm:$0xff] }
 0x281   : > { %v1339_v7 = vmul.f32 %v5037_v41, %v1315_v42  ;;  %v1314_v4 = vsel %vm780_vm14, %v1305_v43, 0.0  ;;  %v1483_v59 = vmul.f32 %v5046_v19, %v1459_v31  ;;  %v1482_v52 = vmul.f32 %v5047_v32, %v1458_v12  ;;  %v5051_v42 = vld [vmem:[#allocation68_spill] sm:$0xff]  ;;  %v5056_v29 = vld [vmem:[#allocation70_spill] sm:$0xff] }
 0x282   : > { %v1338_v62 = vmul.f32 %v5039_v55, %v1314_v4  ;;  %v1484_v2 = vadd.f32 %v1480_v51, %v1440_v48  ;;  %v5050_v48 = vld [vmem:[#allocation27_spill] sm:$0xff] }
 0x283   : > { %v1343_v23 = vadd.f32 %v1339_v7, %v1299_v61  ;;  %v1583_v43 = vmul.f32 %v5051_v42, %v5050_v48  ;;  %v5052_v61 = vld [vmem:[#allocation63_spill] sm:$0xff] }
 0x284   : > { %v1342_v11 = vadd.f32 %v1338_v62, %v1298_v27  ;;  %v1519_v21 = vpop.permute.xlu0 %1518  ;;  %v1556_v36 = vadd.f32 %v1552_v56, %v1484_v2  ;;  %v1589_v57 = vpop.permute.xlu1 %1588  ;;  %v5054_v56 = vld [vmem:[#allocation67_spill] sm:$0xff] }
 0x285   : > { %v1415_v33 = vadd.f32 %v1411_v8, %v1343_v23  ;;  %v1529_v5 = vsel %vm779_vm12, %v1519_v21, 0.0  ;;  %v1600_v60 = vsel %vm780_vm14, %v1589_v57, 0.0  ;;  %v1582_v27 = vmul.f32 %v5054_v56, %v5053_v34  ;;  %v5055_v8 = vld [vmem:[#allocation69_spill] sm:$0xff] }
 0x286   : > { %v1414_v6 = vadd.f32 %v1410_v45, %v1342_v11  ;;  %v1553_v14 = vmul.f32 %v5042_v63, %v1529_v5  ;;  %v1584_v37 = vadd.f32 %v1580_v47, %v1556_v36  ;;  %v1624_v49 = vmul.f32 %v5043_v20, %v1600_v60 }
 0x287   : > { %v1443_v30 = vadd.f32 %v4283_v58, %v1415_v33  ;;  %v4406_v33 = vld [vmem:[%s4896_s3] sm:$0xff] }
 0x288   : > { %v1557_v46 = vadd.f32 %v1553_v14, %v1485_v10  ;;  %v4370_v39 = vadd.f32 %v1624_v49, %v1584_v37  ;;  %v1591_v0 = vpop.permute.xlu0 %1590  ;;  %v1442_v13 = vadd.f32 %v4279_v24, %v1414_v6  ;;  %3022 = vmatprep.mubr.msk.f32.mxu0 %vm1666_vm15, %v4406_v33  ;;  %3036 = vmatprep.mubr.msk.f32.mxu1 %vm1666_vm15, %v4406_v33  ;;  %v306_v49 = vld [vmem:[%s4897_s4 + $0x8] sm:$0xff] }
 0x289   : > { %v1601_v47 = vsel %vm780_vm14, %v1591_v0, 0.0  ;;  %v1521_v51 = vpop.permute.xlu1 %1520  ;;  %v1487_v50 = vadd.f32 %v1483_v59, %v1443_v30 }
 0x28a   : > { %v1585_v17 = vadd.f32 %v1581_v22, %v1557_v46  ;;  %v1625_v9 = vmul.f32 %v5049_v25, %v1601_v47  ;;  %v1486_v38 = vadd.f32 %v1482_v52, %v1442_v13  ;;  %v1530_v58 = vsel %vm779_vm12, %v1521_v51, 0.0  ;;  %v4451_v25 = vld [vmem:[%s4896_s3 + $0x10] sm:$0xff] }
 0x28b   : > { %v1554_v41 = vmul.f32 %v5052_v61, %v1530_v58  ;;  %v2181_v24 = vsel %vm1632_vm13, %v4370_v39, 0.0  ;;  %v1559_v7 = vadd.f32 %v1555_v44, %v1487_v50  ;;  %v2193_v5 = vmul.f32 %v4370_v39, %v4370_v39 }
 0x28c   : > { %v4384_v4 = vadd.f32 %v1625_v9, %v1585_v17  ;;  %2182 = vadd.xlane.f32.xlu0 %v2181_v24  ;;  %v1595_v15 = vpop.permute.xlu0 %1594  ;;  %v4446_v17 = vld [vmem:[%s4896_s3 + $0x8] sm:$0xff]  ;;  %v4460_v9 = vld [vmem:[%s4896_s3 + $0x18] sm:$0xff] }
 0x28d   : > { %v1558_v55 = vadd.f32 %v1554_v41, %v1486_v38  ;;  %v1587_v62 = vadd.f32 %v1583_v43, %v1559_v7  ;;  %v1603_v2 = vsel %vm780_vm14, %v1595_v15, 0.0  ;;  %v1593_v16 = vpop.permute.xlu1 %1592  ;;  %v2197_v63 = vsel %vm1632_vm13, %v2193_v5, 0.0 }
 0x28e   : > { %v1627_v35 = vmul.f32 %v5055_v8, %v1603_v2  ;;  %v1602_v45 = vsel %vm780_vm14, %v1593_v16, 0.0  ;;  %v2184_v31 = vsel %vm1632_vm13, %v4384_v4, 0.0  ;;  %v2194_v23 = vmul.f32 %v4384_v4, %v4384_v4 }
 0x28f   : > { %v1586_v12 = vadd.f32 %v1582_v27, %v1558_v55  ;;  %v1626_v11 = vmul.f32 %v5056_v29, %v1602_v45  ;;  %2185 = vadd.xlane.f32.xlu1 %v2184_v31 }
 0x290   : > { %v4400_v36 = vadd.f32 %v1627_v35, %v1587_v62  ;;  %v2200_v57 = vsel %vm1632_vm13, %v2194_v23, 0.0 }
 0x291   : > { %v4398_v21 = vadd.f32 %v1626_v11, %v1586_v12 }
 0x292   : > { %v2190_v60 = vsel %vm1632_vm13, %v4400_v36, 0.0  ;;  %v2196_v6 = vmul.f32 %v4400_v36, %v4400_v36 }
 0x293   : > { %2201 = vadd.xlane.f32.xlu1 %v2200_v57  ;;  %v2187_v10 = vsel %vm1632_vm13, %v4398_v21, 0.0  ;;  %v2195_v14 = vmul.f32 %v4398_v21, %v4398_v21 }
 0x294   : > { %2188 = vadd.xlane.f32.xlu0 %v2187_v10  ;;  %v2206_v37 = vsel %vm1632_vm13, %v2196_v6, 0.0 }
 0x295   : > { %v2203_v20 = vsel %vm1632_vm13, %v2195_v14, 0.0  ;;  %v2849_v14 = vld [vmem:[%s4897_s4 + $0x48] sm:$0xff] }
 0x297   : > { %2191 = vadd.xlane.f32.xlu1 %v2190_v60 }
 0x298   : > { %2198 = vadd.xlane.f32.xlu0 %v2197_v63  ;;  %v2845_v63 = vld [vmem:[%s4897_s4 + $0x28] sm:$0xff] }
 0x29b   : > { %2207 = vadd.xlane.f32.xlu1 %v2206_v37  ;;  %v2848_v37 = vld [vmem:[%s4897_s4 + $0x40] sm:$0xff] }
 0x29c   : > { %2204 = vadd.xlane.f32.xlu0 %v2203_v20  ;;  %v307_v20 = vld [vmem:[%s4897_s4 + $0x10] sm:$0xff] }
 0x2ac   : > { %1867 = vperm.xlu1 %3165, %v306_v49   ;;  %v2846_v49 = vld [vmem:[%s4897_s4 + $0x30] sm:$0xff] }
 0x2b0   : > { %1886 = vperm.xlu1 %3165, %v2844_v1   ;;  %v308_v1 = vld [vmem:[%s4897_s4 + $0x18] sm:$0xff] }
 0x2b2   : > { %1862 = vperm.xlu0 %3164, %v305_v3   ;;  %v2847_v3 = vld [vmem:[%s4897_s4 + $0x38] sm:$0xff] }
 0x2fe   : > { %v1638_v22 = vpop.xlane.xlu0 %1637 }
 0x301   : > { %v1654_v19 = vpop.xlane.xlu1 %1653 }
 0x302   : > { %v1641_v59 = vpop.xlane.xlu0 %1640  ;;  %v1663_v52 = vsel %vm1661_vm0, %v1638_v22, %v1654_v19  ;;  %v2852_v22 = vld [vmem:[%s4897_s4 + $0x60] sm:$0xff]  ;;  %v2853_v19 = vld [vmem:[%s4897_s4 + $0x68] sm:$0xff] }
 0x305   : > { %v1635_v30 = vpop.xlane.xlu1 %1634 }
 0x306   : > { %v1651_v32 = vpop.xlane.xlu0 %1650 }
 0x307   : > { %v1662_v46 = vsel %vm1661_vm0, %v1635_v30, %v1651_v32  ;;  %v2850_v30 = vld [vmem:[%s4897_s4 + $0x50] sm:$0xff]  ;;  %v2857_v32 = vld [vmem:[%s4897_s4 + $0x88] sm:$0xff] }
 0x308   : > { %v3086_v0 = vpack.c.bf16 %v1663_v52, %v1662_v46  ;;  %v2851_v52 = vld [vmem:[%s4897_s4 + $0x58] sm:$0xff]  ;;  %v2861_v46 = vld [vmem:[%s4897_s4 + $0xa8] sm:$0xff] }
 0x309   : > { %v1644_v13 = vpop.xlane.xlu1 %1643 }
 0x30a   : > { %3087 = vmatprep.subr.bf16.mxu0 %v3086_v0  ;;  %v1657_v18 = vpop.xlane.xlu0 %1656 }
 0x30b   : > { %3089 = vmatpush3.bf16.msra.mxu0 %v3086_v0  ;;  %v1664_v47 = vsel %vm1661_vm0, %v1641_v59, %v1657_v18  ;;  %v2854_v59 = vld [vmem:[%s4897_s4 + $0x70] sm:$0xff]  ;;  %v2855_v0 = vld [vmem:[%s4897_s4 + $0x78] sm:$0xff]  ;;  %v2856_v18 = vld [vmem:[%s4897_s4 + $0x80] sm:$0xff] }
 0x30d   : > { %v1660_v44 = vpop.xlane.xlu1 %1659 }
 0x30e   : > { %v1665_v51 = vsel %vm1661_vm0, %v1644_v13, %v1660_v44  ;;  %v2865_v13 = vld [vmem:[%s4897_s4 + $0xc8] sm:$0xff]  ;;  %v2859_v44 = vld [vmem:[%s4897_s4 + $0x98] sm:$0xff] }
 0x30f   : > { %v3090_v50 = vpack.c.bf16 %v1665_v51, %v1664_v47  ;;  %v2860_v47 = vld [vmem:[%s4897_s4 + $0xa0] sm:$0xff]  ;;  %v3275_v51 = vmov 1  }
 0x311   : > { %3091 = vmatprep.subr.bf16.mxu0 %v3090_v50 }
 0x312   : > { %3093 = vmatpush3.bf16.msra.mxu0 %v3090_v50  ;;  %v2864_v50 = vld [vmem:[%s4897_s4 + $0xc0] sm:$0xff] }
 0x315   : > { %3023 = vmatmul.mubr.msk.f32.vlgmr.msra.gmra.mrb[8].mxu0 %vm1666_vm15, %v4446_v17 }
 0x316   : > { %3025 = vmatprep.mubr.msk.f32.mxu0 %vm1666_vm15, %v4451_v25 }
 0x319   : > { %3026 = vmatmul.mubr.msk.f32.gmra.mrb[10].mxu0 %vm1666_vm15, %v4460_v9  ;;  %v2183_v58 = vpop.xlane.xlu0 %2182 }
 0x31a   : > { %3050 = vmatprep.mubr.msk.f32.mxu0 %vm1666_vm15, %v4406_v33 }
 0x31c   : > { %v2186_v38 = vpop.xlane.xlu1 %2185 }
 0x320   : > { %v2202_v48 = vpop.xlane.xlu1 %2201 }
 0x321   : > { %v2189_v42 = vpop.xlane.xlu0 %2188  ;;  %v2210_v41 = vsel %vm1661_vm0, %v2186_v38, %v2202_v48  ;;  %v2858_v38 = vld [vmem:[%s4897_s4 + $0x90] sm:$0xff] }
 0x324   : > { %v2192_v43 = vpop.xlane.xlu1 %2191 }
 0x325   : > { %v2199_v61 = vpop.xlane.xlu0 %2198 }
 0x326   : > { %v2209_v24 = vsel %vm1661_vm0, %v2183_v58, %v2199_v61 }
 0x327   : > { %v3102_v7 = vpack.c.bf16 %v2210_v41, %v2209_v24 }
 0x328   : > { %v2208_v15 = vpop.xlane.xlu1 %2207 }
 0x329   : > { %v2212_v34 = vsel %vm1661_vm0, %v2192_v43, %v2208_v15  ;;  %v2205_v56 = vpop.xlane.xlu0 %2204  ;;  %3103 = vmatprep.subr.bf16.mxu0 %v3102_v7 }
 0x32a   : > { %v2211_v27 = vsel %vm1661_vm0, %v2189_v42, %v2205_v56  ;;  %3105 = vmatpush3.bf16.msra.mxu0 %v3102_v7 }
 0x32b   : > { %v3106_v55 = vpack.c.bf16 %v2212_v34, %v2211_v27 }
 0x32c   : > { %v4593_v58 = vpop.permute.xlu1 %1867 }
 0x32d   : > { %3107 = vmatprep.subr.bf16.mxu0 %v3106_v55 }
 0x32e   : > { %3109 = vmatpush3.bf16.msra.mxu0 %v3106_v55 }
 0x330   : > { %v4597_v42 = vpop.permute.xlu1 %1886 }
 0x331   : > { %3051 = vmatmul.mubr.msk.f32.vlgmr.msra.gmra.mrb[12].mxu0 %vm1666_vm15, %v4446_v17  ;;  %v4595_v48 = vpop.permute.xlu0 %1862 }
 0x332   : > { %3053 = vmatprep.mubr.msk.f32.mxu0 %vm1666_vm15, %v4451_v25 }
 0x335   : > { %3054 = vmatmul.mubr.msk.f32.gmra.mrb[14].mxu0 %vm1666_vm15, %v4460_v9 }
 0x3e8   : > { %v4480_v62 = vpop.f32.mrb[8].mxu0 }
 0x3e9   : > { %1799 = vperm.xlu0 %3164, %v4480_v62   ;;  %v4483_v2 = vpop.f32.mrb[9].mxu0  ;;  %v1765_v8 = vmul.f32 %v4480_v62, %v4480_v62 }
 0x3ea   : > { %v1764_v16 = vmul.f32 %v4483_v2, %v4483_v2  ;;  %1794 = vperm.xlu1 %3165, %v4483_v2  }
 0x3ec   : > { %v4490_v35 = vpop.f32.mrb[10].mxu0 }
 0x3ed   : > { %1772 = vrot.lane.b32.xlu0 %v1764_v16, %s3274_s30  ;;  %v4493_v45 = vpop.f32.mrb[11].mxu0  ;;  %v1767_v23 = vmul.f32 %v4490_v35, %v4490_v35 }
 0x3ee   : > { %1774 = vrot.lane.b32.xlu1 %v1765_v8, %s3274_s30  ;;  %v1766_v31 = vmul.f32 %v4493_v45, %v4493_v45 }
 0x3f1   : > { %1804 = vperm.xlu0 %3164, %v4493_v45  }
 0x3f2   : > { %1809 = vperm.xlu1 %3165, %v4490_v35  }
 0x3f5   : > { %1776 = vrot.lane.b32.xlu0 %v1766_v31, %s3274_s30 }
 0x3f6   : > { %1778 = vrot.lane.b32.xlu1 %v1767_v23, %s3274_s30 }
 0x404   : > { %v4504_v12 = vpop.f32.mrb[12].mxu0 }
 0x405   : > { %v2299_v29 = vmul.f32 %v4504_v12, %v4504_v12  ;;  %v4508_v11 = vpop.f32.mrb[13].mxu0 }
 0x406   : > { %v2298_v57 = vmul.f32 %v4508_v11, %v4508_v11 }
 0x407   : > { %2308 = vrot.lane.b32.xlu0 %v2299_v29, %s3274_s30 }
 0x408   : > { %2306 = vrot.lane.b32.xlu1 %v2298_v57, %s3274_s30  ;;  %v4514_v10 = vpop.f32.mrb[14].mxu0 }
 0x409   : > { %v2301_v5 = vmul.f32 %v4514_v10, %v4514_v10  ;;  %v4518_v60 = vpop.f32.mrb[15].mxu0 }
 0x40a   : > { %v2300_v6 = vmul.f32 %v4518_v60, %v4518_v60 }
 0x40c   : > { %2312 = vrot.lane.b32.xlu1 %v2301_v5, %s3274_s30  ;;  %2310 = vrot.lane.b32.xlu0 %v2300_v6, %s3274_s30 }
 0x410   : > { %2328 = vperm.xlu1 %3165, %v4508_v11   ;;  %1891 = vperm.xlu0 %3164, %v2845_v63  }
 0x414   : > { %2343 = vperm.xlu1 %3165, %v4514_v10   ;;  %2333 = vperm.xlu0 %3164, %v4504_v12  }
 0x418   : > { %1919 = vperm.xlu1 %3165, %v2849_v14   ;;  %1914 = vperm.xlu0 %3164, %v2848_v37  }
 0x41c   : > { %1872 = vperm.xlu1 %3165, %v307_v20   ;;  %2338 = vperm.xlu0 %3164, %v4518_v60  }
 0x420   : > { %1896 = vperm.xlu1 %3165, %v2846_v49   ;;  %1877 = vperm.xlu0 %3164, %v308_v1  }
 0x424   : > { %1901 = vperm.xlu1 %3165, %v2847_v3   ;;  %1942 = vperm.xlu0 %3164, %v2852_v22  }
 0x428   : > { %1947 = vperm.xlu1 %3165, %v2853_v19   ;;  %1952 = vperm.xlu0 %3164, %v2854_v59  }
 0x42c   : > { %1924 = vperm.xlu1 %3165, %v2850_v30   ;;  %2401 = vperm.xlu0 %3164, %v2857_v32  }
 0x430   : > { %1929 = vperm.xlu1 %3165, %v2851_v52   ;;  %2425 = vperm.xlu0 %3164, %v2861_v46  }
 0x434   : > { %1957 = vperm.xlu1 %3165, %v2855_v0   ;;  %2453 = vperm.xlu0 %3164, %v2865_v13   ;;  %v5057_v0 = vmov 0  }
 0x438   : > { %2396 = vperm.xlu1 %3165, %v2856_v18   ;;  %2411 = vperm.xlu0 %3164, %v2859_v44  }
 0x43c   : > { %2420 = vperm.xlu1 %3165, %v2860_v47   ;;  %3166 = vset.pattern.permute.xlu0 %v3275_v51 }
 0x440   : > { %2448 = vperm.xlu1 %3165, %v2864_v50  }
 0x444   : > { %2406 = vperm.xlu1 %3165, %v2858_v38  }
 0x448   : > { %3167 = vset.pattern.permute.xlu1 %v3275_v51 }
 0x468   : > { %v4599_v43 = vpop.permute.xlu0 %1799 }
 0x469   : > { %v4601_v61 = vpop.permute.xlu1 %1794 }
 0x46c   : > { %v1773_v41 = vpop.permute.xlu0 %1772 }
 0x46d   : > { %v1784_v24 = vsub.f32 %v4483_v2, %v1773_v41  ;;  %v1775_v7 = vpop.permute.xlu1 %1774  ;;  %v2867_v41 = vld [vmem:[%s4897_s4 + $0xd8] sm:$0xff] }
 0x46e   : > { %v1785_v15 = vsub.f32 %v4480_v62, %v1775_v7  ;;  %v2871_v7 = vld [vmem:[%s4897_s4 + $0xf8] sm:$0xff] }
 0x46f   : > { %v1788_v34 = vmax.f32 %v1784_v24, 0.0  ;;  %v2862_v24 = vld [vmem:[%s4897_s4 + $0xb0] sm:$0xff] }
 0x470   : > { %v1789_v56 = vmax.f32 %v1785_v15, 0.0  ;;  %v4605_v27 = vpop.permute.xlu0 %1804  ;;  %v2868_v15 = vld [vmem:[%s4897_s4 + $0xe0] sm:$0xff] }
 0x471   : > { %v1816_v55 = vadd.f32 1e-05, %v1788_v34  ;;  %v4607_v16 = vpop.permute.xlu1 %1809  ;;  %v2866_v34 = vld [vmem:[%s4897_s4 + $0xd0] sm:$0xff] }
 0x472   : > { %v1817_v8 = vadd.f32 1e-05, %v1789_v56  ;;  %v2870_v56 = vld [vmem:[%s4897_s4 + $0xf0] sm:$0xff] }
 0x473   : > { %3174 = vrsqrt.f32 %v1816_v55 }
 0x474   : > { %3176 = vrsqrt.f32 %v1817_v8  ;;  %v1777_v31 = vpop.permute.xlu0 %1776 }
 0x475   : > { %v1786_v23 = vsub.f32 %v4493_v45, %v1777_v31  ;;  %v1779_v29 = vpop.permute.xlu1 %1778 }
 0x476   : > { %v1787_v57 = vsub.f32 %v4490_v35, %v1779_v29 }
 0x477   : > { %v1790_v2 = vmax.f32 %v1786_v23, 0.0 }
 0x478   : > { %v1791_v5 = vmax.f32 %v1787_v57, 0.0 }
 0x479   : > { %v2309_v6 = vpop.permute.xlu0 %2308  ;;  %v1818_v37 = vadd.f32 1e-05, %v1790_v2 }
 0x47a   : > { %v1819_v62 = vadd.f32 1e-05, %v1791_v5  ;;  %v2319_v63 = vsub.f32 %v4504_v12, %v2309_v6  ;;  %v2307_v14 = vpop.permute.xlu1 %2306 }
 0x47b   : > { %v2318_v20 = vsub.f32 %v4508_v11, %v2307_v14  ;;  %v2863_v11 = vld [vmem:[%s4897_s4 + $0xb8] sm:$0xff] }
 0x47c   : > { %3178 = vrsqrt.f32 %v1819_v62  ;;  %v2323_v49 = vmax.f32 %v2319_v63, 0.0 }
 0x47d   : > { %v3175_v1 = vpop.eup %3174  ;;  %v2322_v3 = vmax.f32 %v2318_v20, 0.0  ;;  %3180 = vrsqrt.f32 %v1818_v37 }
 0x47e   : > { %v3177_v22 = vpop.eup %3176  ;;  %v2351_v19 = vadd.f32 1e-05, %v2323_v49  ;;  %1826 = vperm.xlu1 %3167, %v3175_v1   ;;  %v2311_v45 = vpop.permute.xlu0 %2310 }
 0x47f   : > { %v2313_v59 = vpop.permute.xlu1 %2312  ;;  %v2320_v35 = vsub.f32 %v4518_v60, %v2311_v45  ;;  %1831 = vperm.xlu0 %3166, %v3177_v22   ;;  %v2350_v12 = vadd.f32 1e-05, %v2322_v3  ;;  %v2869_v60 = vld [vmem:[%s4897_s4 + $0xe8] sm:$0xff] }
 0x480   : > { %v2321_v30 = vsub.f32 %v4514_v10, %v2313_v59  ;;  %3182 = vrsqrt.f32 %v2351_v19 }
 0x481   : > { %v2324_v32 = vmax.f32 %v2320_v35, 0.0  ;;  %3184 = vrsqrt.f32 %v2350_v12 }
 0x482   : > { %v2325_v52 = vmax.f32 %v2321_v30, 0.0 }
 0x483   : > { %v2352_v46 = vadd.f32 1e-05, %v2324_v32  ;;  %3169 = vset.pattern.permute.xlu0 %v5057_v0 }
 0x484   : > { %v2353_v13 = vadd.f32 1e-05, %v2325_v52  ;;  %2435 = vperm.xlu0 %3169, %v2863_v11   ;;  %v1812_v52 = vsub.f32 %v4258_v54, %v4601_v61  ;;  %v1813_v11 = vsub.f32 %v4242_v28, %v4599_v43 }
 0x485   : > { %3186 = vrsqrt.f32 %v2352_v46 }
 0x486   : > { %v3179_v10 = vpop.eup %3178  ;;  %3188 = vrsqrt.f32 %v2353_v13 }
 0x487   : > { %1841 = vperm.xlu1 %3167, %v3179_v10   ;;  %v3181_v18 = vpop.eup %3180 }
 0x488   : > { %2481 = vperm.xlu0 %3169, %v2869_v60  }
 0x48a   : > { %v3183_v44 = vpop.eup %3182 }
 0x48b   : > { %1836 = vperm.xlu1 %3167, %v3181_v18   ;;  %v3185_v47 = vpop.eup %3184 }
 0x48c   : > { %3170 = vset.pattern.permute.xlu0 %v3275_v51 }
 0x48d   : > { %2365 = vperm.xlu0 %3170, %v3183_v44  }
 0x48f   : > { %v3187_v50 = vpop.eup %3186  ;;  %2360 = vperm.xlu1 %3167, %v3185_v47   ;;  %v4643_v55 = vpop.permute.xlu1 %2328  ;;  %v1815_v47 = vsub.f32 %v4260_v53, %v4607_v16 }
 0x490   : > { %v3189_v38 = vpop.eup %3188  ;;  %v1892_v29 = vpop.permute.xlu0 %1891  ;;  %v2346_v53 = vsub.f32 %v4370_v39, %v4643_v55 }
 0x491   : > { %2370 = vperm.xlu0 %3170, %v3187_v50  }
 0x493   : > { %2375 = vperm.xlu1 %3167, %v3189_v38   ;;  %v4645_v8 = vpop.permute.xlu1 %2343 }
 0x494   : > { %v2334_v2 = vpop.permute.xlu0 %2333 }
 0x495   : > { %3171 = vset.pattern.permute.xlu0 %v5057_v0  ;;  %v2347_v16 = vsub.f32 %v4384_v4, %v2334_v2 }
 0x496   : > { %2463 = vperm.xlu0 %3171, %v2867_v41  }
 0x497   : > { %3168 = vset.pattern.permute.xlu1 %v5057_v0  ;;  %v1920_v31 = vpop.permute.xlu1 %1919 }
 0x498   : > { %2430 = vperm.xlu1 %3168, %v2862_v24   ;;  %v4651_v6 = vpop.permute.xlu0 %1914  ;;  %v1814_v24 = vsub.f32 %v4256_v40, %v4605_v27 }
 0x49a   : > { %2491 = vperm.xlu0 %3171, %v2871_v7  }
 0x49b   : > { %v4647_v23 = vpop.permute.xlu1 %1872 }
 0x49c   : > { %2476 = vperm.xlu1 %3168, %v2868_v15   ;;  %v4655_v63 = vpop.permute.xlu0 %2338 }
 0x49d   : > { %v2348_v39 = vsub.f32 %v4398_v21, %v4655_v63 }
 0x49f   : > { %v1897_v57 = vpop.permute.xlu1 %1896 }
 0x4a0   : > { %2458 = vperm.xlu1 %3168, %v2866_v34   ;;  %v4657_v37 = vpop.permute.xlu0 %1877 }
 0x4a3   : > { %v4649_v5 = vpop.permute.xlu1 %1901 }
 0x4a4   : > { %2486 = vperm.xlu1 %3168, %v2870_v56   ;;  %v4661_v49 = vpop.permute.xlu0 %1942 }
 0x4a7   : > { %v4653_v62 = vpop.permute.xlu1 %1947 }
 0x4a8   : > { %v4665_v3 = vpop.permute.xlu0 %1952 }
 0x4ab   : > { %v1925_v14 = vpop.permute.xlu1 %1924 }
 0x4ac   : > { %v4669_v19 = vpop.permute.xlu0 %2401 }
 0x4af   : > { %v4659_v20 = vpop.permute.xlu1 %1929 }
 0x4b0   : > { %v4673_v59 = vpop.permute.xlu0 %2425 }
 0x4b3   : > { %v4663_v1 = vpop.permute.xlu1 %1957 }
 0x4b4   : > { %v4677_v30 = vpop.permute.xlu0 %2453 }
 0x4b7   : > { %v4667_v22 = vpop.permute.xlu1 %2396 }
 0x4b8   : > { %v4681_v32 = vpop.permute.xlu0 %2411 }
 0x4bb   : > { %v4671_v45 = vpop.permute.xlu1 %2420 }
 0x4bf   : > { %v4675_v35 = vpop.permute.xlu1 %2448 }
 0x4c3   : > { %v4679_v12 = vpop.permute.xlu1 %2406 }
 0x4fd   : > { %v1827_v46 = vpop.permute.xlu1 %1826 }
 0x4fe   : > { %v1844_v0 = vmul.f32 %v1827_v46, %v1812_v52  ;;  %v1832_v13 = vpop.permute.xlu0 %1831  ;;  %v2349_v52 = vsub.f32 %v4400_v36, %v4645_v8 }
 0x4ff   : > { %v1845_v60 = vmul.f32 %v1832_v13, %v1813_v11 }
 0x500   : > { %v1852_v10 = vmul.f32 0.2, %v1844_v0  ;;  %vm1848_vm1 = vcmp.ge.f32.partialorder %v1844_v0, 0.0 }
 0x501   : > { %v1853_v18 = vmul.f32 0.2, %v1845_v60  ;;  %vm1849_vm2 = vcmp.ge.f32.partialorder %v1845_v60, 0.0 }
 0x502   : > { %v4691_v50 = vsel %vm1848_vm1, %v1844_v0, %v1852_v10 }
 0x503   : > { %v4687_v44 = vpop.permute.xlu0 %2435  ;;  %v1857_v38 = vsel %vm1849_vm2, %v1845_v60, %v1853_v18  ;;  %v1905_v28 = vmul.f32 %v1892_v29, %v4691_v50  ;;  %v1880_v40 = vmul.f32 %v4595_v48, %v4691_v50  ;;  %v1934_v4 = vmul.f32 %v1925_v14, %v4691_v50 }
 0x504   : > { %v1881_v43 = vmul.f32 %v4593_v58, %v1857_v38  ;;  %v1906_v55 = vmul.f32 %v1897_v57, %v1857_v38  ;;  %v1960_v63 = vmul.f32 %v4661_v49, %v1857_v38 }
 0x506   : > { %v1842_v54 = vpop.permute.xlu1 %1841  ;;  %v1909_v46 = vadd.f32 %v1905_v28, %v1881_v43 }
 0x507   : > { %v1847_v61 = vmul.f32 %v1842_v54, %v1815_v47  ;;  %v4693_v41 = vpop.permute.xlu0 %2481 }
 0x509   : > { %vm1851_vm3 = vcmp.ge.f32.partialorder %v1847_v61, 0.0  ;;  %v1855_v7 = vmul.f32 0.2, %v1847_v61 }
 0x50a   : > { %v1837_v15 = vpop.permute.xlu1 %1836 }
 0x50b   : > { %v1859_v34 = vsel %vm1851_vm3, %v1847_v61, %v1855_v7  ;;  %v1846_v56 = vmul.f32 %v1837_v15, %v1814_v24 }
 0x50c   : > { %v1904_v29 = vmul.f32 %v4597_v42, %v1859_v34  ;;  %v1933_v11 = vmul.f32 %v1920_v31, %v1859_v34  ;;  %v2366_v58 = vpop.permute.xlu0 %2365  ;;  %v1962_v28 = vmul.f32 %v4665_v3, %v1859_v34  ;;  %v1935_v3 = vmul.f32 %v4659_v20, %v1857_v38 }
 0x50d   : > { %vm1850_vm4 = vcmp.ge.f32.partialorder %v1846_v56, 0.0  ;;  %v1854_v27 = vmul.f32 0.2, %v1846_v56  ;;  %v2379_v0 = vmul.f32 %v2366_v58, %v2347_v16 }
 0x50e   : > { %v2361_v2 = vpop.permute.xlu1 %2360  ;;  %v1937_v13 = vadd.f32 %v1933_v11, %v1909_v46  ;;  %v1908_v31 = vadd.f32 %v1904_v29, %v1880_v40  ;;  %v1883_v29 = vmul.f32 %v4657_v37, %v1859_v34 }
 0x50f   : > { %v1858_v36 = vsel %vm1850_vm4, %v1846_v56, %v1854_v27  ;;  %v2387_v8 = vmul.f32 0.2, %v2379_v0  ;;  %v2378_v42 = vmul.f32 %v2361_v2, %v2346_v53  ;;  %vm2383_vm5 = vcmp.ge.f32.partialorder %v2379_v0, 0.0 }
 0x510   : > { %v1882_v60 = vmul.f32 %v4647_v23, %v1858_v36  ;;  %v1932_v10 = vmul.f32 %v4651_v6, %v1858_v36  ;;  %v2371_v48 = vpop.permute.xlu0 %2370  ;;  %v1961_v18 = vmul.f32 %v4653_v62, %v1858_v36  ;;  %v1907_v49 = vmul.f32 %v4649_v5, %v1858_v36 }
 0x511   : > { %vm2382_vm6 = vcmp.ge.f32.partialorder %v2378_v42, 0.0  ;;  %v2386_v47 = vmul.f32 0.2, %v2378_v42  ;;  %v2380_v21 = vmul.f32 %v2371_v48, %v2348_v39  ;;  %v2391_v6 = vsel %vm2383_vm5, %v2379_v0, %v2387_v8 }
 0x512   : > { %v2376_v57 = vpop.permute.xlu1 %2375  ;;  %v4714_v14 = vadd.f32 %v1961_v18, %v1937_v13  ;;  %v1936_v54 = vadd.f32 %v1932_v10, %v1908_v31  ;;  %v1910_v61 = vadd.f32 %v1906_v55, %v1882_v60  ;;  %v2415_v46 = vmul.f32 %v4669_v19, %v2391_v6 }
 0x513   : > { %vm2384_vm7 = vcmp.ge.f32.partialorder %v2380_v21, 0.0  ;;  %v2388_v23 = vmul.f32 0.2, %v2380_v21  ;;  %v2381_v43 = vmul.f32 %v2376_v57, %v2349_v52  ;;  %v2390_v7 = vsel %vm2382_vm6, %v2378_v42, %v2386_v47 }
 0x514   : > { %v1971_v24 = vsel %vm1632_vm13, %v4714_v14, 0.0  ;;  %v4719_v62 = vadd.f32 %v1960_v63, %v1936_v54  ;;  %v1938_v15 = vadd.f32 %v1934_v4, %v1910_v61  ;;  %v1981_v11 = vmul.f32 %v4714_v14, %v4714_v14 }
 0x515   : > { %v2392_v53 = vsel %vm2384_vm7, %v2380_v21, %v2388_v23  ;;  %vm2385_vm8 = vcmp.ge.f32.partialorder %v2381_v43, 0.0  ;;  %v2389_v16 = vmul.f32 0.2, %v2381_v43  ;;  %v2464_v56 = vpop.permute.xlu0 %2463  ;;  %1972 = vadd.xlane.f32.xlu0 %v1971_v24  ;;  %v2439_v40 = vmul.f32 %v4673_v59, %v2390_v7 }
 0x516   : > { %v1968_v52 = vsel %vm1632_vm13, %v4719_v62, 0.0  ;;  %v4730_v27 = vadd.f32 %v1962_v28, %v1938_v15  ;;  %v2441_v0 = vmul.f32 %v4687_v44, %v2392_v53  ;;  %v2414_v37 = vmul.f32 %v4667_v22, %v2390_v7 }
 0x517   : > { %v2393_v58 = vsel %vm2385_vm8, %v2381_v43, %v2389_v16  ;;  %1969 = vadd.xlane.f32.xlu1 %v1968_v52  ;;  %v2431_v5 = vpop.permute.xlu1 %2430  ;;  %v1980_v4 = vmul.f32 %v4719_v62, %v4719_v62  ;;  %v1911_v59 = vadd.f32 %v1907_v49, %v1883_v29  ;;  %v2469_v2 = vmul.f32 %v2464_v56, %v2391_v6 }
 0x518   : > { %v2417_v20 = vmul.f32 %v4681_v32, %v2393_v58  ;;  %v2438_v38 = vmul.f32 %v4671_v45, %v2393_v58  ;;  %v2467_v34 = vmul.f32 %v4677_v30, %v2393_v58  ;;  %v1974_v19 = vsel %vm1632_vm13, %v4730_v27, 0.0 }
 0x519   : > { %v2492_v39 = vpop.permute.xlu0 %2491  ;;  %1975 = vadd.xlane.f32.xlu0 %v1974_v19  ;;  %v1987_v44 = vsel %vm1632_vm13, %v1981_v11, 0.0  ;;  %v2466_v22 = vmul.f32 %v4675_v35, %v2392_v53  ;;  %v1939_v13 = vadd.f32 %v1935_v3, %v1911_v59  ;;  %v1963_v30 = vmul.f32 %v4663_v1, %v4691_v50 }
 0x51a   : > { %v2445_v55 = vadd.f32 %v2441_v0, %v2417_v20  ;;  %v2442_v32 = vadd.f32 %v2438_v38, %v2414_v37  ;;  %v2443_v36 = vadd.f32 %v2439_v40, %v2415_v46  ;;  %v2497_v42 = vmul.f32 %v2492_v39, %v2390_v7 }
 0x51b   : > { %1988 = vadd.xlane.f32.xlu1 %v1987_v44  ;;  %v2477_v45 = vpop.permute.xlu1 %2476  ;;  %v1984_v31 = vsel %vm1632_vm13, %v1980_v4, 0.0  ;;  %v1982_v60 = vmul.f32 %v4730_v27, %v4730_v27  ;;  %v4748_v18 = vadd.f32 %v1963_v30, %v1939_v13  ;;  %v2440_v21 = vmul.f32 %v2431_v5, %v2391_v6 }
 0x51c   : > { %v2473_v8 = vadd.f32 %v2469_v2, %v2445_v55  ;;  %v2470_v10 = vadd.f32 %v2466_v22, %v2442_v32  ;;  %v2494_v48 = vmul.f32 %v2477_v45, %v2391_v6  ;;  %v2471_v47 = vadd.f32 %v2467_v34, %v2443_v36 }
 0x51d   : > { %1985 = vadd.xlane.f32.xlu0 %v1984_v31  ;;  %v1977_v1 = vsel %vm1632_vm13, %v4748_v18, 0.0  ;;  %v1983_v63 = vmul.f32 %v4748_v18, %v4748_v18  ;;  %v2416_v57 = vmul.f32 %v4679_v12, %v2392_v53  ;;  %v1990_v28 = vsel %vm1632_vm13, %v1982_v60, 0.0 }
 0x51e   : > { %v4750_v35 = vadd.f32 %v2497_v42, %v2473_v8  ;;  %v4757_v61 = vadd.f32 %v2494_v48, %v2470_v10  ;;  %v2495_v23 = vmul.f32 %v4693_v41, %v2392_v53 }
 0x51f   : > { %v2459_v50 = vpop.permute.xlu1 %2458  ;;  %1978 = vadd.xlane.f32.xlu1 %v1977_v1  ;;  %v2444_v43 = vadd.f32 %v2440_v21, %v2416_v57  ;;  %v1993_v6 = vsel %vm1632_vm13, %v1983_v63, 0.0 }
 0x520   : > { %v2468_v54 = vmul.f32 %v2459_v50, %v2390_v7  ;;  %v4762_v15 = vadd.f32 %v2495_v23, %v2471_v47  ;;  %v2502_v12 = vsel %vm1632_vm13, %v4757_v61, 0.0  ;;  %v2514_v3 = vmul.f32 %v4757_v61, %v4757_v61 }
 0x521   : > { %1991 = vadd.xlane.f32.xlu0 %v1990_v28  ;;  %v2517_v46 = vmul.f32 %v4750_v35, %v4750_v35 }
 0x522   : > { %v2472_v49 = vadd.f32 %v2468_v54, %v2444_v43  ;;  %v2505_v56 = vsel %vm1632_vm13, %v4762_v15, 0.0  ;;  %v2515_v41 = vmul.f32 %v4762_v15, %v4762_v15  ;;  %v2518_v52 = vsel %vm1632_vm13, %v2514_v3, 0.0 }
 0x523   : > { %v2487_v24 = vpop.permute.xlu1 %2486  ;;  %1994 = vadd.xlane.f32.xlu1 %v1993_v6  ;;  %v2527_v40 = vsel %vm1632_vm13, %v2517_v46, 0.0 }
 0x524   : > { %v2496_v16 = vmul.f32 %v2487_v24, %v2393_v58  ;;  %v2521_v29 = vsel %vm1632_vm13, %v2515_v41, 0.0  ;;  %v2511_v58 = vsel %vm1632_vm13, %v4750_v35, 0.0 }
 0x525   : > { %2503 = vadd.xlane.f32.xlu0 %v2502_v12 }
 0x526   : > { %v4766_v7 = vadd.f32 %v2496_v16, %v2472_v49 }
 0x527   : > { %2506 = vadd.xlane.f32.xlu1 %v2505_v56 }
 0x528   : > { %v2508_v53 = vsel %vm1632_vm13, %v4766_v7, 0.0  ;;  %v2516_v11 = vmul.f32 %v4766_v7, %v4766_v7 }
 0x529   : > { %2509 = vadd.xlane.f32.xlu0 %v2508_v53 }
 0x52a   : > { %v2524_v5 = vsel %vm1632_vm13, %v2516_v11, 0.0 }
 0x52b   : > { %2522 = vadd.xlane.f32.xlu1 %v2521_v29 }
 0x52d   : > { %2519 = vadd.xlane.f32.xlu0 %v2518_v52 }
 0x52f   : > { %2512 = vadd.xlane.f32.xlu1 %v2511_v58 }
 0x531   : > { %2525 = vadd.xlane.f32.xlu0 %v2524_v5 }
 0x533   : > { %2528 = vadd.xlane.f32.xlu1 %v2527_v40 }
 0x5a2   : > { %v1973_v0 = vpop.xlane.xlu0 %1972 }
 0x5a4   : > { %v1970_v20 = vpop.xlane.xlu1 %1969 }
 0x5a6   : > { %v1976_v37 = vpop.xlane.xlu0 %1975 }
 0x5a8   : > { %v1989_v38 = vpop.xlane.xlu1 %1988 }
 0x5a9   : > { %v1997_v39 = vsel %vm1661_vm0, %v1973_v0, %v1989_v38 }
 0x5aa   : > { %v1986_v34 = vpop.xlane.xlu0 %1985 }
 0x5ab   : > { %v1996_v19 = vsel %vm1661_vm0, %v1970_v20, %v1986_v34 }
 0x5ac   : > { %v3094_v4 = vpack.c.bf16 %v1997_v39, %v1996_v19  ;;  %v1979_v59 = vpop.xlane.xlu1 %1978 }
 0x5ae   : > { %v1992_v55 = vpop.xlane.xlu0 %1991  ;;  %3095 = vmatprep.subr.bf16.mxu1 %v3094_v4 }
 0x5af   : > { %3097 = vmatpush3.bf16.msra.mxu1 %v3094_v4  ;;  %v1998_v44 = vsel %vm1661_vm0, %v1976_v37, %v1992_v55 }
 0x5b0   : > { %v1995_v2 = vpop.xlane.xlu1 %1994 }
 0x5b1   : > { %v1999_v32 = vsel %vm1661_vm0, %v1979_v59, %v1995_v2 }
 0x5b2   : > { %v3098_v22 = vpack.c.bf16 %v1999_v32, %v1998_v44  ;;  %v2504_v45 = vpop.xlane.xlu0 %2503 }
 0x5b4   : > { %3099 = vmatprep.subr.bf16.mxu1 %v3098_v22  ;;  %v2507_v13 = vpop.xlane.xlu1 %2506 }
 0x5b5   : > { %3101 = vmatpush3.bf16.msra.mxu1 %v3098_v22 }
 0x5b6   : > { %v2510_v30 = vpop.xlane.xlu0 %2509 }
 0x5b8   : > { %3037 = vmatmul.mubr.msk.f32.vlgmr.msra.gmra.mrb[8].mxu1 %vm1666_vm15, %v4446_v17  ;;  %v2523_v36 = vpop.xlane.xlu1 %2522 }
 0x5b9   : > { %3039 = vmatprep.mubr.msk.f32.mxu1 %vm1666_vm15, %v4451_v25  ;;  %v2531_v42 = vsel %vm1661_vm0, %v2507_v13, %v2523_v36 }
 0x5ba   : > { %v2520_v8 = vpop.xlane.xlu0 %2519 }
 0x5bb   : > { %v2530_v31 = vsel %vm1661_vm0, %v2504_v45, %v2520_v8 }
 0x5bc   : > { %v3110_v60 = vpack.c.bf16 %v2531_v42, %v2530_v31  ;;  %3040 = vmatmul.mubr.msk.f32.gmra.mrb[10].mxu1 %vm1666_vm15, %v4460_v9  ;;  %v2513_v10 = vpop.xlane.xlu1 %2512 }
 0x5bd   : > { %3064 = vmatprep.mubr.msk.f32.mxu1 %vm1666_vm15, %v4406_v33 }
 0x5be   : > { %v2526_v48 = vpop.xlane.xlu0 %2525  ;;  %3111 = vmatprep.subr.bf16.mxu1 %v3110_v60 }
 0x5bf   : > { %3113 = vmatpush3.bf16.msra.mxu1 %v3110_v60  ;;  %v2532_v21 = vsel %vm1661_vm0, %v2510_v30, %v2526_v48 }
 0x5c0   : > { %v2529_v47 = vpop.xlane.xlu1 %2528 }
 0x5c1   : > { %v2533_v1 = vsel %vm1661_vm0, %v2513_v10, %v2529_v47 }
 0x5c2   : > { %v3114_v50 = vpack.c.bf16 %v2533_v1, %v2532_v21 }
 0x5c4   : > { %3115 = vmatprep.subr.bf16.mxu1 %v3114_v50 }
 0x5c5   : > { %3117 = vmatpush3.bf16.msra.mxu1 %v3114_v50 }
 0x5c8   : > { %3065 = vmatmul.mubr.msk.f32.vlgmr.msra.gmra.mrb[12].mxu1 %vm1666_vm15, %v4446_v17 }
 0x5c9   : > { %3067 = vmatprep.mubr.msk.f32.mxu1 %vm1666_vm15, %v4451_v25 }
 0x5cc   : > { %3068 = vmatmul.mubr.msk.f32.gmra.mrb[14].mxu1 %vm1666_vm15, %v4460_v9 }
 0x68b   : > { %v3038_v33 = vpop.f32.mrb[8].mxu1 }
 0x68c   : > { %v2086_v63 = vmul.f32 %v3038_v33, %v3038_v33  ;;  %v2066_v57 = vpop.f32.mrb[9].mxu1 }
 0x68d   : > { %v2085_v54 = vmul.f32 %v2066_v57, %v2066_v57 }
 0x68e   : > { %2095 = vrot.lane.b32.xlu1 %v2086_v63, %s3274_s30 }
 0x68f   : > { %2093 = vrot.lane.b32.xlu0 %v2085_v54, %s3274_s30  ;;  %v3041_v26 = vpop.f32.mrb[10].mxu1 }
 0x690   : > { %v2088_v28 = vmul.f32 %v3041_v26, %v3041_v26  ;;  %v2076_v23 = vpop.f32.mrb[11].mxu1 }
 0x691   : > { %v2087_v43 = vmul.f32 %v2076_v23, %v2076_v23 }
 0x693   : > { %2099 = vrot.lane.b32.xlu0 %v2088_v28, %s3274_s30  ;;  %2097 = vrot.lane.b32.xlu1 %v2087_v43, %s3274_s30 }
 0x69b   : > { %v3066_v17 = vpop.f32.mrb[12].mxu1 }
 0x69c   : > { %v2620_v25 = vmul.f32 %v3066_v17, %v3066_v17  ;;  %v2600_v6 = vpop.f32.mrb[13].mxu1 }
 0x69d   : > { %v2619_v9 = vmul.f32 %v2600_v6, %v2600_v6 }
 0x69e   : > { %2629 = vrot.lane.b32.xlu0 %v2620_v25, %s3274_s30 }
 0x69f   : > { %2627 = vrot.lane.b32.xlu1 %v2619_v9, %s3274_s30  ;;  %v3069_v24 = vpop.f32.mrb[14].mxu1 }
 0x6a0   : > { %v2622_v49 = vmul.f32 %v3069_v24, %v3069_v24  ;;  %v2610_v16 = vpop.f32.mrb[15].mxu1 }
 0x6a1   : > { %v2621_v12 = vmul.f32 %v2610_v16, %v2610_v16 }
 0x6a2   : > { %2633 = vrot.lane.b32.xlu0 %v2622_v49, %s3274_s30 }
 0x6a3   : > { %2631 = vrot.lane.b32.xlu1 %v2621_v12, %s3274_s30  ;;  %s215_s30 = sand.u32 1, %s3260_s19  }
 0x6a4   : > { %s2803_s8 = sshll.u32 %s215_s30, 5  ;;  %s4851_s22 = scalar_lea.sflag [#allocation3], %s215_s30 }
 0x6a5   : > { %s217_s10 = scalar_lea.vmem [#allocation2], %s2803_s8 }
 0x6a6   : > { %2120 = vperm.xlu0 %3171, %v3038_v33   ;;  %s2737_s12 = sshll.u32 %s217_s10, 4  ;;  %s4846_s12 = int_to_ptr.vmem [resolvable:$true] %s2737_s12 }
 0x6a7   : > { %2115 = vperm.xlu1 %3168, %v2066_v57   ;;  %s3206_s16 = scalar_lea.vmem %s4846_s12, 512  ;;  %p3213_p0 = scmp.lt.s32.totalorder %s4846_s12, %s3211_s23 }
 0x6a8   : > { %p3207_p11 = scmp.ne.s32.totalorder %s4846_s12, %s3206_s16  ;;  %p3214_p1 = scmp.lt.s32.totalorder %s3212_s25, %s3206_s16 }
 0x6aa   : > { %2130 = vperm.xlu0 %3171, %v3041_v26   ;;  %p3208_p12 = pnand %p3207_p11, %p3346_p5  ;;  %p3215_p2 = por %p3214_p1, %p3213_p0 }
 0x6ab   : > { %2125 = vperm.xlu1 %3168, %v2076_v23  }
 0x6ac   : > { %p3209_p13 = pneg %p3208_p12 }
 0x6ae   : > { %2649 = vperm.xlu0 %3171, %v2600_v6   ;;  %p3216_p3 = pnand %p3215_p2, %p3209_p13 }
 0x6af   : > { %2654 = vperm.xlu1 %3168, %v3066_v17  }
 0x6b2   : > { %2664 = vperm.xlu0 %3171, %v3069_v24  }
 0x6b3   : > { %2659 = vperm.xlu1 %3168, %v2610_v16  }
 0x6b6   : > { %3172 = vset.pattern.permute.xlu0 %v3275_v51 }
 0x6b7   : > { %3173 = vset.pattern.permute.xlu1 %v3275_v51 }
 0x700   : > { %v2096_v56 = vpop.permute.xlu1 %2095 }
 0x701   : > { %v2106_v41 = vsub.f32 %v3038_v33, %v2096_v56  ;;  %v2094_v53 = vpop.permute.xlu0 %2093 }
 0x702   : > { %v2105_v3 = vsub.f32 %v2066_v57, %v2094_v53 }
 0x703   : > { %v2110_v29 = vmax.f32 %v2106_v41, 0.0 }
 0x704   : > { %v2109_v52 = vmax.f32 %v2105_v3, 0.0 }
 0x705   : > { %v2138_v11 = vadd.f32 1e-05, %v2110_v29  ;;  %v2100_v58 = vpop.permute.xlu0 %2099  ;;  %v2098_v46 = vpop.permute.xlu1 %2097 }
 0x706   : > { %v2137_v5 = vadd.f32 1e-05, %v2109_v52  ;;  %v2108_v40 = vsub.f32 %v3041_v26, %v2100_v58  ;;  %v2107_v0 = vsub.f32 %v2076_v23, %v2098_v46 }
 0x707   : > { %3190 = vrsqrt.f32 %v2138_v11 }
 0x708   : > { %3192 = vrsqrt.f32 %v2137_v5  ;;  %v2112_v20 = vmax.f32 %v2108_v40, 0.0  ;;  %v2111_v37 = vmax.f32 %v2107_v0, 0.0 }
 0x70a   : > { %v2140_v38 = vadd.f32 1e-05, %v2112_v20  ;;  %v2139_v34 = vadd.f32 1e-05, %v2111_v37 }
 0x70c   : > { %3194 = vrsqrt.f32 %v2140_v38 }
 0x70d   : > { %3196 = vrsqrt.f32 %v2139_v34 }
 0x710   : > { %v2630_v51 = vpop.permute.xlu0 %2629 }
 0x711   : > { %v3191_v39 = vpop.eup %3190  ;;  %v2640_v19 = vsub.f32 %v3066_v17, %v2630_v51  ;;  %v2628_v4 = vpop.permute.xlu1 %2627 }
 0x712   : > { %v3193_v59 = vpop.eup %3192  ;;  %v2639_v55 = vsub.f32 %v2600_v6, %v2628_v4  ;;  %2152 = vperm.xlu0 %3172, %v3191_v39  }
 0x713   : > { %v2644_v2 = vmax.f32 %v2640_v19, 0.0  ;;  %2147 = vperm.xlu1 %3173, %v3193_v59  }
 0x714   : > { %v2643_v44 = vmax.f32 %v2639_v55, 0.0  ;;  %v2634_v32 = vpop.permute.xlu0 %2633 }
 0x715   : > { %v2672_v22 = vadd.f32 1e-05, %v2644_v2  ;;  %v2642_v45 = vsub.f32 %v3069_v24, %v2634_v32  ;;  %v2632_v13 = vpop.permute.xlu1 %2631 }
 0x716   : > { %v3195_v30 = vpop.eup %3194  ;;  %v2671_v36 = vadd.f32 1e-05, %v2643_v44  ;;  %v2641_v8 = vsub.f32 %v2610_v16, %v2632_v13 }
 0x717   : > { %3198 = vrsqrt.f32 %v2672_v22  ;;  %2162 = vperm.xlu1 %3173, %v3195_v30   ;;  %v2646_v42 = vmax.f32 %v2642_v45, 0.0  ;;  %v3197_v60 = vpop.eup %3196 }
 0x718   : > { %3200 = vrsqrt.f32 %v2671_v36  ;;  %v2645_v31 = vmax.f32 %v2641_v8, 0.0 }
 0x719   : > { %v2674_v48 = vadd.f32 1e-05, %v2646_v42 }
 0x71a   : > { %v2673_v10 = vadd.f32 1e-05, %v2645_v31 }
 0x71b   : > { %2157 = vperm.xlu1 %3173, %v3197_v60  }
 0x71c   : > { %3202 = vrsqrt.f32 %v2673_v10 }
 0x71d   : > { %3204 = vrsqrt.f32 %v2674_v48 }
 0x721   : > { %v3199_v47 = vpop.eup %3198 }
 0x722   : > { %v3201_v21 = vpop.eup %3200  ;;  %2686 = vperm.xlu0 %3172, %v3199_v47  }
 0x723   : > { %2681 = vperm.xlu1 %3173, %v3201_v21  }
 0x725   : > { %v2121_v57 = vpop.permute.xlu0 %2120 }
 0x726   : > { %v3203_v1 = vpop.eup %3202  ;;  %v2116_v33 = vpop.permute.xlu1 %2115  ;;  %v2134_v9 = vsub.f32 %v4714_v14, %v2121_v57 }
 0x727   : > { %2691 = vperm.xlu1 %3173, %v3203_v1   ;;  %v3205_v50 = vpop.eup %3204  ;;  %v2133_v24 = vsub.f32 %v4719_v62, %v2116_v33 }
 0x729   : > { %v2131_v26 = vpop.permute.xlu0 %2130 }
 0x72a   : > { %v2126_v63 = vpop.permute.xlu1 %2125  ;;  %v2136_v46 = vsub.f32 %v4748_v18, %v2131_v26 }
 0x72b   : > { %2696 = vperm.xlu1 %3173, %v3205_v50   ;;  %v2135_v41 = vsub.f32 %v4730_v27, %v2126_v63 }
 0x72d   : > { %v2650_v23 = vpop.permute.xlu0 %2649 }
 0x72e   : > { %v2655_v54 = vpop.permute.xlu1 %2654  ;;  %v2667_v53 = vsub.f32 %v4757_v61, %v2650_v23 }
 0x72f   : > { %v2668_v56 = vsub.f32 %v4762_v15, %v2655_v54 }
 0x731   : > { %v2665_v17 = vpop.permute.xlu0 %2664 }
 0x732   : > { %v2660_v28 = vpop.permute.xlu1 %2659  ;;  %v2670_v18 = vsub.f32 %v4750_v35, %v2665_v17 }
 0x733   : > { %v2669_v5 = vsub.f32 %v4766_v7, %v2660_v28 }
 0x791   : > { %v2153_v6 = vpop.permute.xlu0 %2152 }
 0x792   : > { %v2148_v43 = vpop.permute.xlu1 %2147  ;;  %v2166_v49 = vmul.f32 %v2153_v6, %v2134_v9 }
 0x793   : > { %v2165_v16 = vmul.f32 %v2148_v43, %v2133_v24 }
 0x794   : > { %v2174_v29 = vmul.f32 0.2, %v2166_v49  ;;  %vm2170_vm9 = vcmp.ge.f32.partialorder %v2166_v49, 0.0 }
 0x795   : > { %v2173_v52 = vmul.f32 0.2, %v2165_v16  ;;  %vm2169_vm10 = vcmp.ge.f32.partialorder %v2165_v16, 0.0 }
 0x796   : > { %v2163_v25 = vpop.permute.xlu1 %2162  ;;  %v2178_v61 = vsel %vm2170_vm9, %v2166_v49, %v2174_v29 }
 0x797   : > { %v2177_v40 = vsel %vm2169_vm10, %v2165_v16, %v2173_v52  ;;  %v2168_v0 = vmul.f32 %v2163_v25, %v2136_v46 }
 0x799   : > { %v2176_v59 = vmul.f32 0.2, %v2168_v0  ;;  %vm2172_vm0 = vcmp.ge.f32.partialorder %v2168_v0, 0.0 }
 0x79a   : > { %v2158_v12 = vpop.permute.xlu1 %2157 }
 0x79b   : > { %v2167_v14 = vmul.f32 %v2158_v12, %v2135_v41  ;;  %v2180_v35 = vsel %vm2172_vm0, %v2168_v0, %v2176_v59 }
 0x79d   : > { %v2175_v38 = vmul.f32 0.2, %v2167_v14  ;;  %vm2171_vm14 = vcmp.ge.f32.partialorder %v2167_v14, 0.0 }
 0x79f   : > { %v2179_v55 = vsel %vm2171_vm14, %v2167_v14, %v2175_v38 }
 0x7a1   : > { %v2687_v3 = vpop.permute.xlu0 %2686 }
 0x7a2   : > { %v2700_v11 = vmul.f32 %v2687_v3, %v2668_v56  ;;  %v2682_v58 = vpop.permute.xlu1 %2681 }
 0x7a3   : > { %v2699_v62 = vmul.f32 %v2682_v58, %v2667_v53 }
 0x7a4   : > { %vm2704_vm11 = vcmp.ge.f32.partialorder %v2700_v11, 0.0  ;;  %v2708_v15 = vmul.f32 0.2, %v2700_v11 }
 0x7a5   : > { %vm2703_vm12 = vcmp.ge.f32.partialorder %v2699_v62, 0.0  ;;  %v2707_v27 = vmul.f32 0.2, %v2699_v62 }
 0x7a6   : > { %v2712_v20 = vsel %vm2704_vm11, %v2700_v11, %v2708_v15  ;;  %v2692_v37 = vpop.permute.xlu1 %2691 }
 0x7a7   : > { %v2716_v34 = vadd.f32 %v2712_v20, %v2178_v61  ;;  %v2711_v51 = vsel %vm2703_vm12, %v2699_v62, %v2707_v27  ;;  %v2701_v39 = vmul.f32 %v2692_v37, %v2669_v5 }
 0x7a8   : > { %v2715_v19 = vadd.f32 %v2711_v51, %v2177_v40 }
 0x7a9   : > { %2720 = vst.msk [vmem:[%s217_s10 + $0x8] sm:$0xff] %vm1632_vm13, %v2716_v34  ;;  %vm2705_vm15 = vcmp.ge.f32.partialorder %v2701_v39, 0.0  ;;  %v2709_v7 = vmul.f32 0.2, %v2701_v39 }
 0x7aa   : > { %2719 = vst.msk [vmem:[%s217_s10] sm:$0xff] %vm1632_vm13, %v2715_v19  ;;  %v2697_v4 = vpop.permute.xlu1 %2696 }
 0x7ab   : > { %v2713_v2 = vsel %vm2705_vm15, %v2701_v39, %v2709_v7  ;;  %v2702_v44 = vmul.f32 %v2697_v4, %v2670_v18 }
 0x7ac   : > { %v2717_v32 = vadd.f32 %v2713_v2, %v2179_v55 }
 0x7ad   : > { %vm2706_vm1 = vcmp.ge.f32.partialorder %v2702_v44, 0.0  ;;  %v2710_v22 = vmul.f32 0.2, %v2702_v44 }
 0x7ae   : > { %2721 = vst.msk [vmem:[%s217_s10 + $0x10] sm:$0xff] %vm1632_vm13, %v2717_v32 }
 0x7af   : > { %v2714_v45 = vsel %vm2706_vm1, %v2702_v44, %v2710_v22 }
 0x7b0   : > { %v2718_v13 = vadd.f32 %v2714_v45, %v2180_v35 }
 0x7b2   : > { %2722 = vst.msk [vmem:[%s217_s10 + $0x18] sm:$0xff] %vm1632_vm13, %v2718_v13 }
 0x7b3   : > { %3219 = shalt.err (!%p3216_p3)
}
 0x7b4   : > { %s3220_s26 = scalar_lea.hbm %s4844_s15, 512  ;;  %s3224_s30 = scalar_lea.hbm %s4898_s5, 1024 }
 0x7b5   : > { %p3221_p4 = scmp.ne.s32.totalorder %s4844_s15, %s3220_s26  ;;  %p3225_p9 = scmp.lt.u32.totalorder %s4844_s15, %s4898_s5 }
 0x7b6   : > { %p3226_p10 = scmp.lt.u32.totalorder %s3224_s30, %s3220_s26  ;;  %p3228_p12 = scmp.lt.u32.totalorder %s3220_s26, %s4844_s15 }
 0x7b7   : > { %p3222_p7 = pnand %p3221_p4, %p3346_p5 }
 0x7b8   : > { %p3227_p11 = por %p3226_p10, %p3225_p9 }
 0x7b9   : > { %p3223_p8 = pneg %p3222_p7 }
 0x7ba   : > { %p3229_p13 = por %p3228_p12, %p3227_p11 }
 0x7bc   : > { %p3230_p0 = pnand %p3229_p13, %p3223_p8 }
 0x7be   : > { %3233 = shalt.err (!%p3230_p0)
}
 0x7bf   : > { %s3277_s9 = smov 128  }
 0x7c0   : > { %3118 = dma.vmem_to_hbm [thread:$0]  (%p3346_p5), %s4846_s12, 512, %s4844_s15, %s4851_s22, %s3277_s9, %s3277_s9, %s3271_s11  }
 0x7c1 PF: > { %p3124_p1 = scmp.ge.s32.totalorder %s3268_s21, 2  ;;  %s2752_s13 = sand.u32 1, %s3256_s18  }
 0x7c2   : > { %s2753_s14 = scalar_lea.sflag [#allocation3], %s2752_s13 }
 0x7c3   : > { %p3121_p2 = pnand %p3124_p1, %p3350_p6 }
 0x7c5   : > { %3251 = dma.done.wait (!%p3121_p2), %s2753_s14, 512  }
 0x7c6   : > { %3253 = vsyncadd (!%p3121_p2), %s2753_s14, 4294966784  ;;  %p15_p3 = scmp.ge.s32.totalorder %s3333_s24, 4   ;;  %s5058_s18 = smov %s3260_s19 }
 0x7c7   : > { %s5059_s19 = smov %s3264_s20  ;;  %s5060_s20 = smov %s3344_s27 }
 0x7c8   : > { %s5061_s21 = smov %s3333_s24  ;;  %17 = sbr.rel (!%p15_p3) target bundleno = 3 (0x3), region = 91 }
 0x7cf   :  { %2758 = vsyncpa [#allocation3], 1 }
 0x7d0   :  { %2760 = vsyncpa [#allocation3 + $0x1], 1 }

</bundles_post_ra>
